<compile_context>
chip_gen: v7x
topology: tpu7x:2x2x1
jax: 0.10.0
libtpu: 0.0.40
codegen_flags: <defaults>
</compile_context>

<pallas_src>
import math
from functools import partial

import jax
import jax.numpy as jnp
import numpy as np
from jax.experimental import pallas as pl
from jax.experimental.pallas import tpu as pltpu


def _cdiv(a, b):
    return -(-a // b)


def _round_up(v, m):
    return _cdiv(v, m) * m


def _tpu_params():
    """Per-generation knobs (MXU width, VMEM cap) from the local device kind."""
    try:
        kind = jax.devices()[0].device_kind.lower()
    except Exception:  # pragma: no cover - defensive only
        kind = ""
    is_v7 = ("v7" in kind) or ("7x" in kind)
    wide_mxu = is_v7 or ("v6" in kind)              # 256-wide MXU on v6e / v7x
    # Leave headroom: v7x has 64 MiB/core (cap at 48), v5e/v6e have 128 MiB.
    vmem_cap = (48 if is_v7 else 100) * (1 << 20)
    mtile = 256 if wide_mxu else 128                # matmul-M target per chunk
    return wide_mxu, mtile, vmem_cap


# ----------------------------- fused Pallas kernel ---------------------------

def _make_block_kernel(stride, Ho, Wo, Cin_p, nb, row_chunks):
    """relu(pw1x1(relu(dw3x3(x) + b_dw)) + b_pw), fused.

    Grid = (batch_groups, cout_tiles).  The depthwise result for a group of
    `nb` images is computed once (at j == 0) into a bf16 VMEM scratch, in row
    chunks whose pointwise matmul is issued right away (VPU/MXU overlap), and
    reused for every remaining Cout tile (j > 0).
    """
    s = int(stride)
    HWo = Ho * Wo
    M = nb * HWo
    taps = [(dy, dx) for dy in range(3) for dx in range(3)]

    def kernel(xph_ref, wdw_ref, bdw_ref, wpw_ref, bpw_ref, o_ref, dw_ref):
        j = pl.program_id(1)

        def pw_rows(m0, mm):
            # pointwise 1x1 conv on a row block = bf16 MXU matmul, f32 acc.
            out = jnp.dot(dw_ref[m0:m0 + mm, :], wpw_ref[...],
                          preferred_element_type=jnp.float32)
            out = jnp.maximum(out + bpw_ref[...], 0.0)
            o_ref[0, m0:m0 + mm, :] = out.astype(o_ref.dtype)

        @pl.when(j == 0)
        def _():
            # Depthwise 3x3 + ReLU, computed ONCE per batch group, in chunks.
            # Each chunk's matmul is emitted immediately after its MAC so the
            # MXU (chunk t) can overlap the VPU MAC (chunk t+1).
            for b in range(nb):
                for (r0, rc) in row_chunks:
                    acc = jnp.zeros((rc, Wo, Cin_p), jnp.float32)
                    for k, (dy, dx) in enumerate(taps):
                        ph = (dy % s) * s + (dx % s)   # space-to-depth phase
                        rr, cc = dy // s, dx // s      # static offsets in phase
                        tap = xph_ref[b, ph,
                                      r0 + rr:r0 + rr + rc,
                                      cc:cc + Wo, :].astype(jnp.float32)
                        # TODO(synk): replace the cc-shifted (sublane) slices
                        # with pltpu.roll on full-width row slabs to cut the
                        # VPU-phase copy/select work.
                        acc = acc + tap * wdw_ref[k]   # wdw_ref[k]: (1, Cin_p)
                    acc = jnp.maximum(acc + bdw_ref[...], 0.0)
                    m0, mm = b * HWo + r0 * Wo, rc * Wo
                    dw_ref[m0:m0 + mm, :] = (
                        acc.reshape(mm, Cin_p).astype(dw_ref.dtype))
                    pw_rows(m0, mm)

        @pl.when(j > 0)
        def _():
            # Reuse the depthwise result for the remaining Cout tiles.
            # NOTE: this relies on the j axis staying 'arbitrary' (each core
            # runs j = 0..J-1 in order for every group g).
            pw_rows(0, M)

    return kernel


# --------------------------------- wrapper -----------------------------------

@partial(jax.jit, static_argnames=("stride",))
def block_forward(x_nchw, params, stride=1):
    """PyTorch Block forward.  x: NCHW f32 -> NCHW f32."""
    if isinstance(stride, tuple):
        assert stride[0] == stride[1], "only square strides supported"
        s = int(stride[0])
    else:
        s = int(stride)

    w_dw, b_dw = params["w_dw"], params["b_dw"]     # (3,3,Cin), (Cin,)
    w_pw, b_pw = params["w_pw"], params["b_pw"]     # (Cin,Cout), (Cout,)

    N, Cin, H, W = x_nchw.shape
    Cout = w_pw.shape[1]
    Ho = (H + 2 - 3) // s + 1
    Wo = (W + 2 - 3) // s + 1
    HWo = Ho * Wo
    ss = s * s
    Hph, Wph = Ho + 2, Wo + 2

    wide_mxu, mtile, vmem_cap = _tpu_params()

    # lane-dense channel padding (padded lanes stay exactly zero end-to-end)
    Cin_p = _round_up(Cin, 128)
    Cout_p = _round_up(Cout, 128)
    tn = 256 if (wide_mxu and Cout_p % 256 == 0) else 128

    # Fold `nb` images into one grid step so the matmul M dim (= nb*HWo) fills
    # the MXU for small spatial maps; cap nb by a VMEM budget on the
    # (double-buffered) padded-activation block.
    img_bytes = ss * Hph * Wph * Cin_p * 2
    nb = max(1, min(N, _cdiv(mtile, HWo), max(1, (8 << 20) // img_bytes)))
    N_pad = _cdiv(N, nb) * nb
    G = N_pad // nb
    M = nb * HWo

    # Row chunks: ~mtile matmul rows per chunk; force >= 2 chunks per group
    # (when possible) so the dw/pw phases can interleave; bound the unroll.
    chunks_per_img = max(1, _cdiv(HWo, mtile))
    if nb * chunks_per_img < 2 and Ho >= 2:
        chunks_per_img = 2
    chunks_per_img = min(chunks_per_img, Ho, 8)
    rc = _cdiv(Ho, chunks_per_img)
    row_chunks = [(r0, min(rc, Ho - r0)) for r0 in range(0, Ho, rc)]
    # TODO(synk): pad Wo (or the row chunk) so every chunk's M offset stays a
    # multiple of 8 when Wo % 8 != 0 (avoids a sublane relayout copy).

    # NCHW -> NHWC bf16, then ONE fused pad: batch pad (to nb multiple) +
    # conv pad=1 + channel pad.  For stride==1 the phase decomposition is the
    # identity, so no extra reshape/transpose pass over the activation.
    # TODO(synk): keep the whole model NHWC/bf16 to delete both transposes.
    x = jnp.transpose(x_nchw.astype(jnp.bfloat16), (0, 2, 3, 1))
    xp = jnp.pad(x, ((0, N_pad - N),
                     (1, s * Hph - H - 1),
                     (1, s * Wph - W - 1),
                     (0, Cin_p - Cin)))
    if s == 1:
        xph = xp.reshape(N_pad, 1, Hph, Wph, Cin_p)
    else:
        # space-to-depth phase decomposition so every one of the 9 depthwise
        # taps is a contiguous in-kernel slice even for stride > 1:
        #   xph[n, py*s+px, r, c, ch] == x_padded[n, s*r+py, s*c+px, ch]
        xph = (xp.reshape(N_pad, Hph, s, Wph, s, Cin_p)
                 .transpose(0, 2, 4, 1, 3, 5)
                 .reshape(N_pad, ss, Hph, Wph, Cin_p))

    # depthwise params stay f32 (VPU path); pointwise weight is the bf16 MXU operand
    wdw = jnp.zeros((9, 1, Cin_p), jnp.float32).at[:, 0, :Cin].set(
        w_dw.reshape(9, Cin).astype(jnp.float32))
    bdw = jnp.zeros((1, Cin_p), jnp.float32).at[0, :Cin].set(
        b_dw.astype(jnp.float32))
    wpw = jnp.zeros((Cin_p, Cout_p), jnp.bfloat16).at[:Cin, :Cout].set(
        w_pw.astype(jnp.bfloat16))
    bpw = jnp.zeros((1, Cout_p), jnp.float32).at[0, :Cout].set(
        b_pw.astype(jnp.float32))

    # VMEM budget (double-buffered blocks + scratch), capped per generation.
    # TODO(synk): row-halo spatial tiling (manual DMA) when a full padded image
    # group does not fit the per-generation VMEM cap (not needed at MobileNet
    # feature-map sizes).
    est = (2 * (nb * img_bytes                     # xph block
                + Cin_p * tn * 2                   # w_pw tile (bf16)
                + M * tn * 2                       # out tile (bf16 now)
                + (9 * Cin_p + Cin_p + tn) * 4)    # small constant blocks
           + M * Cin_p * 2)                        # dw scratch (single buffer)
    vmem_limit = int(min(vmem_cap, max(32 << 20, 2 * est)))

    kernel = _make_block_kernel(s, Ho, Wo, Cin_p, nb, row_chunks)
    out = pl.pallas_call(
        kernel,
        out_shape=jax.ShapeDtypeStruct((G, M, Cout_p), jnp.bfloat16),
        grid_spec=pltpu.PrefetchScalarGridSpec(
            num_scalar_prefetch=0,
            grid=(G, Cout_p // tn),
            in_specs=[
                pl.BlockSpec((nb, ss, Hph, Wph, Cin_p),
                             lambda g, j: (g, 0, 0, 0, 0)),
                pl.BlockSpec((9, 1, Cin_p), lambda g, j: (0, 0, 0)),
                pl.BlockSpec((1, Cin_p), lambda g, j: (0, 0)),
                pl.BlockSpec((Cin_p, tn), lambda g, j: (0, j)),
                pl.BlockSpec((1, tn), lambda g, j: (0, j)),
            ],
            out_specs=pl.BlockSpec((1, M, tn), lambda g, j: (g, 0, j)),
            scratch_shapes=[pltpu.VMEM((M, Cin_p), jnp.bfloat16)],
        ),
        compiler_params=pltpu.CompilerParams(
            # dw_ref reuse at j > 0 requires the j axis to stay 'arbitrary'.
            # TODO(synk): for v7x batch-1 inference, mark j parallel and
            # recompute the (cheap) depthwise per Cout tile to use both cores.
            dimension_semantics=("parallel", "arbitrary"),
            vmem_limit_bytes=vmem_limit,
        ),
    )(xph, wdw, bdw, wpw, bpw)

    out = out.reshape(N_pad, HWo, Cout_p)[:N, :, :Cout].reshape(N, Ho, Wo, Cout)
    # Interface stays NCHW f32 like the PyTorch module; the kernel's own HBM
    # writeback above is bf16 (half the store traffic).
    return jnp.transpose(out, (0, 3, 1, 2)).astype(jnp.float32)


# --------------------- params + pure-JAX reference (checking) ----------------

def init_block_params(key, in_planes, out_planes):
    k1, k2, k3, k4 = jax.random.split(key, 4)
    return {
        "w_dw": math.sqrt(2.0 / 9.0)
        * jax.random.normal(k1, (3, 3, in_planes), jnp.float32),
        "b_dw": 0.1 * jax.random.normal(k2, (in_planes,), jnp.float32),
        "w_pw": math.sqrt(2.0 / in_planes)
        * jax.random.normal(k3, (in_planes, out_planes), jnp.float32),
        "b_pw": 0.1 * jax.random.normal(k4, (out_planes,), jnp.float32),
    }


def _ref_block(x_nchw, params, stride):
    """Pure-JAX reference: depthwise 3x3 (pad=1) + ReLU -> pointwise 1x1 + ReLU."""
    dn = ("NHWC", "HWIO", "NHWC")
    s = int(stride)
    x = jnp.transpose(x_nchw, (0, 2, 3, 1)).astype(jnp.float32)
    Cin = x.shape[-1]
    wd = params["w_dw"].reshape(3, 3, 1, Cin)
    y = jax.lax.conv_general_dilated(x, wd, (s, s), [(1, 1), (1, 1)],
                                     dimension_numbers=dn, feature_group_count=Cin)
    x = jax.nn.relu(y + params["b_dw"])
    wp = params["w_pw"][None, None]
    y = jax.lax.conv_general_dilated(x, wp, (1, 1), [(0, 0), (0, 0)],
                                     dimension_numbers=dn)
    x = jax.nn.relu(y + params["b_pw"])
    return jnp.transpose(x, (0, 3, 1, 2))


if __name__ == "__main__":
    key = jax.random.PRNGKey(0)
    configs = [
        # (in_planes, out_planes, H, W, stride)
        (128, 256, 16, 16, 1),   # standard block
        (128, 256, 16, 16, 2),   # strided block (space-to-depth phases, nb=2 folding)
        (32, 64, 16, 16, 1),     # exercises channel padding (Cin/Cout < 128)
    ]
    for cin, cout, H, W, s in configs:
        key, kx, kp = jax.random.split(key, 3)
        x = jax.random.normal(kx, (2, cin, H, W), jnp.float32)
        params = init_block_params(kp, cin, cout)

        out = jax.block_until_ready(block_forward(x, params, stride=s))
        ref = jax.block_until_ready(_ref_block(x, params, s))
        assert out.shape == ref.shape, (out.shape, ref.shape)

        scale = float(jnp.max(jnp.abs(ref))) + 1e-30
        # tolerance sized for bf16 activations / bf16 output with f32 accumulation
        np.testing.assert_allclose(np.asarray(out), np.asarray(ref),
                                   rtol=1e-2, atol=1e-2 * scale)
    print("KERNEL_OK")
</pallas_src>

<mosaic_0001>
module attributes {stable_mosaic.version = 11 : i64} {
  func.func @kernel(%arg0: i32, %arg1: i32, %arg2: memref<1x1x18x18x128xbf16, #tpu.memory_space<vmem>>, %arg3: memref<9x1x128xf32, #tpu.memory_space<vmem>>, %arg4: memref<1x128xf32, #tpu.memory_space<vmem>>, %arg5: memref<128x128xbf16, #tpu.memory_space<vmem>>, %arg6: memref<1x128xf32, #tpu.memory_space<vmem>>, %arg7: memref<1x256x128xbf16, #tpu.memory_space<vmem>>, %arg8: memref<256x128xbf16, #tpu.memory_space<vmem>>) attributes {dimension_semantics = [#tpu.dimension_semantics<parallel>, #tpu.dimension_semantics<arbitrary>], iteration_bounds = array<i64: 2, 2>, scalar_prefetch = 0 : i64, scratch_operands = 1 : i64, tpu.core_type = #tpu.core_type<tc>, window_params = [{transform_indices = @transform_0, window_bounds = array<i64: 1, 1, 18, 18, 128>}, {pipeline_mode = #tpu.pipeline_mode<synchronous>, transform_indices = @transform_1, window_bounds = array<i64: 9, 1, 128>}, {pipeline_mode = #tpu.pipeline_mode<synchronous>, transform_indices = @transform_2, window_bounds = array<i64: 1, 128>}, {transform_indices = @transform_3, window_bounds = array<i64: 128, 128>}, {transform_indices = @transform_4, window_bounds = array<i64: 1, 128>}, {transform_indices = @transform_5, window_bounds = array<i64: 1, 256, 128>}]} {
    %c0_i32 = arith.constant 0 : i32
    %0 = arith.cmpi eq, %arg1, %c0_i32 : i32
    %1 = arith.extui %0 : i1 to i32
    %c0_i32_0 = arith.constant 0 : i32
    %2 = arith.cmpi ne, %1, %c0_i32_0 : i32
    scf.if %2 {
      %cst = arith.constant 0.000000e+00 : f32
      %6 = vector.broadcast %cst : f32 to vector<8x16x128xf32>
      %c0 = arith.constant 0 : index
      %c0_3 = arith.constant 0 : index
      %c0_4 = arith.constant 0 : index
      %c0_5 = arith.constant 0 : index
      %c0_6 = arith.constant 0 : index
      %7 = vector.load %arg2[%c0, %c0_3, %c0_4, %c0_5, %c0_6] : memref<1x1x18x18x128xbf16, #tpu.memory_space<vmem>>, vector<1x1x8x16x128xbf16>
      %8 = vector.shape_cast %7 : vector<1x1x8x16x128xbf16> to vector<8x16x128xbf16>
      %9 = arith.extf %8 : vector<8x16x128xbf16> to vector<8x16x128xf32>
      %c0_7 = arith.constant 0 : index
      %c0_8 = arith.constant 0 : index
      %c0_9 = arith.constant 0 : index
      %10 = vector.load %arg3[%c0_7, %c0_8, %c0_9] : memref<9x1x128xf32, #tpu.memory_space<vmem>>, vector<1x1x128xf32>
      %11 = vector.shape_cast %10 : vector<1x1x128xf32> to vector<1x128xf32>
      %12 = vector.shape_cast %11 : vector<1x128xf32> to vector<1x1x128xf32>
      %13 = vector.broadcast %12 : vector<1x1x128xf32> to vector<8x16x128xf32>
      %14 = arith.mulf %9, %13 : vector<8x16x128xf32>
      %15 = arith.addf %6, %14 : vector<8x16x128xf32>
      %c0_10 = arith.constant 0 : index
      %c0_11 = arith.constant 0 : index
      %c0_12 = arith.constant 0 : index
      %c1 = arith.constant 1 : index
      %c0_13 = arith.constant 0 : index
      %16 = vector.load %arg2[%c0_10, %c0_11, %c0_12, %c1, %c0_13] : memref<1x1x18x18x128xbf16, #tpu.memory_space<vmem>>, vector<1x1x8x16x128xbf16>
      %17 = vector.shape_cast %16 : vector<1x1x8x16x128xbf16> to vector<8x16x128xbf16>
      %18 = arith.extf %17 : vector<8x16x128xbf16> to vector<8x16x128xf32>
      %c1_14 = arith.constant 1 : index
      %c0_15 = arith.constant 0 : index
      %c0_16 = arith.constant 0 : index
      %19 = vector.load %arg3[%c1_14, %c0_15, %c0_16] : memref<9x1x128xf32, #tpu.memory_space<vmem>>, vector<1x1x128xf32>
      %20 = vector.shape_cast %19 : vector<1x1x128xf32> to vector<1x128xf32>
      %21 = vector.shape_cast %20 : vector<1x128xf32> to vector<1x1x128xf32>
      %22 = vector.broadcast %21 : vector<1x1x128xf32> to vector<8x16x128xf32>
      %23 = arith.mulf %18, %22 : vector<8x16x128xf32>
      %24 = arith.addf %15, %23 : vector<8x16x128xf32>
      %c0_17 = arith.constant 0 : index
      %c0_18 = arith.constant 0 : index
      %c0_19 = arith.constant 0 : index
      %c2 = arith.constant 2 : index
      %c0_20 = arith.constant 0 : index
      %25 = vector.load %arg2[%c0_17, %c0_18, %c0_19, %c2, %c0_20] : memref<1x1x18x18x128xbf16, #tpu.memory_space<vmem>>, vector<1x1x8x16x128xbf16>
      %26 = vector.shape_cast %25 : vector<1x1x8x16x128xbf16> to vector<8x16x128xbf16>
      %27 = arith.extf %26 : vector<8x16x128xbf16> to vector<8x16x128xf32>
      %c2_21 = arith.constant 2 : index
      %c0_22 = arith.constant 0 : index
      %c0_23 = arith.constant 0 : index
      %28 = vector.load %arg3[%c2_21, %c0_22, %c0_23] : memref<9x1x128xf32, #tpu.memory_space<vmem>>, vector<1x1x128xf32>
      %29 = vector.shape_cast %28 : vector<1x1x128xf32> to vector<1x128xf32>
      %30 = vector.shape_cast %29 : vector<1x128xf32> to vector<1x1x128xf32>
      %31 = vector.broadcast %30 : vector<1x1x128xf32> to vector<8x16x128xf32>
      %32 = arith.mulf %27, %31 : vector<8x16x128xf32>
      %33 = arith.addf %24, %32 : vector<8x16x128xf32>
      %c0_24 = arith.constant 0 : index
      %c0_25 = arith.constant 0 : index
      %c1_26 = arith.constant 1 : index
      %c0_27 = arith.constant 0 : index
      %c0_28 = arith.constant 0 : index
      %34 = vector.load %arg2[%c0_24, %c0_25, %c1_26, %c0_27, %c0_28] : memref<1x1x18x18x128xbf16, #tpu.memory_space<vmem>>, vector<1x1x8x16x128xbf16>
      %35 = vector.shape_cast %34 : vector<1x1x8x16x128xbf16> to vector<8x16x128xbf16>
      %36 = arith.extf %35 : vector<8x16x128xbf16> to vector<8x16x128xf32>
      %c3 = arith.constant 3 : index
      %c0_29 = arith.constant 0 : index
      %c0_30 = arith.constant 0 : index
      %37 = vector.load %arg3[%c3, %c0_29, %c0_30] : memref<9x1x128xf32, #tpu.memory_space<vmem>>, vector<1x1x128xf32>
      %38 = vector.shape_cast %37 : vector<1x1x128xf32> to vector<1x128xf32>
      %39 = vector.shape_cast %38 : vector<1x128xf32> to vector<1x1x128xf32>
      %40 = vector.broadcast %39 : vector<1x1x128xf32> to vector<8x16x128xf32>
      %41 = arith.mulf %36, %40 : vector<8x16x128xf32>
      %42 = arith.addf %33, %41 : vector<8x16x128xf32>
      %c0_31 = arith.constant 0 : index
      %c0_32 = arith.constant 0 : index
      %c1_33 = arith.constant 1 : index
      %c1_34 = arith.constant 1 : index
      %c0_35 = arith.constant 0 : index
      %43 = vector.load %arg2[%c0_31, %c0_32, %c1_33, %c1_34, %c0_35] : memref<1x1x18x18x128xbf16, #tpu.memory_space<vmem>>, vector<1x1x8x16x128xbf16>
      %44 = vector.shape_cast %43 : vector<1x1x8x16x128xbf16> to vector<8x16x128xbf16>
      %45 = arith.extf %44 : vector<8x16x128xbf16> to vector<8x16x128xf32>
      %c4 = arith.constant 4 : index
      %c0_36 = arith.constant 0 : index
      %c0_37 = arith.constant 0 : index
      %46 = vector.load %arg3[%c4, %c0_36, %c0_37] : memref<9x1x128xf32, #tpu.memory_space<vmem>>, vector<1x1x128xf32>
      %47 = vector.shape_cast %46 : vector<1x1x128xf32> to vector<1x128xf32>
      %48 = vector.shape_cast %47 : vector<1x128xf32> to vector<1x1x128xf32>
      %49 = vector.broadcast %48 : vector<1x1x128xf32> to vector<8x16x128xf32>
      %50 = arith.mulf %45, %49 : vector<8x16x128xf32>
      %51 = arith.addf %42, %50 : vector<8x16x128xf32>
      %c0_38 = arith.constant 0 : index
      %c0_39 = arith.constant 0 : index
      %c1_40 = arith.constant 1 : index
      %c2_41 = arith.constant 2 : index
      %c0_42 = arith.constant 0 : index
      %52 = vector.load %arg2[%c0_38, %c0_39, %c1_40, %c2_41, %c0_42] : memref<1x1x18x18x128xbf16, #tpu.memory_space<vmem>>, vector<1x1x8x16x128xbf16>
      %53 = vector.shape_cast %52 : vector<1x1x8x16x128xbf16> to vector<8x16x128xbf16>
      %54 = arith.extf %53 : vector<8x16x128xbf16> to vector<8x16x128xf32>
      %c5 = arith.constant 5 : index
      %c0_43 = arith.constant 0 : index
      %c0_44 = arith.constant 0 : index
      %55 = vector.load %arg3[%c5, %c0_43, %c0_44] : memref<9x1x128xf32, #tpu.memory_space<vmem>>, vector<1x1x128xf32>
      %56 = vector.shape_cast %55 : vector<1x1x128xf32> to vector<1x128xf32>
      %57 = vector.shape_cast %56 : vector<1x128xf32> to vector<1x1x128xf32>
      %58 = vector.broadcast %57 : vector<1x1x128xf32> to vector<8x16x128xf32>
      %59 = arith.mulf %54, %58 : vector<8x16x128xf32>
      %60 = arith.addf %51, %59 : vector<8x16x128xf32>
      %c0_45 = arith.constant 0 : index
      %c0_46 = arith.constant 0 : index
      %c2_47 = arith.constant 2 : index
      %c0_48 = arith.constant 0 : index
      %c0_49 = arith.constant 0 : index
      %61 = vector.load %arg2[%c0_45, %c0_46, %c2_47, %c0_48, %c0_49] : memref<1x1x18x18x128xbf16, #tpu.memory_space<vmem>>, vector<1x1x8x16x128xbf16>
      %62 = vector.shape_cast %61 : vector<1x1x8x16x128xbf16> to vector<8x16x128xbf16>
      %63 = arith.extf %62 : vector<8x16x128xbf16> to vector<8x16x128xf32>
      %c6 = arith.constant 6 : index
      %c0_50 = arith.constant 0 : index
      %c0_51 = arith.constant 0 : index
      %64 = vector.load %arg3[%c6, %c0_50, %c0_51] : memref<9x1x128xf32, #tpu.memory_space<vmem>>, vector<1x1x128xf32>
      %65 = vector.shape_cast %64 : vector<1x1x128xf32> to vector<1x128xf32>
      %66 = vector.shape_cast %65 : vector<1x128xf32> to vector<1x1x128xf32>
      %67 = vector.broadcast %66 : vector<1x1x128xf32> to vector<8x16x128xf32>
      %68 = arith.mulf %63, %67 : vector<8x16x128xf32>
      %69 = arith.addf %60, %68 : vector<8x16x128xf32>
      %c0_52 = arith.constant 0 : index
      %c0_53 = arith.constant 0 : index
      %c2_54 = arith.constant 2 : index
      %c1_55 = arith.constant 1 : index
      %c0_56 = arith.constant 0 : index
      %70 = vector.load %arg2[%c0_52, %c0_53, %c2_54, %c1_55, %c0_56] : memref<1x1x18x18x128xbf16, #tpu.memory_space<vmem>>, vector<1x1x8x16x128xbf16>
      %71 = vector.shape_cast %70 : vector<1x1x8x16x128xbf16> to vector<8x16x128xbf16>
      %72 = arith.extf %71 : vector<8x16x128xbf16> to vector<8x16x128xf32>
      %c7 = arith.constant 7 : index
      %c0_57 = arith.constant 0 : index
      %c0_58 = arith.constant 0 : index
      %73 = vector.load %arg3[%c7, %c0_57, %c0_58] : memref<9x1x128xf32, #tpu.memory_space<vmem>>, vector<1x1x128xf32>
      %74 = vector.shape_cast %73 : vector<1x1x128xf32> to vector<1x128xf32>
      %75 = vector.shape_cast %74 : vector<1x128xf32> to vector<1x1x128xf32>
      %76 = vector.broadcast %75 : vector<1x1x128xf32> to vector<8x16x128xf32>
      %77 = arith.mulf %72, %76 : vector<8x16x128xf32>
      %78 = arith.addf %69, %77 : vector<8x16x128xf32>
      %c0_59 = arith.constant 0 : index
      %c0_60 = arith.constant 0 : index
      %c2_61 = arith.constant 2 : index
      %c2_62 = arith.constant 2 : index
      %c0_63 = arith.constant 0 : index
      %79 = vector.load %arg2[%c0_59, %c0_60, %c2_61, %c2_62, %c0_63] : memref<1x1x18x18x128xbf16, #tpu.memory_space<vmem>>, vector<1x1x8x16x128xbf16>
      %80 = vector.shape_cast %79 : vector<1x1x8x16x128xbf16> to vector<8x16x128xbf16>
      %81 = arith.extf %80 : vector<8x16x128xbf16> to vector<8x16x128xf32>
      %c8 = arith.constant 8 : index
      %c0_64 = arith.constant 0 : index
      %c0_65 = arith.constant 0 : index
      %82 = vector.load %arg3[%c8, %c0_64, %c0_65] : memref<9x1x128xf32, #tpu.memory_space<vmem>>, vector<1x1x128xf32>
      %83 = vector.shape_cast %82 : vector<1x1x128xf32> to vector<1x128xf32>
      %84 = vector.shape_cast %83 : vector<1x128xf32> to vector<1x1x128xf32>
      %85 = vector.broadcast %84 : vector<1x1x128xf32> to vector<8x16x128xf32>
      %86 = arith.mulf %81, %85 : vector<8x16x128xf32>
      %87 = arith.addf %78, %86 : vector<8x16x128xf32>
      %c0_66 = arith.constant 0 : index
      %c0_67 = arith.constant 0 : index
      %88 = vector.load %arg4[%c0_66, %c0_67] : memref<1x128xf32, #tpu.memory_space<vmem>>, vector<1x128xf32>
      %89 = vector.shape_cast %88 : vector<1x128xf32> to vector<1x1x128xf32>
      %90 = vector.broadcast %89 : vector<1x1x128xf32> to vector<8x16x128xf32>
      %91 = arith.addf %87, %90 : vector<8x16x128xf32>
      %cst_68 = arith.constant 0.000000e+00 : f32
      %92 = vector.broadcast %cst_68 : f32 to vector<8x16x128xf32>
      %93 = arith.maximumf %91, %92 : vector<8x16x128xf32>
      %94 = vector.shape_cast %93 : vector<8x16x128xf32> to vector<128x128xf32>
      %95 = arith.truncf %94 : vector<128x128xf32> to vector<128x128xbf16>
      %c0_69 = arith.constant 0 : index
      %c0_70 = arith.constant 0 : index
      %96 = vector.load %arg8[%c0_69, %c0_70] : memref<256x128xbf16, #tpu.memory_space<vmem>>, vector<128x128xbf16>
      tpu.vector_store %arg8[%c0_69, %c0_70], %95 {strides = array<i32>} : memref<256x128xbf16, #tpu.memory_space<vmem>>, vector<128x128xbf16>,
      %c0_71 = arith.constant 0 : index
      %c0_72 = arith.constant 0 : index
      %97 = vector.load %arg8[%c0_71, %c0_72] : memref<256x128xbf16, #tpu.memory_space<vmem>>, vector<128x128xbf16>
      %c0_73 = arith.constant 0 : index
      %c0_74 = arith.constant 0 : index
      %98 = vector.load %arg5[%c0_73, %c0_74] : memref<128x128xbf16, #tpu.memory_space<vmem>>, vector<128x128xbf16>
      %cst_75 = arith.constant dense<0.000000e+00> : vector<128x128xf32>
      %99 = tpu.matmul %97, %98, %cst_75 {dimension_numbers = #tpu.dot_dimension_numbers<[1], [0], [0], [1], [0, 0, 1, 1], [], []>} : vector<128x128xbf16>, vector<128x128xbf16>, vector<128x128xf32> -> vector<128x128xf32>
      %c0_76 = arith.constant 0 : index
      %c0_77 = arith.constant 0 : index
      %100 = vector.load %arg6[%c0_76, %c0_77] : memref<1x128xf32, #tpu.memory_space<vmem>>, vector<1x128xf32>
      %101 = vector.broadcast %100 : vector<1x128xf32> to vector<128x128xf32>
      %102 = arith.addf %99, %101 : vector<128x128xf32>
      %cst_78 = arith.constant 0.000000e+00 : f32
      %103 = vector.broadcast %cst_78 : f32 to vector<128x128xf32>
      %104 = arith.maximumf %102, %103 : vector<128x128xf32>
      %105 = arith.truncf %104 : vector<128x128xf32> to vector<128x128xbf16>
      %c0_79 = arith.constant 0 : index
      %c0_80 = arith.constant 0 : index
      %c0_81 = arith.constant 0 : index
      %106 = vector.load %arg7[%c0_79, %c0_80, %c0_81] : memref<1x256x128xbf16, #tpu.memory_space<vmem>>, vector<1x128x128xbf16>
      %107 = vector.shape_cast %106 : vector<1x128x128xbf16> to vector<128x128xbf16>
      %108 = vector.shape_cast %105 : vector<128x128xbf16> to vector<1x128x128xbf16>
      tpu.vector_store %arg7[%c0_79, %c0_80, %c0_81], %108 {strides = array<i32>} : memref<1x256x128xbf16, #tpu.memory_space<vmem>>, vector<1x128x128xbf16>,
      %cst_82 = arith.constant 0.000000e+00 : f32
      %109 = vector.broadcast %cst_82 : f32 to vector<8x16x128xf32>
      %c0_83 = arith.constant 0 : index
      %c0_84 = arith.constant 0 : index
      %c8_85 = arith.constant 8 : index
      %c0_86 = arith.constant 0 : index
      %c0_87 = arith.constant 0 : index
      %110 = vector.load %arg2[%c0_83, %c0_84, %c8_85, %c0_86, %c0_87] : memref<1x1x18x18x128xbf16, #tpu.memory_space<vmem>>, vector<1x1x8x16x128xbf16>
      %111 = vector.shape_cast %110 : vector<1x1x8x16x128xbf16> to vector<8x16x128xbf16>
      %112 = arith.extf %111 : vector<8x16x128xbf16> to vector<8x16x128xf32>
      %c0_88 = arith.constant 0 : index
      %c0_89 = arith.constant 0 : index
      %c0_90 = arith.constant 0 : index
      %113 = vector.load %arg3[%c0_88, %c0_89, %c0_90] : memref<9x1x128xf32, #tpu.memory_space<vmem>>, vector<1x1x128xf32>
      %114 = vector.shape_cast %113 : vector<1x1x128xf32> to vector<1x128xf32>
      %115 = vector.shape_cast %114 : vector<1x128xf32> to vector<1x1x128xf32>
      %116 = vector.broadcast %115 : vector<1x1x128xf32> to vector<8x16x128xf32>
      %117 = arith.mulf %112, %116 : vector<8x16x128xf32>
      %118 = arith.addf %109, %117 : vector<8x16x128xf32>
      %c0_91 = arith.constant 0 : index
      %c0_92 = arith.constant 0 : index
      %c8_93 = arith.constant 8 : index
      %c1_94 = arith.constant 1 : index
      %c0_95 = arith.constant 0 : index
      %119 = vector.load %arg2[%c0_91, %c0_92, %c8_93, %c1_94, %c0_95] : memref<1x1x18x18x128xbf16, #tpu.memory_space<vmem>>, vector<1x1x8x16x128xbf16>
      %120 = vector.shape_cast %119 : vector<1x1x8x16x128xbf16> to vector<8x16x128xbf16>
      %121 = arith.extf %120 : vector<8x16x128xbf16> to vector<8x16x128xf32>
      %c1_96 = arith.constant 1 : index
      %c0_97 = arith.constant 0 : index
      %c0_98 = arith.constant 0 : index
      %122 = vector.load %arg3[%c1_96, %c0_97, %c0_98] : memref<9x1x128xf32, #tpu.memory_space<vmem>>, vector<1x1x128xf32>
      %123 = vector.shape_cast %122 : vector<1x1x128xf32> to vector<1x128xf32>
      %124 = vector.shape_cast %123 : vector<1x128xf32> to vector<1x1x128xf32>
      %125 = vector.broadcast %124 : vector<1x1x128xf32> to vector<8x16x128xf32>
      %126 = arith.mulf %121, %125 : vector<8x16x128xf32>
      %127 = arith.addf %118, %126 : vector<8x16x128xf32>
      %c0_99 = arith.constant 0 : index
      %c0_100 = arith.constant 0 : index
      %c8_101 = arith.constant 8 : index
      %c2_102 = arith.constant 2 : index
      %c0_103 = arith.constant 0 : index
      %128 = vector.load %arg2[%c0_99, %c0_100, %c8_101, %c2_102, %c0_103] : memref<1x1x18x18x128xbf16, #tpu.memory_space<vmem>>, vector<1x1x8x16x128xbf16>
      %129 = vector.shape_cast %128 : vector<1x1x8x16x128xbf16> to vector<8x16x128xbf16>
      %130 = arith.extf %129 : vector<8x16x128xbf16> to vector<8x16x128xf32>
      %c2_104 = arith.constant 2 : index
      %c0_105 = arith.constant 0 : index
      %c0_106 = arith.constant 0 : index
      %131 = vector.load %arg3[%c2_104, %c0_105, %c0_106] : memref<9x1x128xf32, #tpu.memory_space<vmem>>, vector<1x1x128xf32>
      %132 = vector.shape_cast %131 : vector<1x1x128xf32> to vector<1x128xf32>
      %133 = vector.shape_cast %132 : vector<1x128xf32> to vector<1x1x128xf32>
      %134 = vector.broadcast %133 : vector<1x1x128xf32> to vector<8x16x128xf32>
      %135 = arith.mulf %130, %134 : vector<8x16x128xf32>
      %136 = arith.addf %127, %135 : vector<8x16x128xf32>
      %c0_107 = arith.constant 0 : index
      %c0_108 = arith.constant 0 : index
      %c9 = arith.constant 9 : index
      %c0_109 = arith.constant 0 : index
      %c0_110 = arith.constant 0 : index
      %137 = vector.load %arg2[%c0_107, %c0_108, %c9, %c0_109, %c0_110] : memref<1x1x18x18x128xbf16, #tpu.memory_space<vmem>>, vector<1x1x8x16x128xbf16>
      %138 = vector.shape_cast %137 : vector<1x1x8x16x128xbf16> to vector<8x16x128xbf16>
      %139 = arith.extf %138 : vector<8x16x128xbf16> to vector<8x16x128xf32>
      %c3_111 = arith.constant 3 : index
      %c0_112 = arith.constant 0 : index
      %c0_113 = arith.constant 0 : index
      %140 = vector.load %arg3[%c3_111, %c0_112, %c0_113] : memref<9x1x128xf32, #tpu.memory_space<vmem>>, vector<1x1x128xf32>
      %141 = vector.shape_cast %140 : vector<1x1x128xf32> to vector<1x128xf32>
      %142 = vector.shape_cast %141 : vector<1x128xf32> to vector<1x1x128xf32>
      %143 = vector.broadcast %142 : vector<1x1x128xf32> to vector<8x16x128xf32>
      %144 = arith.mulf %139, %143 : vector<8x16x128xf32>
      %145 = arith.addf %136, %144 : vector<8x16x128xf32>
      %c0_114 = arith.constant 0 : index
      %c0_115 = arith.constant 0 : index
      %c9_116 = arith.constant 9 : index
      %c1_117 = arith.constant 1 : index
      %c0_118 = arith.constant 0 : index
      %146 = vector.load %arg2[%c0_114, %c0_115, %c9_116, %c1_117, %c0_118] : memref<1x1x18x18x128xbf16, #tpu.memory_space<vmem>>, vector<1x1x8x16x128xbf16>
      %147 = vector.shape_cast %146 : vector<1x1x8x16x128xbf16> to vector<8x16x128xbf16>
      %148 = arith.extf %147 : vector<8x16x128xbf16> to vector<8x16x128xf32>
      %c4_119 = arith.constant 4 : index
      %c0_120 = arith.constant 0 : index
      %c0_121 = arith.constant 0 : index
      %149 = vector.load %arg3[%c4_119, %c0_120, %c0_121] : memref<9x1x128xf32, #tpu.memory_space<vmem>>, vector<1x1x128xf32>
      %150 = vector.shape_cast %149 : vector<1x1x128xf32> to vector<1x128xf32>
      %151 = vector.shape_cast %150 : vector<1x128xf32> to vector<1x1x128xf32>
      %152 = vector.broadcast %151 : vector<1x1x128xf32> to vector<8x16x128xf32>
      %153 = arith.mulf %148, %152 : vector<8x16x128xf32>
      %154 = arith.addf %145, %153 : vector<8x16x128xf32>
      %c0_122 = arith.constant 0 : index
      %c0_123 = arith.constant 0 : index
      %c9_124 = arith.constant 9 : index
      %c2_125 = arith.constant 2 : index
      %c0_126 = arith.constant 0 : index
      %155 = vector.load %arg2[%c0_122, %c0_123, %c9_124, %c2_125, %c0_126] : memref<1x1x18x18x128xbf16, #tpu.memory_space<vmem>>, vector<1x1x8x16x128xbf16>
      %156 = vector.shape_cast %155 : vector<1x1x8x16x128xbf16> to vector<8x16x128xbf16>
      %157 = arith.extf %156 : vector<8x16x128xbf16> to vector<8x16x128xf32>
      %c5_127 = arith.constant 5 : index
      %c0_128 = arith.constant 0 : index
      %c0_129 = arith.constant 0 : index
      %158 = vector.load %arg3[%c5_127, %c0_128, %c0_129] : memref<9x1x128xf32, #tpu.memory_space<vmem>>, vector<1x1x128xf32>
      %159 = vector.shape_cast %158 : vector<1x1x128xf32> to vector<1x128xf32>
      %160 = vector.shape_cast %159 : vector<1x128xf32> to vector<1x1x128xf32>
      %161 = vector.broadcast %160 : vector<1x1x128xf32> to vector<8x16x128xf32>
      %162 = arith.mulf %157, %161 : vector<8x16x128xf32>
      %163 = arith.addf %154, %162 : vector<8x16x128xf32>
      %c0_130 = arith.constant 0 : index
      %c0_131 = arith.constant 0 : index
      %c10 = arith.constant 10 : index
      %c0_132 = arith.constant 0 : index
      %c0_133 = arith.constant 0 : index
      %164 = vector.load %arg2[%c0_130, %c0_131, %c10, %c0_132, %c0_133] : memref<1x1x18x18x128xbf16, #tpu.memory_space<vmem>>, vector<1x1x8x16x128xbf16>
      %165 = vector.shape_cast %164 : vector<1x1x8x16x128xbf16> to vector<8x16x128xbf16>
      %166 = arith.extf %165 : vector<8x16x128xbf16> to vector<8x16x128xf32>
      %c6_134 = arith.constant 6 : index
      %c0_135 = arith.constant 0 : index
      %c0_136 = arith.constant 0 : index
      %167 = vector.load %arg3[%c6_134, %c0_135, %c0_136] : memref<9x1x128xf32, #tpu.memory_space<vmem>>, vector<1x1x128xf32>
      %168 = vector.shape_cast %167 : vector<1x1x128xf32> to vector<1x128xf32>
      %169 = vector.shape_cast %168 : vector<1x128xf32> to vector<1x1x128xf32>
      %170 = vector.broadcast %169 : vector<1x1x128xf32> to vector<8x16x128xf32>
      %171 = arith.mulf %166, %170 : vector<8x16x128xf32>
      %172 = arith.addf %163, %171 : vector<8x16x128xf32>
      %c0_137 = arith.constant 0 : index
      %c0_138 = arith.constant 0 : index
      %c10_139 = arith.constant 10 : index
      %c1_140 = arith.constant 1 : index
      %c0_141 = arith.constant 0 : index
      %173 = vector.load %arg2[%c0_137, %c0_138, %c10_139, %c1_140, %c0_141] : memref<1x1x18x18x128xbf16, #tpu.memory_space<vmem>>, vector<1x1x8x16x128xbf16>
      %174 = vector.shape_cast %173 : vector<1x1x8x16x128xbf16> to vector<8x16x128xbf16>
      %175 = arith.extf %174 : vector<8x16x128xbf16> to vector<8x16x128xf32>
      %c7_142 = arith.constant 7 : index
      %c0_143 = arith.constant 0 : index
      %c0_144 = arith.constant 0 : index
      %176 = vector.load %arg3[%c7_142, %c0_143, %c0_144] : memref<9x1x128xf32, #tpu.memory_space<vmem>>, vector<1x1x128xf32>
      %177 = vector.shape_cast %176 : vector<1x1x128xf32> to vector<1x128xf32>
      %178 = vector.shape_cast %177 : vector<1x128xf32> to vector<1x1x128xf32>
      %179 = vector.broadcast %178 : vector<1x1x128xf32> to vector<8x16x128xf32>
      %180 = arith.mulf %175, %179 : vector<8x16x128xf32>
      %181 = arith.addf %172, %180 : vector<8x16x128xf32>
      %c0_145 = arith.constant 0 : index
      %c0_146 = arith.constant 0 : index
      %c10_147 = arith.constant 10 : index
      %c2_148 = arith.constant 2 : index
      %c0_149 = arith.constant 0 : index
      %182 = vector.load %arg2[%c0_145, %c0_146, %c10_147, %c2_148, %c0_149] : memref<1x1x18x18x128xbf16, #tpu.memory_space<vmem>>, vector<1x1x8x16x128xbf16>
      %183 = vector.shape_cast %182 : vector<1x1x8x16x128xbf16> to vector<8x16x128xbf16>
      %184 = arith.extf %183 : vector<8x16x128xbf16> to vector<8x16x128xf32>
      %c8_150 = arith.constant 8 : index
      %c0_151 = arith.constant 0 : index
      %c0_152 = arith.constant 0 : index
      %185 = vector.load %arg3[%c8_150, %c0_151, %c0_152] : memref<9x1x128xf32, #tpu.memory_space<vmem>>, vector<1x1x128xf32>
      %186 = vector.shape_cast %185 : vector<1x1x128xf32> to vector<1x128xf32>
      %187 = vector.shape_cast %186 : vector<1x128xf32> to vector<1x1x128xf32>
      %188 = vector.broadcast %187 : vector<1x1x128xf32> to vector<8x16x128xf32>
      %189 = arith.mulf %184, %188 : vector<8x16x128xf32>
      %190 = arith.addf %181, %189 : vector<8x16x128xf32>
      %c0_153 = arith.constant 0 : index
      %c0_154 = arith.constant 0 : index
      %191 = vector.load %arg4[%c0_153, %c0_154] : memref<1x128xf32, #tpu.memory_space<vmem>>, vector<1x128xf32>
      %192 = vector.shape_cast %191 : vector<1x128xf32> to vector<1x1x128xf32>
      %193 = vector.broadcast %192 : vector<1x1x128xf32> to vector<8x16x128xf32>
      %194 = arith.addf %190, %193 : vector<8x16x128xf32>
      %cst_155 = arith.constant 0.000000e+00 : f32
      %195 = vector.broadcast %cst_155 : f32 to vector<8x16x128xf32>
      %196 = arith.maximumf %194, %195 : vector<8x16x128xf32>
      %197 = vector.shape_cast %196 : vector<8x16x128xf32> to vector<128x128xf32>
      %198 = arith.truncf %197 : vector<128x128xf32> to vector<128x128xbf16>
      %c128 = arith.constant 128 : index
      %c0_156 = arith.constant 0 : index
      %199 = vector.load %arg8[%c128, %c0_156] : memref<256x128xbf16, #tpu.memory_space<vmem>>, vector<128x128xbf16>
      tpu.vector_store %arg8[%c128, %c0_156], %198 {strides = array<i32>} : memref<256x128xbf16, #tpu.memory_space<vmem>>, vector<128x128xbf16>,
      %c128_157 = arith.constant 128 : index
      %c0_158 = arith.constant 0 : index
      %200 = vector.load %arg8[%c128_157, %c0_158] : memref<256x128xbf16, #tpu.memory_space<vmem>>, vector<128x128xbf16>
      %c0_159 = arith.constant 0 : index
      %c0_160 = arith.constant 0 : index
      %201 = vector.load %arg5[%c0_159, %c0_160] : memref<128x128xbf16, #tpu.memory_space<vmem>>, vector<128x128xbf16>
      %cst_161 = arith.constant dense<0.000000e+00> : vector<128x128xf32>
      %202 = tpu.matmul %200, %201, %cst_161 {dimension_numbers = #tpu.dot_dimension_numbers<[1], [0], [0], [1], [0, 0, 1, 1], [], []>} : vector<128x128xbf16>, vector<128x128xbf16>, vector<128x128xf32> -> vector<128x128xf32>
      %c0_162 = arith.constant 0 : index
      %c0_163 = arith.constant 0 : index
      %203 = vector.load %arg6[%c0_162, %c0_163] : memref<1x128xf32, #tpu.memory_space<vmem>>, vector<1x128xf32>
      %204 = vector.broadcast %203 : vector<1x128xf32> to vector<128x128xf32>
      %205 = arith.addf %202, %204 : vector<128x128xf32>
      %cst_164 = arith.constant 0.000000e+00 : f32
      %206 = vector.broadcast %cst_164 : f32 to vector<128x128xf32>
      %207 = arith.maximumf %205, %206 : vector<128x128xf32>
      %208 = arith.truncf %207 : vector<128x128xf32> to vector<128x128xbf16>
      %c0_165 = arith.constant 0 : index
      %c128_166 = arith.constant 128 : index
      %c0_167 = arith.constant 0 : index
      %209 = vector.load %arg7[%c0_165, %c128_166, %c0_167] : memref<1x256x128xbf16, #tpu.memory_space<vmem>>, vector<1x128x128xbf16>
      %210 = vector.shape_cast %209 : vector<1x128x128xbf16> to vector<128x128xbf16>
      %211 = vector.shape_cast %208 : vector<128x128xbf16> to vector<1x128x128xbf16>
      tpu.vector_store %arg7[%c0_165, %c128_166, %c0_167], %211 {strides = array<i32>} : memref<1x256x128xbf16, #tpu.memory_space<vmem>>, vector<1x128x128xbf16>,
    } else {
    }
    %c0_i32_1 = arith.constant 0 : i32
    %3 = arith.cmpi sgt, %arg1, %c0_i32_1 : i32
    %4 = arith.extui %3 : i1 to i32
    %c0_i32_2 = arith.constant 0 : i32
    %5 = arith.cmpi ne, %4, %c0_i32_2 : i32
    scf.if %5 {
      %c0 = arith.constant 0 : index
      %c0_3 = arith.constant 0 : index
      %6 = vector.load %arg8[%c0, %c0_3] : memref<256x128xbf16, #tpu.memory_space<vmem>>, vector<256x128xbf16>
      %c0_4 = arith.constant 0 : index
      %c0_5 = arith.constant 0 : index
      %7 = vector.load %arg5[%c0_4, %c0_5] : memref<128x128xbf16, #tpu.memory_space<vmem>>, vector<128x128xbf16>
      %cst = arith.constant dense<0.000000e+00> : vector<256x128xf32>
      %8 = tpu.matmul %6, %7, %cst {dimension_numbers = #tpu.dot_dimension_numbers<[1], [0], [0], [1], [0, 0, 1, 1], [], []>} : vector<256x128xbf16>, vector<128x128xbf16>, vector<256x128xf32> -> vector<256x128xf32>
      %c0_6 = arith.constant 0 : index
      %c0_7 = arith.constant 0 : index
      %9 = vector.load %arg6[%c0_6, %c0_7] : memref<1x128xf32, #tpu.memory_space<vmem>>, vector<1x128xf32>
      %10 = vector.broadcast %9 : vector<1x128xf32> to vector<256x128xf32>
      %11 = arith.addf %8, %10 : vector<256x128xf32>
      %cst_8 = arith.constant 0.000000e+00 : f32
      %12 = vector.broadcast %cst_8 : f32 to vector<256x128xf32>
      %13 = arith.maximumf %11, %12 : vector<256x128xf32>
      %14 = arith.truncf %13 : vector<256x128xf32> to vector<256x128xbf16>
      %c0_9 = arith.constant 0 : index
      %c0_10 = arith.constant 0 : index
      %c0_11 = arith.constant 0 : index
      %15 = vector.load %arg7[%c0_9, %c0_10, %c0_11] : memref<1x256x128xbf16, #tpu.memory_space<vmem>>, vector<1x256x128xbf16>
      %16 = vector.shape_cast %15 : vector<1x256x128xbf16> to vector<256x128xbf16>
      %17 = vector.shape_cast %14 : vector<256x128xbf16> to vector<1x256x128xbf16>
      tpu.vector_store %arg7[%c0_9, %c0_10, %c0_11], %17 {strides = array<i32>} : memref<1x256x128xbf16, #tpu.memory_space<vmem>>, vector<1x256x128xbf16>,
    } else {
    }
    return
  }
  func.func @transform_0(%arg0: i32, %arg1: i32) -> (i32, i32, i32, i32, i32) {
    %c0_i32 = arith.constant 0 : i32
    %c0_i32_0 = arith.constant 0 : i32
    %c0_i32_1 = arith.constant 0 : i32
    %c0_i32_2 = arith.constant 0 : i32
    %c0_i32_3 = arith.constant 0 : i32
    return %arg0, %c0_i32, %c0_i32_0, %c0_i32_1, %c0_i32_2 : i32, i32, i32, i32, i32
  }
  func.func @transform_1(%arg0: i32, %arg1: i32) -> (i32, i32, i32) {
    %c0_i32 = arith.constant 0 : i32
    %c0_i32_0 = arith.constant 0 : i32
    %c0_i32_1 = arith.constant 0 : i32
    %c0_i32_2 = arith.constant 0 : i32
    return %c0_i32, %c0_i32_0, %c0_i32_1 : i32, i32, i32
  }
  func.func @transform_2(%arg0: i32, %arg1: i32) -> (i32, i32) {
    %c0_i32 = arith.constant 0 : i32
    %c0_i32_0 = arith.constant 0 : i32
    %c0_i32_1 = arith.constant 0 : i32
    return %c0_i32, %c0_i32_0 : i32, i32
  }
  func.func @transform_3(%arg0: i32, %arg1: i32) -> (i32, i32) {
    %c0_i32 = arith.constant 0 : i32
    %c0_i32_0 = arith.constant 0 : i32
    return %c0_i32, %arg1 : i32, i32
  }
  func.func @transform_4(%arg0: i32, %arg1: i32) -> (i32, i32) {
    %c0_i32 = arith.constant 0 : i32
    %c0_i32_0 = arith.constant 0 : i32
    return %c0_i32, %arg1 : i32, i32
  }
  func.func @transform_5(%arg0: i32, %arg1: i32) -> (i32, i32, i32) {
    %c0_i32 = arith.constant 0 : i32
    %c0_i32_0 = arith.constant 0 : i32
    return %arg0, %c0_i32, %arg1 : i32, i32, i32
  }
}

</mosaic_0001>

<bundles_post_ra>
// kernel: block_forward.1
= control target key start
LH: loop header
LB: loop body
LE: loop exit
PB: predicated region body
PF: predicated region fallthrough
CT: control target
= control target key end

     0   :  { %s6375_s0 = inlined_call_operand.vmem [shape: bf16[2,1,18,18,128], index: 0, kind: input, shape index: {}]   ;;  %s6376_s1 = inlined_call_operand.vmem [shape: f32[9,1,128], index: 1, kind: input, shape index: {}]   ;;  %s6377_s2 = inlined_call_operand.vmem [shape: f32[1,128], index: 2, kind: input, shape index: {}]   ;;  %s6378_s3 = inlined_call_operand.vmem [shape: bf16[128,256], index: 3, kind: input, shape index: {}]   ;;  %s6379_s4 = inlined_call_operand.vmem [shape: f32[1,256], index: 4, kind: input, shape index: {}]   ;;  %s6380_s5 = inlined_call_operand.vmem [shape: bf16[2,256,256], index: 5, kind: output, shape index: {}]  }
   0x1   :  { %6383 = sst [smem:[#allocation7_spill]] %s6378_s3 }
   0x2   :  { %s4973_s18 = smov 0   ;;  %s4975_s19 = smov 0  }
   0x3   :  { %s4977_s20 = smov 0   ;;  %s4979_s21 = smov 0  }
   0x4   :  { %s4981_s22 = smov 0   ;;  %s4983_s23 = smov 0  }
   0x5   :  { %s4985_s24 = smov 0   ;;  %s4987_s25 = smov 0  }
   0x6   :  { %s4989_s26 = smov 0  }
   0x7 LB: > { %s3893_s27 = sadd.s32 4294967295, %s4941_s26   ;;  %s24_s28 = sadd.s32 1, %s4933_s24  ;;  %s4941_s26 = sphi %s4989_s26, %s15_s26   ;;  %s4937_s25 = sphi %s4987_s25, %s6397_s25   ;;  %s4933_s24 = sphi %s4985_s24, %s6396_s24   ;;  %s4929_s23 = sphi %s4983_s23, %s6395_s23   ;;  %s4925_s22 = sphi %s4981_s22, %s6394_s22   ;;  %s4921_s21 = sphi %s4979_s21, %s6393_s21   ;;  %s4917_s20 = sphi %s4977_s20, %s6392_s20   ;;  %s4913_s19 = sphi %s4975_s19, %s6391_s19   ;;  %s4909_s18 = sphi %s4973_s18, %s6390_s18  }
   0x8   : > { %p25_p0 = scmp.ge.s32.totalorder %s24_s28, 2  ;;  %s27_s29 = sadd.s32 1, %s4937_s25 }
   0x9   : > { %s102_s30 = sadd.s32 1, %s4921_s21  ;;  %p109_p1 = scmp.ne.s32.totalorder %s4921_s21, %s4917_s20 }
   0xa   : > { %s6399_s28 = smov (%p25_p0, %s24_s28), 0  ;;  %s6401_s29 = smov (!%p25_p0, %s27_s29), %s4937_s25 }
   0xb   : > { %6384 = sst [smem:[#allocation5_spill]] %s6399_s28  ;;  %s99_s6 = ssub.s32 %s4933_s24, %s6399_s28 }
   0xc   : > { %p110_p2 = scmp.eq.s32.totalorder %s4941_s26, 0  ;;  %p29_p3 = scmp.ge.s32.totalorder %s6401_s29, 2 }
   0xd   : > { %p100_p4 = scmp.eq.s32.totalorder %s99_s6, 0  ;;  %s156_s7 = sadd.s32 1, %s4913_s19 }
   0xe   : > { %p111_p5 = por %p110_p2, %p109_p1  ;;  %s6403_s29 = smov (%p29_p3, %s6401_s29), 0 }
   0xf   : > { %6385 = sst [smem:[#allocation6_spill]] %s6403_s29  ;;  %s151_s9 = ssub.s32 %s4937_s25, %s6403_s29 }
  0x10   : > { %s5034_s8 = scalar_select %p100_p4, %s4921_s21, %s102_s30  }
  0x11   : > { %p166_p6 = scmp.ne.s32.totalorder %s4913_s19, %s4909_s18  ;;  %s153_s10 = sor.u32 %s151_s9, %s99_s6 }
  0x12   : > { %p167_p7 = scmp.eq.s32.totalorder %s3893_s27, 3  ;;  %p154_p8 = scmp.eq.s32.totalorder %s153_s10, 0 }
  0x13   : > { %p3896_p10 = scmp.ge.s32.totalorder %s4941_s26, 4 }
  0x14   : > { %p5040_p9 = por %p167_p7, %p166_p6 }
  0x15   : > { %s5045_s12 = scalar_select %p154_p8, %s4913_s19, %s156_s7  }
  0x16   : > { %195 = sbr.rel (%p3896_p10) target bundleno = 49 (0x31), region = 24 }
  0x1d   : > { %206 = sbr.rel (!%p111_p5) target bundleno = 49 (0x31), region = 32  ;;  %s208_s13 = sand.u32 (%p111_p5), 1, %s4921_s21  }
  0x1e   : > { %s3898_s14 = sshll.u32 (%p111_p5), %s4933_s24, 2  ;;  %s3897_s15 = sshll.u32 (%p111_p5), %s208_s13, 6 }
  0x1f   : > { %s6387_s3 = sld [smem:[#allocation7_spill]] (%p111_p5)  ;;  %s210_s30 = scalar_lea.vmem (%p111_p5), [#allocation3], %s3897_s15 }
  0x25   : > { %s5053_s27 = scalar_lea.vmem %s6387_s3, %s3898_s14 }
  0x26   : > { %v228_v0 = vld [vmem:[%s5053_s27] sm:$0xf]  ;;  %v230_v1 = vld [vmem:[%s5053_s27 + $0x8] sm:$0xf]  ;;  %v232_v2 = vld [vmem:[%s5053_s27 + $0x10] sm:$0xf] }
  0x27   : > { %229 = vst [vmem:[%s210_s30] sm:$0xf] %v228_v0  ;;  %231 = vst [vmem:[%s210_s30 + $0x4] sm:$0xf] %v230_v1  ;;  %v234_v3 = vld [vmem:[%s5053_s27 + $0x18] sm:$0xf] }
  0x28   : > { %v236_v4 = vld [vmem:[%s5053_s27 + $0x20] sm:$0xf]  ;;  %233 = vst [vmem:[%s210_s30 + $0x8] sm:$0xf] %v232_v2  ;;  %235 = vst [vmem:[%s210_s30 + $0xc] sm:$0xf] %v234_v3 }
  0x29   : > { %237 = vst [vmem:[%s210_s30 + $0x10] sm:$0xf] %v236_v4  ;;  %v238_v5 = vld [vmem:[%s5053_s27 + $0x28] sm:$0xf]  ;;  %v240_v6 = vld [vmem:[%s5053_s27 + $0x30] sm:$0xf] }
  0x2a   : > { %v242_v7 = vld [vmem:[%s5053_s27 + $0x38] sm:$0xf]  ;;  %239 = vst [vmem:[%s210_s30 + $0x14] sm:$0xf] %v238_v5  ;;  %241 = vst [vmem:[%s210_s30 + $0x18] sm:$0xf] %v240_v6 }
  0x2b   : > { %243 = vst [vmem:[%s210_s30 + $0x1c] sm:$0xf] %v242_v7  ;;  %v244_v8 = vld [vmem:[%s5053_s27 + $0x40] sm:$0xf]  ;;  %v246_v9 = vld [vmem:[%s5053_s27 + $0x48] sm:$0xf] }
  0x2c   : > { %v248_v10 = vld [vmem:[%s5053_s27 + $0x50] sm:$0xf]  ;;  %245 = vst [vmem:[%s210_s30 + $0x20] sm:$0xf] %v244_v8  ;;  %247 = vst [vmem:[%s210_s30 + $0x24] sm:$0xf] %v246_v9 }
  0x2d   : > { %249 = vst [vmem:[%s210_s30 + $0x28] sm:$0xf] %v248_v10  ;;  %v250_v11 = vld [vmem:[%s5053_s27 + $0x58] sm:$0xf]  ;;  %v252_v12 = vld [vmem:[%s5053_s27 + $0x60] sm:$0xf] }
  0x2e   : > { %v254_v13 = vld [vmem:[%s5053_s27 + $0x68] sm:$0xf]  ;;  %251 = vst [vmem:[%s210_s30 + $0x2c] sm:$0xf] %v250_v11  ;;  %253 = vst [vmem:[%s210_s30 + $0x30] sm:$0xf] %v252_v12 }
  0x2f   : > { %255 = vst [vmem:[%s210_s30 + $0x34] sm:$0xf] %v254_v13  ;;  %v256_v14 = vld [vmem:[%s5053_s27 + $0x70] sm:$0xf]  ;;  %v258_v15 = vld [vmem:[%s5053_s27 + $0x78] sm:$0xf] }
  0x30   : > { %257 = vst [vmem:[%s210_s30 + $0x38] sm:$0xf] %v256_v14  ;;  %259 = vst [vmem:[%s210_s30 + $0x3c] sm:$0xf] %v258_v15 }
  0x31 PF: > { %p3899_p11 = scmp.ge.s32.totalorder %s4941_s26, 1  ;;  %p319_p12 = scmp.lt.s32.totalorder %s4941_s26, 5 }
  0x33   : > { %p320_p13 = pnand %p3899_p11, %p319_p12 }
  0x34   : > { %s326_s6 = sand.u32 (!%p320_p13), 1, %s4917_s20   ;;  %s357_s7 = sand.u32 (!%p320_p13), 1, %s4909_s18  }
  0x35   : > { %323 = sbr.rel (%p320_p13) target bundleno = 942 (0x3ae), region = 77  ;;  %s3900_s9 = sshll.u32 (!%p320_p13), %s326_s6, 6 }
  0x36   : > { %s3901_s10 = sshll.u32 (!%p320_p13), %s357_s7, 7  ;;  %p360_p0 = scmp.lt.s32.totalorder (!%p320_p13), %s4929_s23, 1 }
  0x37   : > { %p365_p1 = scmp.lt.s32.totalorder (!%p320_p13), %s4925_s22, 1  ;;  %s5089_s28 = scalar_lea.vmem (!%p320_p13), [#allocation3], %s3900_s9 }
  0x38   : > { %s5091_s18 = scalar_lea.vmem (!%p320_p13), [#allocation4], %s3901_s10  ;;  %p3903_p2 = scmp.ne.s32.totalorder (!%p320_p13), %s4925_s22, 0 }
  0x3c   : > { %s361_s13 = scalar_select %p360_p0, %s4929_s23, 1 }
  0x3d   : > { %s366_s14 = scalar_select %p365_p1, %s4925_s22, 1 }
  0x3e   : > { %s4754_s15 = smul.u32 216, %s361_s13  ;;  %v4827_v16 = vld [vmem:[%s5089_s28] sm:$0xff] (!%p3903_p2)   ;;  %v4829_v18 = vld [vmem:[%s5089_s28 + $0x8] sm:$0xff] (!%p3903_p2)   ;;  %v4831_v20 = vld [vmem:[%s5089_s28 + $0x10] sm:$0xff] (!%p3903_p2)   ;;  %vm516_vm0 = vcmask (!%p3903_p2), 1046528   ;;  %vm661_vm1 = vcmask (!%p3903_p2), 1045504  }
  0x3f   : > { %s5082_s27 = scalar_lea.vmem %s6379_s4, %s366_s14  ;;  %372 = sbr.rel (%p3903_p2) target bundleno = 639 (0x27f), region = 85  ;;  %v4828_v17 = vld [vmem:[%s5089_s28] sm:$0xff] (!%p3903_p2)   ;;  %4626 = vmatprep.subr.bf16.mxu0 (!%p3903_p2), %v4827_v16  ;;  %v4830_v19 = vld [vmem:[%s5089_s28 + $0x8] sm:$0xff] (!%p3903_p2)   ;;  %v4832_v21 = vld [vmem:[%s5089_s28 + $0x10] sm:$0xff] (!%p3903_p2)  }
  0x40   : > { %s5087_s29 = scalar_lea.vmem %s6375_s0, %s4754_s15  ;;  %4658 = vmatprep.subr.bf16.mxu1 (!%p3903_p2), %v4828_v17  ;;  %4627 = vmatpush3.bf16.msra.mxu0 (!%p3903_p2), %v4827_v16  ;;  %v4833_v22 = vld [vmem:[%s5089_s28 + $0x18] sm:$0xff] (!%p3903_p2)   ;;  %v4835_v24 = vld [vmem:[%s5089_s28 + $0x20] sm:$0xff] (!%p3903_p2)   ;;  %v4837_v26 = vld [vmem:[%s5089_s28 + $0x28] sm:$0xff] (!%p3903_p2)  }
  0x41   : > { %4659 = vmatpush3.bf16.msra.mxu1 (!%p3903_p2), %v4828_v17  ;;  %4628 = vmatprep.subr.bf16.mxu0 (!%p3903_p2), %v4829_v18  ;;  %v4834_v23 = vld [vmem:[%s5089_s28 + $0x18] sm:$0xff] (!%p3903_p2)   ;;  %v4836_v25 = vld [vmem:[%s5089_s28 + $0x20] sm:$0xff] (!%p3903_p2)   ;;  %v4838_v27 = vld [vmem:[%s5089_s28 + $0x28] sm:$0xff] (!%p3903_p2)  }
  0x42   : > { %4660 = vmatprep.subr.bf16.mxu1 (!%p3903_p2), %v4830_v19  ;;  %v4262_v28 = vld [vmem:[%s5087_s29] sm:$0xff] (!%p3903_p2)   ;;  %v444_v30 = vld [vmem:[%s5087_s29 + $0x8] sm:$0x1] (!%p3903_p2)  ;;  %v3909_v38 = vld [vmem:[%s5087_s29 + $0xc] sm:$0xff] (!%p3903_p2)  }
  0x43   : > { %v5110_v29 = vld [vmem:[%s6376_s1] ss:$0 sm:$0xff] (!%p3903_p2)  ;;  %v4263_v31 = vunpack.c.l.bf16 (!%p3903_p2), %v4262_v28  ;;  %v4264_v32 = vunpack.c.h.bf16 (!%p3903_p2), %v4262_v28  ;;  %v452_v33 = vunpack.c.l.bf16 (!%p3903_p2), %v444_v30  ;;  %v5116_v34 = vld [vmem:[%s6376_s1 + $0x1] ss:$0 sm:$0xff] (!%p3903_p2)  ;;  %v5122_v36 = vld [vmem:[%s6376_s1 + $0x2] ss:$0 sm:$0xff] (!%p3903_p2)  ;;  %v751_v48 = vunpack.c.l.bf16 (!%p3903_p2), %v3909_v38 }
  0x44   : > { %4629 = vmatpush3.bf16.msra.mxu0 (!%p3903_p2), %v4829_v18  ;;  %v589_v35 = vld [vmem:[%s5087_s29] sm:$0xe] (!%p3903_p2)  ;;  %v4839_v44 = vld [vmem:[%s5089_s28 + $0x30] sm:$0xff] (!%p3903_p2)   ;;  %v752_v54 = vunpack.c.h.bf16 (!%p3903_p2), %v3909_v38  ;;  %v3937_v55 = vld [vmem:[%s5087_s29 + $0xc] sm:$0xe] (!%p3903_p2) }
  0x45   : > { %4661 = vmatpush3.bf16.msra.mxu1 (!%p3903_p2), %v4830_v19  ;;  %4630 = vmatprep.subr.bf16.mxu0 (!%p3903_p2), %v4831_v20  ;;  %v597_v37 = vunpack.c.l.bf16 (!%p3903_p2), %v589_v35  ;;  %v412_v39 = vmul.f32 (!%p3903_p2), %v4263_v31, %v5110_v29  ;;  %v413_v40 = vmul.f32 (!%p3903_p2), %v4264_v32, %v5110_v29  ;;  %v468_v41 = vmul.f32 (!%p3903_p2), %v4263_v31, %v5116_v34  ;;  %v5132_v43 = vld [vmem:[%s6376_s1 + $0x3] ss:$0 sm:$0xff] (!%p3903_p2)  ;;  %v3927_v49 = vld [vmem:[%s5087_s29 + $0x14] sm:$0x1] (!%p3903_p2)  ;;  %v5146_v60 = vld [vmem:[%s6376_s1 + $0x4] ss:$0 sm:$0xff] (!%p3903_p2) }
  0x46   : > { %4662 = vmatprep.subr.bf16.mxu1 %v4832_v21  ;;  %v469_v42 = vmul.f32 %v4264_v32, %v5116_v34  ;;  %v470_v45 = vmul.f32 %v5116_v34, %v452_v33  ;;  %v614_v47 = vmul.f32 %v4264_v32, %v5122_v36  ;;  %v4840_v50 = vld [vmem:[%s5089_s28 + $0x30] sm:$0xff]   ;;  %v615_v53 = vmul.f32 %v5122_v36, %v452_v33  ;;  %v5153_v1 = vld [vmem:[%s6376_s1 + $0x5] ss:$0 sm:$0xff]  ;;  %v4841_v2 = vld [vmem:[%s5089_s28 + $0x38] sm:$0xff]  }
  0x47   : > { %v613_v46 = vmul.f32 %v5122_v36, %v597_v37  ;;  %v517_v51 = vrot.slane %v468_v41, 1  ;;  %v775_v59 = vmul.f32 %v5132_v43, %v751_v48  ;;  %v776_v63 = vmul.f32 %v5132_v43, %v752_v54  ;;  %v4842_v7 = vld [vmem:[%s5089_s28 + $0x38] sm:$0xff]   ;;  %v5179_v32 = vld [vmem:[%s6376_s1 + $0x7] ss:$0 sm:$0xff] }
  0x48   : > { %4631 = vmatpush3.bf16.msra.mxu0 %v4831_v20  ;;  %v518_v52 = vrot.slane %v469_v42, 1  ;;  %v520_v56 = vrot.slane %v470_v45, 1  ;;  %v663_v58 = vrot.slane %v614_v47, 2  ;;  %v665_v62 = vrot.slane %v615_v53, 2  ;;  %v4524_v16 = vld [vmem:[%s5087_s29 + $0x18] sm:$0xff]  }
  0x49   : > { %4663 = vmatpush3.bf16.msra.mxu1 %v4832_v21  ;;  %4632 = vmatprep.subr.bf16.mxu0 %v4833_v22  ;;  %v662_v57 = vrot.slane %v613_v46, 2  ;;  %v815_v0 = vunpack.c.l.bf16 %v3927_v49  ;;  %v959_v6 = vunpack.c.l.bf16 %v3937_v55  ;;  %v831_v10 = vmul.f32 %v5146_v60, %v751_v48  ;;  %v5170_v21 = vld [vmem:[%s6376_s1 + $0x6] ss:$0 sm:$0xff] }
  0x4a   : > { %4664 = vmatprep.subr.bf16.mxu1 %v4834_v23  ;;  %v519_v61 = vsel %vm516_vm0, %v517_v51, %v518_v52  ;;  %v521_v3 = vsel %vm516_vm0, %v518_v52, %v520_v56  ;;  %v666_v9 = vsel %vm661_vm1, %v663_v58, %v665_v62  ;;  %v832_v11 = vmul.f32 %v5146_v60, %v752_v54 }
  0x4b   : > { %v573_v4 = vadd.f32 %v519_v61, %v412_v39  ;;  %v664_v5 = vsel %vm661_vm1, %v662_v57, %v663_v58  ;;  %v574_v8 = vadd.f32 %v521_v3, %v413_v40  ;;  %v833_v13 = vmul.f32 %v5146_v60, %v815_v0  ;;  %v3975_v39 = vld [vmem:[%s5087_s29 + $0x18] sm:$0xe]  ;;  %v5189_v40 = vld [vmem:[%s6376_s1 + $0x8] ss:$0 sm:$0xff] }
  0x4c   : > { %4633 = vmatpush3.bf16.msra.mxu0 %v4833_v22  ;;  %v975_v14 = vmul.f32 %v5153_v1, %v959_v6  ;;  %v976_v15 = vmul.f32 %v5153_v1, %v752_v54  ;;  %v879_v18 = vrot.slane %v831_v10, 1  ;;  %v880_v19 = vrot.slane %v832_v11, 1  ;;  %v4535_v54 = vld [vmem:[%s5087_s29 + $0x60] sm:$0xff]  }
  0x4d   : > { %4665 = vmatpush3.bf16.msra.mxu1 %v4834_v23  ;;  %4634 = vmatprep.subr.bf16.mxu0 %v4835_v24  ;;  %v718_v12 = vadd.f32 %v664_v5, %v573_v4  ;;  %v719_v17 = vadd.f32 %v666_v9, %v574_v8  ;;  %v977_v20 = vmul.f32 %v5153_v1, %v815_v0  ;;  %v882_v23 = vrot.slane %v833_v13, 1  ;;  %v4038_v10 = vld [vmem:[%s5087_s29 + $0x60] sm:$0xe] }
  0x4e   : > { %4666 = vmatprep.subr.bf16.mxu1 %v4836_v25  ;;  %v881_v28 = vsel %vm516_vm0, %v879_v18, %v880_v19  ;;  %v5174_v31 = vunpack.c.l.bf16 %v4524_v16  ;;  %v5183_v38 = vunpack.c.h.bf16 %v4524_v16  ;;  %v1320_v52 = vunpack.c.l.bf16 %v3975_v39  ;;  %v5217_v16 = vld [vmem:[%s6377_s2] ss:$0 sm:$0xff] }
  0x4f   : > { %v791_v22 = vadd.f32 %v775_v59, %v718_v12  ;;  %v1026_v30 = vrot.slane %v977_v20, 2  ;;  %v883_v33 = vsel %vm516_vm0, %v880_v19, %v882_v23  ;;  %v4028_v59 = vld [vmem:[%s5087_s29 + $0x68] sm:$0x1]  ;;  %v4351_v4 = vunpack.c.l.bf16 %v4535_v54 }
  0x50   : > { %4635 = vmatpush3.bf16.msra.mxu0 %v4835_v24  ;;  %v1023_v24 = vrot.slane %v975_v14, 2  ;;  %v1137_v47 = vmul.f32 %v5183_v38, %v5170_v21  ;;  %v1192_v48 = vmul.f32 %v5174_v31, %v5179_v32  ;;  %v1193_v49 = vmul.f32 %v5183_v38, %v5179_v32 }
  0x51   : > { %4667 = vmatpush3.bf16.msra.mxu1 %v4836_v25  ;;  %4636 = vmatprep.subr.bf16.mxu0 %v4837_v26  ;;  %v1024_v25 = vrot.slane %v976_v15, 2  ;;  %v935_v35 = vadd.f32 %v881_v28, %v791_v22  ;;  %v1337_v53 = vmul.f32 %v5183_v38, %v5189_v40  ;;  %v4352_v5 = vunpack.c.h.bf16 %v4535_v54 }
  0x52   : > { %4668 = vmatprep.subr.bf16.mxu1 %v4838_v27  ;;  %v1240_v56 = vrot.slane %v1192_v48, 1  ;;  %v1241_v57 = vrot.slane %v1193_v49, 1  ;;  %v1863_v9 = vunpack.c.l.bf16 %v4028_v59  ;;  %v1823_v13 = vmul.f32 %v4351_v4, %v5110_v29 }
  0x53   : > { %v1025_v37 = vsel %vm661_vm1, %v1023_v24, %v1024_v25  ;;  %v1027_v42 = vsel %vm661_vm1, %v1024_v25, %v1026_v30  ;;  %v1385_v0 = vrot.slane %v1337_v53, 2  ;;  %v1824_v14 = vmul.f32 %v4352_v5, %v5110_v29  ;;  %v4048_v25 = vld [vmem:[%s5087_s29 + $0x6c] sm:$0xff]  }
  0x54   : > { %4637 = vmatpush3.bf16.msra.mxu0 %v4837_v26  ;;  %v3965_v26 = vld [vmem:[%s5087_s29 + $0x20] sm:$0x1]  ;;  %v1079_v46 = vadd.f32 %v1025_v37, %v935_v35  ;;  %v1879_v18 = vmul.f32 %v4352_v5, %v5116_v34  ;;  %v1880_v19 = vmul.f32 %v5116_v34, %v1863_v9  ;;  %v2006_v23 = vunpack.c.l.bf16 %v4038_v10 }
  0x55   : > { %4669 = vmatpush3.bf16.msra.mxu1 %v4838_v27  ;;  %4638 = vmatprep.subr.bf16.mxu0 %v4839_v44  ;;  %v792_v27 = vadd.f32 %v776_v63, %v719_v17  ;;  %v1176_v45 = vunpack.c.l.bf16 %v3965_v26  ;;  %v1336_v63 = vmul.f32 %v5189_v40, %v1320_v52  ;;  %v1878_v17 = vmul.f32 %v4351_v4, %v5116_v34 }
  0x56   : > { %4670 = vmatprep.subr.bf16.mxu1 %v4840_v50  ;;  %v2022_v24 = vmul.f32 %v4352_v5, %v5122_v36  ;;  %v1929_v28 = vrot.slane %v1880_v19, 1  ;;  %v2023_v30 = vmul.f32 %v5122_v36, %v1863_v9  ;;  %v2021_v37 = vmul.f32 %v5122_v36, %v2006_v23 }
  0x57   : > { %v936_v41 = vadd.f32 %v883_v33, %v792_v27  ;;  %v1194_v51 = vmul.f32 %v5179_v32, %v1176_v45  ;;  %v1338_v58 = vmul.f32 %v5189_v40, %v1176_v45  ;;  %v1384_v8 = vrot.slane %v1336_v63, 2 }
  0x58   : > { %4639 = vmatpush3.bf16.msra.mxu0 %v4839_v44  ;;  %v1136_v44 = vmul.f32 %v5174_v31, %v5170_v21  ;;  %v1926_v26 = vrot.slane %v1878_v17, 1  ;;  %v1927_v27 = vrot.slane %v1879_v18, 1  ;;  %v2070_v39 = vrot.slane %v2022_v24, 2 }
  0x59   : > { %4671 = vmatpush3.bf16.msra.mxu1 %v4840_v50  ;;  %4640 = vmatprep.subr.bf16.mxu0 %v4841_v2  ;;  %v1080_v50 = vadd.f32 %v1027_v42, %v936_v41  ;;  %v1243_v62 = vrot.slane %v1194_v51, 1  ;;  %v1387_v3 = vrot.slane %v1338_v58, 2  ;;  %v1386_v15 = vsel %vm661_vm1, %v1384_v8, %v1385_v0  ;;  %v4076_v51 = vld [vmem:[%s5087_s29 + $0x6c] sm:$0xe] }
  0x5a   : > { %4672 = vmatprep.subr.bf16.mxu1 %v4842_v7  ;;  %v1152_v55 = vadd.f32 %v1136_v44, %v1079_v46  ;;  %v1928_v41 = vsel %vm516_vm0, %v1926_v26, %v1927_v27  ;;  %v1930_v42 = vsel %vm516_vm0, %v1927_v27, %v1929_v28  ;;  %v2072_v44 = vrot.slane %v2023_v30, 2  ;;  %v4066_v46 = vld [vmem:[%s5087_s29 + $0x74] sm:$0x1]  ;;  %v4114_v26 = vld [vmem:[%s5087_s29 + $0x78] sm:$0xe] }
  0x5b   : > { %v1153_v61 = vadd.f32 %v1137_v47, %v1080_v50  ;;  %v1244_v6 = vsel %vm516_vm0, %v1241_v57, %v1243_v62  ;;  %v1388_v12 = vsel %vm661_vm1, %v1385_v0, %v1387_v3  ;;  %v2158_v45 = vunpack.c.l.bf16 %v4048_v25 }
  0x5c   : > { %4641 = vmatpush3.bf16.msra.mxu0 %v4841_v2  ;;  %v1242_v2 = vsel %vm516_vm0, %v1240_v56, %v1241_v57  ;;  %v1982_v49 = vadd.f32 %v1928_v41, %v1823_v13  ;;  %v1983_v50 = vadd.f32 %v1930_v42, %v1824_v14  ;;  %v2069_v52 = vrot.slane %v2021_v37, 2 }
  0x5d   : > { %4673 = vmatpush3.bf16.msra.mxu1 %v4842_v7  ;;  %v1296_v7 = vadd.f32 %v1242_v2, %v1152_v55  ;;  %v1297_v11 = vadd.f32 %v1244_v6, %v1153_v61  ;;  %v2073_v53 = vsel %vm661_vm1, %v2070_v39, %v2072_v44  ;;  %v2159_v54 = vunpack.c.h.bf16 %v4048_v25  ;;  %v4543_v2 = vld [vmem:[%s5087_s29 + $0x78] sm:$0xff]  }
  0x5e   : > { %v2181_v55 = vmul.f32 %v5132_v43, %v2158_v45  ;;  %v2126_v57 = vadd.f32 %v2073_v53, %v1983_v50  ;;  %v2221_v58 = vunpack.c.l.bf16 %v4066_v46  ;;  %v2236_v59 = vmul.f32 %v5146_v60, %v2158_v45 }
  0x5f   : > { %v1440_v20 = vadd.f32 %v1386_v15, %v1296_v7  ;;  %v1441_v22 = vadd.f32 %v1388_v12, %v1297_v11  ;;  %v2071_v61 = vsel %vm661_vm1, %v2069_v52, %v2070_v39  ;;  %v2182_v62 = vmul.f32 %v5132_v43, %v2159_v54  ;;  %v4104_v11 = vld [vmem:[%s5087_s29 + $0x80] sm:$0x1] }
  0x60   : > { %v2237_v63 = vmul.f32 %v5146_v60, %v2159_v54  ;;  %v2364_v0 = vunpack.c.l.bf16 %v4076_v51  ;;  %v2125_v3 = vadd.f32 %v2071_v61, %v1982_v49  ;;  %v2238_v4 = vmul.f32 %v5146_v60, %v2221_v58 }
  0x61   : > { %v1463_v33 = vadd.f32 %v5217_v16, %v1440_v20  ;;  %v1464_v35 = vadd.f32 %v5217_v16, %v1441_v22  ;;  %v2284_v5 = vrot.slane %v2236_v59, 1  ;;  %v2380_v6 = vmul.f32 %v5153_v1, %v2159_v54 }
  0x62   : > { %v2198_v7 = vadd.f32 %v2182_v62, %v2126_v57  ;;  %v2285_v8 = vrot.slane %v2237_v63, 1  ;;  %v2379_v9 = vmul.f32 %v5153_v1, %v2364_v0  ;;  %v2381_v10 = vmul.f32 %v5153_v1, %v2221_v58  ;;  %v590_v62 = vld [vmem:[%s5087_s29 + $0xc] sm:$0xe] }
  0x63   : > { %v1479_v47 = vmax.f32 %v1463_v33, 0.0  ;;  %v1480_v48 = vmax.f32 %v1464_v35, 0.0  ;;  %v2197_v12 = vadd.f32 %v2181_v55, %v2125_v3  ;;  %v2287_v13 = vrot.slane %v2238_v4, 1 }
  0x64   : > { %v2428_v14 = vrot.slane %v2380_v6, 2  ;;  %v5244_v15 = vunpack.c.l.bf16 %v4543_v2  ;;  %v2286_v17 = vsel %vm516_vm0, %v2284_v5, %v2285_v8  ;;  %v2427_v18 = vrot.slane %v2379_v9, 2 }
  0x65   : > { %v1495_v56 = vpack.c.bf16 %v1480_v48, %v1479_v47  ;;  %v2430_v19 = vrot.slane %v2381_v10, 2  ;;  %v5247_v20 = vunpack.c.h.bf16 %v4543_v2  ;;  %v2288_v22 = vsel %vm516_vm0, %v2285_v8, %v2287_v13  ;;  %v375_v47 = vld [vmem:[%s5087_s29 + $0xc] sm:$0xff]  }
  0x66   : > { %v2340_v23 = vadd.f32 %v2286_v17, %v2197_v12  ;;  %v2539_v24 = vmul.f32 %v5244_v15, %v5170_v21  ;;  %v2579_v25 = vunpack.c.l.bf16 %v4104_v11  ;;  %v2341_v27 = vadd.f32 %v2288_v22, %v2198_v7 }
  0x67   : > { %1503 = vst [vmem:[#allocation2] sm:$0xff] %v1495_v56  ;;  %4642 = vmatprep.mubr.bf16.mxu0 %v1495_v56  ;;  %v2429_v28 = vsel %vm661_vm1, %v2427_v18, %v2428_v14  ;;  %v2431_v30 = vsel %vm661_vm1, %v2428_v14, %v2430_v19  ;;  %v2540_v33 = vmul.f32 %v5247_v20, %v5170_v21  ;;  %v2722_v44 = vunpack.c.l.bf16 %v4114_v26  ;;  %v445_v56 = vld [vmem:[%s5087_s29 + $0x14] sm:$0x1] }
  0x68   : > { %v2483_v35 = vadd.f32 %v2429_v28, %v2340_v23  ;;  %v2594_v37 = vmul.f32 %v5244_v15, %v5179_v32  ;;  %v2595_v39 = vmul.f32 %v5247_v20, %v5179_v32  ;;  %v2596_v41 = vmul.f32 %v5179_v32, %v2579_v25  ;;  %v3928_v28 = vld [vmem:[%s5087_s29 + $0x20] sm:$0x1] }
  0x69   : > { %v2484_v42 = vadd.f32 %v2431_v30, %v2341_v27  ;;  %v2738_v45 = vmul.f32 %v5247_v20, %v5189_v40  ;;  %v2739_v46 = vmul.f32 %v5189_v40, %v2579_v25  ;;  %v2737_v53 = vmul.f32 %v5189_v40, %v2722_v44 }
  0x6a   : > { %v2555_v48 = vadd.f32 %v2539_v24, %v2483_v35  ;;  %v2642_v49 = vrot.slane %v2594_v37, 1  ;;  %v2643_v50 = vrot.slane %v2595_v39, 1  ;;  %v2645_v51 = vrot.slane %v2596_v41, 1 }
  0x6b   : > { %v2556_v52 = vadd.f32 %v2540_v33, %v2484_v42  ;;  %v2786_v54 = vrot.slane %v2738_v45, 2  ;;  %v2788_v55 = vrot.slane %v2739_v46, 2  ;;  %v391_v59 = vunpack.c.l.bf16 %v375_v47  ;;  %v3938_v45 = vld [vmem:[%s5087_s29 + $0x18] sm:$0xe] }
  0x6c   : > { %v2644_v57 = vsel %vm516_vm0, %v2642_v49, %v2643_v50  ;;  %v2646_v58 = vsel %vm516_vm0, %v2643_v50, %v2645_v51  ;;  %v392_v61 = vunpack.c.h.bf16 %v375_v47  ;;  %v2785_v2 = vrot.slane %v2737_v53, 2 }
  0x6d   : > { %v2698_v63 = vadd.f32 %v2644_v57, %v2555_v48  ;;  %v2699_v0 = vadd.f32 %v2646_v58, %v2556_v52  ;;  %v2789_v3 = vsel %vm661_vm1, %v2786_v54, %v2788_v55  ;;  %v414_v4 = vmul.f32 %v5110_v29, %v391_v59  ;;  %v3949_v58 = vld [vmem:[%s5087_s29 + $0x24] sm:$0xff]  }
  0x6e   : > { %v415_v5 = vmul.f32 %v5110_v29, %v392_v61  ;;  %v453_v6 = vunpack.c.l.bf16 %v445_v56  ;;  %v471_v7 = vmul.f32 %v5116_v34, %v391_v59  ;;  %v2787_v8 = vsel %vm661_vm1, %v2785_v2, %v2786_v54 }
  0x6f   : > { %v2842_v9 = vadd.f32 %v2789_v3, %v2699_v0  ;;  %v472_v10 = vmul.f32 %v5116_v34, %v392_v61  ;;  %v598_v11 = vunpack.c.l.bf16 %v590_v62  ;;  %v2841_v12 = vadd.f32 %v2787_v8, %v2698_v63  ;;  %v3966_v0 = vld [vmem:[%s5087_s29 + $0x2c] sm:$0x1] }
  0x70   : > { %v473_v13 = vmul.f32 %v5116_v34, %v453_v6  ;;  %v522_v14 = vrot.slane %v471_v7, 1  ;;  %v617_v17 = vmul.f32 %v5122_v36, %v392_v61  ;;  %v618_v23 = vmul.f32 %v5122_v36, %v453_v6 }
  0x71   : > { %v2865_v18 = vadd.f32 %v5217_v16, %v2842_v9  ;;  %v523_v19 = vrot.slane %v472_v10, 1  ;;  %v616_v22 = vmul.f32 %v5122_v36, %v598_v11  ;;  %v2864_v24 = vadd.f32 %v5217_v16, %v2841_v12 }
  0x72   : > { %v525_v25 = vrot.slane %v473_v13, 1  ;;  %v668_v26 = vrot.slane %v617_v17, 2  ;;  %v777_v27 = vmul.f32 %v5174_v31, %v5132_v43  ;;  %v670_v37 = vrot.slane %v618_v23, 2 }
  0x73   : > { %v2881_v30 = vmax.f32 %v2865_v18, 0.0  ;;  %v524_v33 = vsel %vm516_vm0, %v522_v14, %v523_v19  ;;  %v667_v35 = vrot.slane %v616_v22, 2  ;;  %v2880_v39 = vmax.f32 %v2864_v24, 0.0  ;;  %v3976_v14 = vld [vmem:[%s5087_s29 + $0x24] sm:$0xe] }
  0x74   : > { %v526_v41 = vsel %vm516_vm0, %v523_v19, %v525_v25  ;;  %v575_v42 = vadd.f32 %v524_v33, %v414_v4  ;;  %v778_v44 = vmul.f32 %v5183_v38, %v5132_v43  ;;  %v671_v48 = vsel %vm661_vm1, %v668_v26, %v670_v37 }
  0x75   : > { %v576_v46 = vadd.f32 %v526_v41, %v415_v5  ;;  %v669_v47 = vsel %vm661_vm1, %v667_v35, %v668_v26  ;;  %v816_v49 = vunpack.c.l.bf16 %v3928_v28  ;;  %v2896_v50 = vpack.c.bf16 %v2881_v30, %v2880_v39  ;;  %v4013_v35 = vld [vmem:[%s5087_s29 + $0x6c] sm:$0xff]  }
  0x76   : > { %v720_v51 = vadd.f32 %v669_v47, %v575_v42  ;;  %v834_v52 = vmul.f32 %v5174_v31, %v5146_v60  ;;  %v835_v53 = vmul.f32 %v5183_v38, %v5146_v60  ;;  %v960_v56 = vunpack.c.l.bf16 %v3938_v45 }
  0x77   : > { %v721_v54 = vadd.f32 %v671_v48, %v576_v46  ;;  %v836_v55 = vmul.f32 %v5146_v60, %v816_v49  ;;  %v979_v57 = vmul.f32 %v5183_v38, %v5153_v1  ;;  %2904 = vst [vmem:[#allocation2 + $0x40] sm:$0xff] %v2896_v50  ;;  %4674 = vmatprep.mubr.bf16.mxu1 %v2896_v50  ;;  %v1114_v8 = vunpack.c.l.bf16 %v3949_v58  ;;  %v4029_v48 = vld [vmem:[%s5087_s29 + $0x74] sm:$0x1] }
  0x78   : > { %v793_v59 = vadd.f32 %v777_v27, %v720_v51  ;;  %v884_v61 = vrot.slane %v834_v52, 1  ;;  %v885_v62 = vrot.slane %v835_v53, 1  ;;  %v980_v63 = vmul.f32 %v5153_v1, %v816_v49 }
  0x79   : > { %v794_v2 = vadd.f32 %v778_v44, %v721_v54  ;;  %v887_v3 = vrot.slane %v836_v55, 1  ;;  %v978_v4 = vmul.f32 %v5153_v1, %v960_v56  ;;  %v1029_v5 = vrot.slane %v979_v57, 2  ;;  %v4039_v57 = vld [vmem:[%s5087_s29 + $0x6c] sm:$0xe] }
  0x7a   : > { %v886_v6 = vsel %vm516_vm0, %v884_v61, %v885_v62  ;;  %v1031_v7 = vrot.slane %v980_v63, 2  ;;  %v1115_v9 = vunpack.c.h.bf16 %v3949_v58  ;;  %v1177_v13 = vunpack.c.l.bf16 %v3966_v0 }
  0x7b   : > { %v888_v10 = vsel %vm516_vm0, %v885_v62, %v887_v3  ;;  %v937_v11 = vadd.f32 %v886_v6, %v793_v59  ;;  %v1028_v12 = vrot.slane %v978_v4, 2  ;;  %v1138_v19 = vmul.f32 %v5170_v21, %v1114_v8 }
  0x7c   : > { %v938_v17 = vadd.f32 %v888_v10, %v794_v2  ;;  %v1032_v18 = vsel %vm661_vm1, %v1029_v5, %v1031_v7  ;;  %v1139_v22 = vmul.f32 %v5170_v21, %v1115_v9  ;;  %v1195_v24 = vmul.f32 %v5179_v32, %v1114_v8 }
  0x7d   : > { %v1030_v23 = vsel %vm661_vm1, %v1028_v12, %v1029_v5  ;;  %v1196_v25 = vmul.f32 %v5179_v32, %v1115_v9  ;;  %v1197_v26 = vmul.f32 %v5179_v32, %v1177_v13  ;;  %v1321_v30 = vunpack.c.l.bf16 %v3976_v14 }
  0x7e   : > { %v1081_v27 = vadd.f32 %v1030_v23, %v937_v11  ;;  %v1082_v28 = vadd.f32 %v1032_v18, %v938_v17  ;;  %v1340_v33 = vmul.f32 %v5189_v40, %v1115_v9  ;;  %v1245_v37 = vrot.slane %v1195_v24, 1  ;;  %v4067_v18 = vld [vmem:[%s5087_s29 + $0x80] sm:$0x1] }
  0x7f   : > { %v1246_v39 = vrot.slane %v1196_v25, 1  ;;  %v1248_v41 = vrot.slane %v1197_v26, 1  ;;  %v1341_v42 = vmul.f32 %v5189_v40, %v1177_v13  ;;  %v1339_v46 = vmul.f32 %v5189_v40, %v1321_v30  ;;  %v4077_v30 = vld [vmem:[%s5087_s29 + $0x78] sm:$0xe] }
  0x80   : > { %v1154_v44 = vadd.f32 %v1138_v19, %v1081_v27  ;;  %v1155_v45 = vadd.f32 %v1139_v22, %v1082_v28  ;;  %v1390_v47 = vrot.slane %v1340_v33, 2  ;;  %v1802_v52 = vunpack.c.l.bf16 %v4013_v35 }
  0x81   : > { %v1247_v49 = vsel %vm516_vm0, %v1245_v37, %v1246_v39  ;;  %v1249_v50 = vsel %vm516_vm0, %v1246_v39, %v1248_v41  ;;  %v1392_v51 = vrot.slane %v1341_v42, 2  ;;  %v1389_v55 = vrot.slane %v1339_v46, 2 }
  0x82   : > { %v1298_v53 = vadd.f32 %v1247_v49, %v1154_v44  ;;  %v1299_v54 = vadd.f32 %v1249_v50, %v1155_v45  ;;  %v1803_v56 = vunpack.c.h.bf16 %v4013_v35  ;;  %v1825_v59 = vmul.f32 %v5110_v29, %v1802_v52  ;;  %v4088_v50 = vld [vmem:[%s5087_s29 + $0x84] sm:$0xff]  }
  0x83   : > { %v1393_v58 = vsel %vm661_vm1, %v1390_v47, %v1392_v51  ;;  %v1864_v61 = vunpack.c.l.bf16 %v4029_v48  ;;  %v1881_v62 = vmul.f32 %v5116_v34, %v1802_v52  ;;  %v1391_v63 = vsel %vm661_vm1, %v1389_v55, %v1390_v47 }
  0x84   : > { %v1443_v0 = vadd.f32 %v1393_v58, %v1299_v54  ;;  %v1826_v2 = vmul.f32 %v5110_v29, %v1803_v56  ;;  %v1882_v3 = vmul.f32 %v5116_v34, %v1803_v56  ;;  %v1442_v4 = vadd.f32 %v1391_v63, %v1298_v53 }
  0x85   : > { %v1883_v5 = vmul.f32 %v5116_v34, %v1864_v61  ;;  %v1931_v6 = vrot.slane %v1881_v62, 1  ;;  %v2007_v7 = vunpack.c.l.bf16 %v4039_v57  ;;  %v2025_v10 = vmul.f32 %v5122_v36, %v1803_v56 }
  0x86   : > { %v1466_v8 = vadd.f32 %v5217_v16, %v1443_v0  ;;  %v1932_v9 = vrot.slane %v1882_v3, 1  ;;  %v2026_v11 = vmul.f32 %v5122_v36, %v1864_v61  ;;  %v1465_v12 = vadd.f32 %v5217_v16, %v1442_v4 }
  0x87   : > { %v1934_v13 = vrot.slane %v1883_v5, 1  ;;  %v2024_v14 = vmul.f32 %v5122_v36, %v2007_v7  ;;  %v2183_v17 = vmul.f32 %v5244_v15, %v5132_v43  ;;  %v2075_v23 = vrot.slane %v2025_v10, 2 }
  0x88   : > { %v1482_v19 = vmax.f32 %v1466_v8, 0.0  ;;  %v1933_v22 = vsel %vm516_vm0, %v1931_v6, %v1932_v9  ;;  %v2077_v24 = vrot.slane %v2026_v11, 2  ;;  %v1481_v25 = vmax.f32 %v1465_v12, 0.0  ;;  %v4115_v6 = vld [vmem:[%s5087_s29 + $0x84] sm:$0xe] }
  0x89   : > { %v1935_v26 = vsel %vm516_vm0, %v1932_v9, %v1934_v13  ;;  %v1984_v27 = vadd.f32 %v1933_v22, %v1825_v59  ;;  %v2074_v28 = vrot.slane %v2024_v14, 2  ;;  %v2184_v37 = vmul.f32 %v5247_v20, %v5132_v43  ;;  %v4105_v59 = vld [vmem:[%s5087_s29 + $0x8c] sm:$0x1] }
  0x8a   : > { %v1985_v33 = vadd.f32 %v1935_v26, %v1826_v2  ;;  %v2078_v35 = vsel %vm661_vm1, %v2075_v23, %v2077_v24  ;;  %v2222_v39 = vunpack.c.l.bf16 %v4067_v18  ;;  %v1496_v41 = vpack.c.bf16 %v1482_v19, %v1481_v25 }
  0x8b   : > { %v2076_v42 = vsel %vm661_vm1, %v2074_v28, %v2075_v23  ;;  %v2239_v44 = vmul.f32 %v5244_v15, %v5146_v60  ;;  %v2240_v45 = vmul.f32 %v5247_v20, %v5146_v60  ;;  %v2365_v49 = vunpack.c.l.bf16 %v4077_v30 }
  0x8c   : > { %v2127_v46 = vadd.f32 %v2076_v42, %v1984_v27  ;;  %v2128_v47 = vadd.f32 %v2078_v35, %v1985_v33  ;;  %v2241_v48 = vmul.f32 %v5146_v60, %v2222_v39  ;;  %1504 = vst [vmem:[#allocation2 + $0x8] sm:$0xff] %v1496_v41  ;;  %4643 = vmatmul.mubr.bf16.vlgmr.msra.gmra.mrb[0].mxu0 %v1496_v41  ;;  %v2518_v0 = vunpack.c.l.bf16 %v4088_v50  ;;  %v446_v35 = vld [vmem:[%s5087_s29 + $0x20] sm:$0x1] }
  0x8d   : > { %v2289_v51 = vrot.slane %v2239_v44, 1  ;;  %v2290_v52 = vrot.slane %v2240_v45, 1  ;;  %v2383_v53 = vmul.f32 %v5247_v20, %v5153_v1  ;;  %v2384_v54 = vmul.f32 %v5153_v1, %v2222_v39  ;;  %v591_v44 = vld [vmem:[%s5087_s29 + $0x18] sm:$0xe] }
  0x8e   : > { %v2199_v55 = vadd.f32 %v2183_v17, %v2127_v46  ;;  %v2200_v56 = vadd.f32 %v2184_v37, %v2128_v47  ;;  %v2292_v57 = vrot.slane %v2241_v48, 1  ;;  %v2382_v58 = vmul.f32 %v5153_v1, %v2365_v49 }
  0x8f   : > { %v2291_v61 = vsel %vm516_vm0, %v2289_v51, %v2290_v52  ;;  %v2433_v62 = vrot.slane %v2383_v53, 2  ;;  %v2435_v63 = vrot.slane %v2384_v54, 2  ;;  %v2519_v5 = vunpack.c.h.bf16 %v4088_v50 }
  0x90   : > { %v2293_v2 = vsel %vm516_vm0, %v2290_v52, %v2292_v57  ;;  %v2342_v3 = vadd.f32 %v2291_v61, %v2199_v55  ;;  %v2432_v4 = vrot.slane %v2382_v58, 2  ;;  %v2541_v9 = vmul.f32 %v5170_v21, %v2518_v0  ;;  %v3913_v57 = vld [vmem:[%s5087_s29 + $0x24] sm:$0xff]  }
  0x91   : > { %v2343_v7 = vadd.f32 %v2293_v2, %v2200_v56  ;;  %v2436_v8 = vsel %vm661_vm1, %v2433_v62, %v2435_v63  ;;  %v2580_v10 = vunpack.c.l.bf16 %v4105_v59  ;;  %v2542_v12 = vmul.f32 %v5170_v21, %v2519_v5 }
  0x92   : > { %v2434_v11 = vsel %vm661_vm1, %v2432_v4, %v2433_v62  ;;  %v2597_v13 = vmul.f32 %v5179_v32, %v2518_v0  ;;  %v2598_v14 = vmul.f32 %v5179_v32, %v2519_v5  ;;  %v2723_v22 = vunpack.c.l.bf16 %v4115_v6 }
  0x93   : > { %v2485_v17 = vadd.f32 %v2434_v11, %v2342_v3  ;;  %v2486_v18 = vadd.f32 %v2436_v8, %v2343_v7  ;;  %v2599_v19 = vmul.f32 %v5179_v32, %v2580_v10  ;;  %v2741_v25 = vmul.f32 %v5189_v40, %v2519_v5 }
  0x94   : > { %v2647_v23 = vrot.slane %v2597_v13, 1  ;;  %v2648_v24 = vrot.slane %v2598_v14, 1  ;;  %v2742_v26 = vmul.f32 %v5189_v40, %v2580_v10  ;;  %v2740_v33 = vmul.f32 %v5189_v40, %v2723_v22  ;;  %v3929_v10 = vld [vmem:[%s5087_s29 + $0x2c] sm:$0x1] }
  0x95   : > { %v2557_v27 = vadd.f32 %v2541_v9, %v2485_v17  ;;  %v2558_v28 = vadd.f32 %v2542_v12, %v2486_v18  ;;  %v2650_v30 = vrot.slane %v2599_v19, 1  ;;  %v2791_v39 = vrot.slane %v2741_v25, 2  ;;  %v3939_v17 = vld [vmem:[%s5087_s29 + $0x24] sm:$0xe] }
  0x96   : > { %v2649_v37 = vsel %vm516_vm0, %v2647_v23, %v2648_v24  ;;  %v2793_v41 = vrot.slane %v2742_v26, 2  ;;  %v416_v42 = vmul.f32 %v5174_v31, %v5110_v29  ;;  %v2790_v47 = vrot.slane %v2740_v33, 2 }
  0x97   : > { %v2651_v45 = vsel %vm516_vm0, %v2648_v24, %v2650_v30  ;;  %v2700_v46 = vadd.f32 %v2649_v37, %v2557_v27  ;;  %v417_v48 = vmul.f32 %v5183_v38, %v5110_v29  ;;  %v454_v51 = vunpack.c.l.bf16 %v446_v35  ;;  %v4525_v37 = vld [vmem:[%s5087_s29 + $0x30] sm:$0xff]  }
  0x98   : > { %v2701_v49 = vadd.f32 %v2651_v45, %v2558_v28  ;;  %v2794_v50 = vsel %vm661_vm1, %v2791_v39, %v2793_v41  ;;  %v474_v52 = vmul.f32 %v5174_v31, %v5116_v34  ;;  %v2792_v53 = vsel %vm661_vm1, %v2790_v47, %v2791_v39  ;;  %v3967_v45 = vld [vmem:[%s5087_s29 + $0x38] sm:$0x1] }
  0x99   : > { %v475_v54 = vmul.f32 %v5183_v38, %v5116_v34  ;;  %v599_v55 = vunpack.c.l.bf16 %v591_v44  ;;  %v620_v56 = vmul.f32 %v5183_v38, %v5122_v36  ;;  %v2843_v58 = vadd.f32 %v2792_v53, %v2700_v46 }
  0x9a   : > { %v2844_v59 = vadd.f32 %v2794_v50, %v2701_v49  ;;  %v476_v61 = vmul.f32 %v5116_v34, %v454_v51  ;;  %v527_v62 = vrot.slane %v474_v52, 1  ;;  %v621_v31 = vmul.f32 %v5122_v36, %v454_v51 }
  0x9b   : > { %v528_v63 = vrot.slane %v475_v54, 1  ;;  %v619_v0 = vmul.f32 %v5122_v36, %v599_v55  ;;  %v673_v2 = vrot.slane %v620_v56, 2  ;;  %v2866_v3 = vadd.f32 %v5217_v16, %v2843_v58 }
  0x9c   : > { %v2867_v4 = vadd.f32 %v5217_v16, %v2844_v59  ;;  %v530_v5 = vrot.slane %v476_v61, 1  ;;  %v755_v38 = vunpack.c.l.bf16 %v3913_v57  ;;  %v675_v8 = vrot.slane %v621_v31, 2 }
  0x9d   : > { %v529_v6 = vsel %vm516_vm0, %v527_v62, %v528_v63  ;;  %v672_v7 = vrot.slane %v619_v0, 2  ;;  %v756_v9 = vunpack.c.h.bf16 %v3913_v57  ;;  %v2882_v11 = vmax.f32 %v2866_v3, 0.0  ;;  %v3977_v57 = vld [vmem:[%s5087_s29 + $0x30] sm:$0xe] }
  0x9e   : > { %v2883_v12 = vmax.f32 %v2867_v4, 0.0  ;;  %v531_v13 = vsel %vm516_vm0, %v528_v63, %v530_v5  ;;  %v577_v14 = vadd.f32 %v529_v6, %v416_v42  ;;  %v676_v22 = vsel %vm661_vm1, %v673_v2, %v675_v8 }
  0x9f   : > { %v578_v18 = vadd.f32 %v531_v13, %v417_v48  ;;  %v674_v19 = vsel %vm661_vm1, %v672_v7, %v673_v2  ;;  %v779_v23 = vmul.f32 %v5132_v43, %v755_v38  ;;  %v780_v26 = vmul.f32 %v5132_v43, %v756_v9 }
  0xa0   : > { %v2897_v24 = vpack.c.bf16 %v2883_v12, %v2882_v11  ;;  %v722_v25 = vadd.f32 %v674_v19, %v577_v14  ;;  %v817_v27 = vunpack.c.l.bf16 %v3929_v10  ;;  %v837_v30 = vmul.f32 %v5146_v60, %v755_v38  ;;  %v4030_v14 = vld [vmem:[%s5087_s29 + $0x80] sm:$0x1] }
  0xa1   : > { %v723_v28 = vadd.f32 %v676_v22, %v578_v18  ;;  %v838_v33 = vmul.f32 %v5146_v60, %v756_v9  ;;  %v961_v35 = vunpack.c.l.bf16 %v3939_v17  ;;  %v982_v42 = vmul.f32 %v5153_v1, %v756_v9 }
  0xa2   : > { %2905 = vst [vmem:[#allocation2 + $0x48] sm:$0xff] %v2897_v24  ;;  %4675 = vmatmul.mubr.bf16.vlgmr.msra.gmra.mrb[0].mxu1 %v2897_v24  ;;  %v795_v39 = vadd.f32 %v779_v23, %v722_v25  ;;  %v839_v41 = vmul.f32 %v5146_v60, %v817_v27  ;;  %v983_v44 = vmul.f32 %v5153_v1, %v817_v27  ;;  %v889_v46 = vrot.slane %v837_v30, 1  ;;  %v4040_v23 = vld [vmem:[%s5087_s29 + $0x78] sm:$0xe] }
  0xa3   : > { %v796_v43 = vadd.f32 %v780_v26, %v723_v28  ;;  %v890_v47 = vrot.slane %v838_v33, 1  ;;  %v981_v48 = vmul.f32 %v5153_v1, %v961_v35  ;;  %v1034_v50 = vrot.slane %v982_v42, 2 }
  0xa4   : > { %v892_v49 = vrot.slane %v839_v41, 1  ;;  %v1036_v51 = vrot.slane %v983_v44, 2  ;;  %v5406_v52 = vunpack.c.l.bf16 %v4525_v37  ;;  %v5409_v55 = vunpack.c.h.bf16 %v4525_v37 }
  0xa5   : > { %v891_v53 = vsel %vm516_vm0, %v889_v46, %v890_v47  ;;  %v1033_v54 = vrot.slane %v981_v48, 2  ;;  %v1178_v56 = vunpack.c.l.bf16 %v3967_v45  ;;  %v1322_v38 = vunpack.c.l.bf16 %v3977_v57  ;;  %v4052_v46 = vld [vmem:[%s5087_s29 + $0x84] sm:$0xff]  }
  0xa6   : > { %v893_v58 = vsel %vm516_vm0, %v890_v47, %v892_v49  ;;  %v939_v59 = vadd.f32 %v891_v53, %v795_v39  ;;  %v1037_v61 = vsel %vm661_vm1, %v1034_v50, %v1036_v51  ;;  %v1140_v62 = vmul.f32 %v5406_v52, %v5170_v21 }
  0xa7   : > { %v940_v63 = vadd.f32 %v893_v58, %v796_v43  ;;  %v1035_v0 = vsel %vm661_vm1, %v1033_v54, %v1034_v50  ;;  %v1141_v31 = vmul.f32 %v5409_v55, %v5170_v21  ;;  %v1198_v2 = vmul.f32 %v5406_v52, %v5179_v32 }
  0xa8   : > { %v1083_v3 = vadd.f32 %v1035_v0, %v939_v59  ;;  %v1199_v4 = vmul.f32 %v5409_v55, %v5179_v32  ;;  %v1200_v5 = vmul.f32 %v5179_v32, %v1178_v56  ;;  %v1343_v8 = vmul.f32 %v5409_v55, %v5189_v40 }
  0xa9   : > { %v1084_v6 = vadd.f32 %v1037_v61, %v940_v63  ;;  %v1250_v7 = vrot.slane %v1198_v2, 1  ;;  %v1344_v9 = vmul.f32 %v5189_v40, %v1178_v56  ;;  %v1342_v13 = vmul.f32 %v5189_v40, %v1322_v38  ;;  %v5459_v38 = vld [vmem:[%s6376_s1 + $0x3] ss:$0 sm:$0xff] }
  0xaa   : > { %v1156_v10 = vadd.f32 %v1140_v62, %v1083_v3  ;;  %v1251_v11 = vrot.slane %v1199_v4, 1  ;;  %v1253_v12 = vrot.slane %v1200_v5, 1  ;;  %v1395_v18 = vrot.slane %v1343_v8, 2  ;;  %v4078_v3 = vld [vmem:[%s5087_s29 + $0x84] sm:$0xe] }
  0xab   : > { %v1157_v17 = vadd.f32 %v1141_v31, %v1084_v6  ;;  %v1397_v19 = vrot.slane %v1344_v9, 2  ;;  %v1827_v22 = vmul.f32 %v5244_v15, %v5110_v29  ;;  %v1394_v26 = vrot.slane %v1342_v13, 2 }
  0xac   : > { %v1252_v24 = vsel %vm516_vm0, %v1250_v7, %v1251_v11  ;;  %v1254_v25 = vsel %vm516_vm0, %v1251_v11, %v1253_v12  ;;  %v1828_v27 = vmul.f32 %v5247_v20, %v5110_v29  ;;  %v1865_v35 = vunpack.c.l.bf16 %v4030_v14  ;;  %v4544_v12 = vld [vmem:[%s5087_s29 + $0x90] sm:$0xff]  }
  0xad   : > { %v1300_v28 = vadd.f32 %v1252_v24, %v1156_v10  ;;  %v1301_v30 = vadd.f32 %v1254_v25, %v1157_v17  ;;  %v1398_v33 = vsel %vm661_vm1, %v1395_v18, %v1397_v19  ;;  %v1396_v37 = vsel %vm661_vm1, %v1394_v26, %v1395_v18  ;;  %v4106_v19 = vld [vmem:[%s5087_s29 + $0x98] sm:$0x1]  ;;  %v5472_v25 = vld [vmem:[%s6376_s1 + $0x5] ss:$0 sm:$0xff] }
  0xae   : > { %v1884_v39 = vmul.f32 %v5244_v15, %v5116_v34  ;;  %v1885_v41 = vmul.f32 %v5247_v20, %v5116_v34  ;;  %v2008_v42 = vunpack.c.l.bf16 %v4040_v23  ;;  %v1886_v43 = vmul.f32 %v5116_v34, %v1865_v35 }
  0xaf   : > { %v1444_v44 = vadd.f32 %v1396_v37, %v1300_v28  ;;  %v1445_v45 = vadd.f32 %v1398_v33, %v1301_v30  ;;  %v2028_v29 = vmul.f32 %v5247_v20, %v5122_v36  ;;  %v2029_v50 = vmul.f32 %v5122_v36, %v1865_v35  ;;  %v4068_v20 = vld [vmem:[%s5087_s29 + $0x8c] sm:$0x1] }
  0xb0   : > { %v1936_v47 = vrot.slane %v1884_v39, 1  ;;  %v1937_v48 = vrot.slane %v1885_v41, 1  ;;  %v2027_v49 = vmul.f32 %v5122_v36, %v2008_v42  ;;  %v1939_v53 = vrot.slane %v1886_v43, 1  ;;  %v4116_v39 = vld [vmem:[%s5087_s29 + $0x90] sm:$0xe] }
  0xb1   : > { %v1467_v15 = vadd.f32 %v5217_v16, %v1444_v44  ;;  %v1468_v51 = vadd.f32 %v5217_v16, %v1445_v45  ;;  %v2080_v54 = vrot.slane %v2028_v29, 2  ;;  %v2082_v57 = vrot.slane %v2029_v50, 2 }
  0xb2   : > { %v1938_v56 = vsel %vm516_vm0, %v1936_v47, %v1937_v48  ;;  %v2079_v34 = vrot.slane %v2027_v49, 2  ;;  %v2162_v58 = vunpack.c.l.bf16 %v4052_v46  ;;  %v1940_v62 = vsel %vm516_vm0, %v1937_v48, %v1939_v53 }
  0xb3   : > { %v1483_v59 = vmax.f32 %v1467_v15, 0.0  ;;  %v1484_v61 = vmax.f32 %v1468_v51, 0.0  ;;  %v1986_v63 = vadd.f32 %v1938_v56, %v1827_v22  ;;  %v1987_v36 = vadd.f32 %v1940_v62, %v1828_v27  ;;  %v379_v51 = vld [vmem:[%s5087_s29 + $0x24] sm:$0xff]  }
  0xb4   : > { %v2081_v0 = vsel %vm661_vm1, %v2079_v34, %v2080_v54  ;;  %v2083_v31 = vsel %vm661_vm1, %v2080_v54, %v2082_v57  ;;  %v2163_v2 = vunpack.c.h.bf16 %v4052_v46  ;;  %v2185_v6 = vmul.f32 %v5459_v38, %v2162_v58 }
  0xb5   : > { %v1497_v4 = vpack.c.bf16 %v1484_v61, %v1483_v59  ;;  %v2129_v5 = vadd.f32 %v2081_v0, %v1986_v63  ;;  %v2223_v7 = vunpack.c.l.bf16 %v4068_v20  ;;  %v2130_v8 = vadd.f32 %v2083_v31, %v1987_v36 }
  0xb6   : > { %v2186_v9 = vmul.f32 %v5459_v38, %v2163_v2  ;;  %v2242_v10 = vmul.f32 %v5146_v60, %v2162_v58  ;;  %v2243_v11 = vmul.f32 %v5146_v60, %v2163_v2  ;;  %v2366_v17 = vunpack.c.l.bf16 %v4078_v3 }
  0xb7   : > { %1505 = vst [vmem:[#allocation2 + $0x10] sm:$0xff] %v1497_v4  ;;  %4646 = vmatprep.mubr.bf16.mxu0 %v1497_v4  ;;  %v2201_v13 = vadd.f32 %v2185_v6, %v2129_v5  ;;  %v2244_v14 = vmul.f32 %v5146_v60, %v2223_v7  ;;  %v2386_v18 = vmul.f32 %v5153_v1, %v2163_v2  ;;  %v5476_v60 = vunpack.c.l.bf16 %v4544_v12  ;;  %v5505_v6 = vld [vmem:[%s6376_s1] ss:$0 sm:$0xff] }
  0xb8   : > { %v2202_v22 = vadd.f32 %v2186_v9, %v2130_v8  ;;  %v2294_v23 = vrot.slane %v2242_v10, 1  ;;  %v2295_v24 = vrot.slane %v2243_v11, 1  ;;  %v2387_v26 = vmul.f32 %v5472_v25, %v2223_v7  ;;  %v592_v7 = vld [vmem:[%s5087_s29 + $0x24] sm:$0xe]  ;;  %v5514_v11 = vld [vmem:[%s6376_s1 + $0x1] ss:$0 sm:$0xff] }
  0xb9   : > { %v2297_v27 = vrot.slane %v2244_v14, 1  ;;  %v2385_v28 = vmul.f32 %v5472_v25, %v2366_v17  ;;  %v2438_v30 = vrot.slane %v2386_v18, 2  ;;  %v5479_v35 = vunpack.c.h.bf16 %v4544_v12 }
  0xba   : > { %v2296_v33 = vsel %vm516_vm0, %v2294_v23, %v2295_v24  ;;  %v2440_v1 = vrot.slane %v2387_v26, 2  ;;  %v2581_v37 = vunpack.c.l.bf16 %v4106_v19  ;;  %v2543_v45 = vmul.f32 %v5476_v60, %v5170_v21 }
  0xbb   : > { %v2298_v41 = vsel %vm516_vm0, %v2295_v24, %v2297_v27  ;;  %v2344_v42 = vadd.f32 %v2296_v33, %v2201_v13  ;;  %v2437_v44 = vrot.slane %v2385_v28, 2  ;;  %v2544_v46 = vmul.f32 %v5479_v35, %v5170_v21  ;;  %v5523_v24 = vld [vmem:[%s6376_s1 + $0x2] ss:$0 sm:$0xff] }
  0xbc   : > { %v2345_v43 = vadd.f32 %v2298_v41, %v2202_v22  ;;  %v2441_v29 = vsel %vm661_vm1, %v2438_v30, %v2440_v1  ;;  %v2600_v47 = vmul.f32 %v5476_v60, %v5179_v32  ;;  %v2601_v49 = vmul.f32 %v5479_v35, %v5179_v32 }
  0xbd   : > { %v2439_v48 = vsel %vm661_vm1, %v2437_v44, %v2438_v30  ;;  %v2602_v50 = vmul.f32 %v5179_v32, %v2581_v37  ;;  %v2724_v15 = vunpack.c.l.bf16 %v4116_v39  ;;  %v2744_v34 = vmul.f32 %v5479_v35, %v5189_v40  ;;  %v447_v32 = vld [vmem:[%s5087_s29 + $0x2c] sm:$0x1] }
  0xbe   : > { %v2487_v53 = vadd.f32 %v2439_v48, %v2344_v42  ;;  %v2488_v54 = vadd.f32 %v2441_v29, %v2345_v43  ;;  %v2652_v56 = vrot.slane %v2600_v47, 1  ;;  %v2653_v21 = vrot.slane %v2601_v49, 1  ;;  %v3930_v42 = vld [vmem:[%s5087_s29 + $0x38] sm:$0x1] }
  0xbf   : > { %v2655_v57 = vrot.slane %v2602_v50, 1  ;;  %v2743_v58 = vmul.f32 %v5189_v40, %v2724_v15  ;;  %v2745_v20 = vmul.f32 %v5189_v40, %v2581_v37  ;;  %v2796_v62 = vrot.slane %v2744_v34, 2 }
  0xc0   : > { %v2559_v59 = vadd.f32 %v2543_v45, %v2487_v53  ;;  %v2560_v61 = vadd.f32 %v2544_v46, %v2488_v54  ;;  %v395_v63 = vunpack.c.l.bf16 %v379_v51  ;;  %v2654_v36 = vsel %vm516_vm0, %v2652_v56, %v2653_v21  ;;  %v3940_v46 = vld [vmem:[%s5087_s29 + $0x30] sm:$0xe]  ;;  %v5543_v56 = vld [vmem:[%s6376_s1 + $0x4] ss:$0 sm:$0xff] }
  0xc1   : > { %v2656_v0 = vsel %vm516_vm0, %v2653_v21, %v2655_v57  ;;  %v2795_v31 = vrot.slane %v2743_v58, 2  ;;  %v2798_v2 = vrot.slane %v2745_v20, 2  ;;  %v396_v5 = vunpack.c.h.bf16 %v379_v51 }
  0xc2   : > { %v2702_v3 = vadd.f32 %v2654_v36, %v2559_v59  ;;  %v2703_v4 = vadd.f32 %v2656_v0, %v2560_v61  ;;  %v418_v40 = vmul.f32 %v5505_v6, %v395_v63  ;;  %v455_v10 = vunpack.c.l.bf16 %v447_v32 }
  0xc3   : > { %v2797_v8 = vsel %vm661_vm1, %v2795_v31, %v2796_v62  ;;  %v2799_v9 = vsel %vm661_vm1, %v2796_v62, %v2798_v2  ;;  %v477_v12 = vmul.f32 %v5514_v11, %v395_v63  ;;  %v419_v17 = vmul.f32 %v5505_v6, %v396_v5  ;;  %v3953_v62 = vld [vmem:[%s5087_s29 + $0x3c] sm:$0xff]   ;;  %v3968_v31 = vld [vmem:[%s5087_s29 + $0x44] sm:$0x1] }
  0xc4   : > { %v2845_v13 = vadd.f32 %v2797_v8, %v2702_v3  ;;  %v2846_v14 = vadd.f32 %v2799_v9, %v2703_v4  ;;  %v478_v18 = vmul.f32 %v5514_v11, %v396_v5  ;;  %v479_v19 = vmul.f32 %v5514_v11, %v455_v10 }
  0xc5   : > { %v532_v22 = vrot.slane %v477_v12, 1  ;;  %v600_v23 = vunpack.c.l.bf16 %v592_v7  ;;  %v623_v26 = vmul.f32 %v5523_v24, %v396_v5  ;;  %v624_v33 = vmul.f32 %v5523_v24, %v455_v10 }
  0xc6   : > { %v2868_v27 = vadd.f32 %v5217_v16, %v2845_v13  ;;  %v2869_v28 = vadd.f32 %v5217_v16, %v2846_v14  ;;  %v533_v30 = vrot.slane %v478_v18, 1  ;;  %v535_v1 = vrot.slane %v479_v19, 1 }
  0xc7   : > { %v622_v37 = vmul.f32 %v5523_v24, %v600_v23  ;;  %v678_v39 = vrot.slane %v623_v26, 2  ;;  %v781_v41 = vmul.f32 %v5459_v38, %v5406_v52  ;;  %v680_v29 = vrot.slane %v624_v33, 2  ;;  %v5564_v23 = vld [vmem:[%s6376_s1 + $0x6] ss:$0 sm:$0xff] }
  0xc8   : > { %v2884_v44 = vmax.f32 %v2868_v27, 0.0  ;;  %v2885_v45 = vmax.f32 %v2869_v28, 0.0  ;;  %v534_v43 = vsel %vm516_vm0, %v532_v22, %v533_v30  ;;  %v536_v47 = vsel %vm516_vm0, %v533_v30, %v535_v1  ;;  %v5571_v30 = vld [vmem:[%s6376_s1 + $0x7] ss:$0 sm:$0xff] }
  0xc9   : > { %v579_v16 = vadd.f32 %v534_v43, %v418_v40  ;;  %v677_v48 = vrot.slane %v622_v37, 2  ;;  %v782_v49 = vmul.f32 %v5459_v38, %v5409_v55  ;;  %v580_v15 = vadd.f32 %v536_v47, %v419_v17  ;;  %v3978_v17 = vld [vmem:[%s5087_s29 + $0x3c] sm:$0xe] }
  0xca   : > { %v2898_v50 = vpack.c.bf16 %v2885_v45, %v2884_v44  ;;  %v681_v51 = vsel %vm661_vm1, %v678_v39, %v680_v29  ;;  %v818_v53 = vunpack.c.l.bf16 %v3930_v42  ;;  %v840_v34 = vmul.f32 %v5543_v56, %v5406_v52  ;;  %v5579_v42 = vld [vmem:[%s6376_s1 + $0x8] ss:$0 sm:$0xff] }
  0xcb   : > { %v679_v54 = vsel %vm661_vm1, %v677_v48, %v678_v39  ;;  %v841_v21 = vmul.f32 %v5543_v56, %v5409_v55  ;;  %v962_v57 = vunpack.c.l.bf16 %v3940_v46  ;;  %v725_v20 = vadd.f32 %v681_v51, %v580_v15  ;;  %v4017_v45 = vld [vmem:[%s5087_s29 + $0x84] sm:$0xff]  }
  0xcc   : > { %2906 = vst [vmem:[#allocation2 + $0x50] sm:$0xff] %v2898_v50  ;;  %4678 = vmatprep.mubr.bf16.mxu1 %v2898_v50  ;;  %v724_v58 = vadd.f32 %v679_v54, %v579_v16  ;;  %v842_v59 = vmul.f32 %v5543_v56, %v818_v53  ;;  %v985_v61 = vmul.f32 %v5472_v25, %v5409_v55  ;;  %v894_v63 = vrot.slane %v840_v34, 1  ;;  %v4031_v16 = vld [vmem:[%s5087_s29 + $0x8c] sm:$0x1] }
  0xcd   : > { %v895_v32 = vrot.slane %v841_v21, 1  ;;  %v984_v36 = vmul.f32 %v5472_v25, %v962_v57  ;;  %v986_v0 = vmul.f32 %v5472_v25, %v818_v53  ;;  %v798_v3 = vadd.f32 %v782_v49, %v725_v20 }
  0xce   : > { %v797_v2 = vadd.f32 %v781_v41, %v724_v58  ;;  %v897_v4 = vrot.slane %v842_v59, 1  ;;  %v1039_v5 = vrot.slane %v985_v61, 2  ;;  %v1118_v9 = vunpack.c.l.bf16 %v3953_v62  ;;  %v4041_v59 = vld [vmem:[%s5087_s29 + $0x84] sm:$0xe] }
  0xcf   : > { %v896_v40 = vsel %vm516_vm0, %v894_v63, %v895_v32  ;;  %v1038_v7 = vrot.slane %v984_v36, 2  ;;  %v1041_v8 = vrot.slane %v986_v0, 2  ;;  %v1119_v13 = vunpack.c.h.bf16 %v3953_v62 }
  0xd0   : > { %v898_v10 = vsel %vm516_vm0, %v895_v32, %v897_v4  ;;  %v941_v12 = vadd.f32 %v896_v40, %v797_v2  ;;  %v1179_v14 = vunpack.c.l.bf16 %v3968_v31  ;;  %v1142_v26 = vmul.f32 %v5564_v23, %v1118_v9 }
  0xd1   : > { %v942_v18 = vadd.f32 %v898_v10, %v798_v3  ;;  %v1040_v19 = vsel %vm661_vm1, %v1038_v7, %v1039_v5  ;;  %v1042_v22 = vsel %vm661_vm1, %v1039_v5, %v1041_v8  ;;  %v1143_v28 = vmul.f32 %v5564_v23, %v1119_v13 }
  0xd2   : > { %v1085_v27 = vadd.f32 %v1040_v19, %v941_v12  ;;  %v1201_v33 = vmul.f32 %v5571_v30, %v1118_v9  ;;  %v1202_v1 = vmul.f32 %v5571_v30, %v1119_v13  ;;  %v1203_v39 = vmul.f32 %v5571_v30, %v1179_v14  ;;  %v5601_v12 = vld [vmem:[%s6377_s2] ss:$0 sm:$0xff]  ;;  %v4069_v19 = vld [vmem:[%s5087_s29 + $0x98] sm:$0x1] }
  0xd3   : > { %v1086_v37 = vadd.f32 %v1042_v22, %v942_v18  ;;  %v1323_v41 = vunpack.c.l.bf16 %v3978_v17  ;;  %v1346_v44 = vmul.f32 %v5579_v42, %v1119_v13  ;;  %v1347_v47 = vmul.f32 %v5579_v42, %v1179_v14 }
  0xd4   : > { %v1158_v43 = vadd.f32 %v1142_v26, %v1085_v27  ;;  %v1255_v29 = vrot.slane %v1201_v33, 1  ;;  %v1256_v46 = vrot.slane %v1202_v1, 1  ;;  %v1258_v49 = vrot.slane %v1203_v39, 1 }
  0xd5   : > { %v1159_v48 = vadd.f32 %v1143_v28, %v1086_v37  ;;  %v1345_v50 = vmul.f32 %v5579_v42, %v1323_v41  ;;  %v1400_v15 = vrot.slane %v1346_v44, 2  ;;  %v1402_v53 = vrot.slane %v1347_v47, 2  ;;  %v4079_v41 = vld [vmem:[%s5087_s29 + $0x90] sm:$0xe] }
  0xd6   : > { %v1257_v51 = vsel %vm516_vm0, %v1255_v29, %v1256_v46  ;;  %v1806_v54 = vunpack.c.l.bf16 %v4017_v45  ;;  %v1807_v34 = vunpack.c.h.bf16 %v4017_v45  ;;  %v1259_v21 = vsel %vm516_vm0, %v1256_v46, %v1258_v49 }
  0xd7   : > { %v1302_v57 = vadd.f32 %v1257_v51, %v1158_v43  ;;  %v1399_v58 = vrot.slane %v1345_v50, 2  ;;  %v1866_v20 = vunpack.c.l.bf16 %v4031_v16  ;;  %v1303_v61 = vadd.f32 %v1259_v21, %v1159_v48 }
  0xd8   : > { %v1403_v62 = vsel %vm661_vm1, %v1400_v15, %v1402_v53  ;;  %v1829_v63 = vmul.f32 %v5505_v6, %v1806_v54  ;;  %v1830_v32 = vmul.f32 %v5505_v6, %v1807_v34  ;;  %v1887_v0 = vmul.f32 %v5514_v11, %v1806_v54  ;;  %v4092_v53 = vld [vmem:[%s5087_s29 + $0x9c] sm:$0xff]  }
  0xd9   : > { %v1401_v36 = vsel %vm661_vm1, %v1399_v58, %v1400_v15  ;;  %v1888_v31 = vmul.f32 %v5514_v11, %v1807_v34  ;;  %v1889_v2 = vmul.f32 %v5514_v11, %v1866_v20  ;;  %v1447_v4 = vadd.f32 %v1403_v62, %v1303_v61  ;;  %v4107_v58 = vld [vmem:[%s5087_s29 + $0xa4] sm:$0x1] }
  0xda   : > { %v1446_v3 = vadd.f32 %v1401_v36, %v1302_v57  ;;  %v2009_v5 = vunpack.c.l.bf16 %v4041_v59  ;;  %v2031_v40 = vmul.f32 %v5523_v24, %v1807_v34  ;;  %v1941_v7 = vrot.slane %v1887_v0, 1 }
  0xdb   : > { %v1942_v8 = vrot.slane %v1888_v31, 1  ;;  %v1944_v9 = vrot.slane %v1889_v2, 1  ;;  %v2032_v10 = vmul.f32 %v5523_v24, %v1866_v20  ;;  %v1470_v14 = vadd.f32 %v5601_v12, %v1447_v4 }
  0xdc   : > { %v1469_v13 = vadd.f32 %v5601_v12, %v1446_v3  ;;  %v2030_v17 = vmul.f32 %v5523_v24, %v2009_v5  ;;  %v2085_v18 = vrot.slane %v2031_v40, 2  ;;  %v2187_v28 = vmul.f32 %v5459_v38, %v5476_v60  ;;  %v4117_v5 = vld [vmem:[%s5087_s29 + $0x9c] sm:$0xe] }
  0xdd   : > { %v1943_v22 = vsel %vm516_vm0, %v1941_v7, %v1942_v8  ;;  %v1945_v26 = vsel %vm516_vm0, %v1942_v8, %v1944_v9  ;;  %v2087_v27 = vrot.slane %v2032_v10, 2  ;;  %v1486_v1 = vmax.f32 %v1470_v14, 0.0 }
  0xde   : > { %v1485_v33 = vmax.f32 %v1469_v13, 0.0  ;;  %v1988_v37 = vadd.f32 %v1943_v22, %v1829_v63  ;;  %v1989_v39 = vadd.f32 %v1945_v26, %v1830_v32  ;;  %v2084_v44 = vrot.slane %v2030_v17, 2 }
  0xdf   : > { %v2088_v45 = vsel %vm661_vm1, %v2085_v18, %v2087_v27  ;;  %v2188_v43 = vmul.f32 %v5459_v38, %v5479_v35  ;;  %v2224_v29 = vunpack.c.l.bf16 %v4069_v19  ;;  %v2245_v16 = vmul.f32 %v5543_v56, %v5476_v60 }
  0xe0   : > { %v1498_v46 = vpack.c.bf16 %v1486_v1, %v1485_v33  ;;  %v2132_v47 = vadd.f32 %v2088_v45, %v1989_v39  ;;  %v2246_v48 = vmul.f32 %v5543_v56, %v5479_v35  ;;  %v2086_v49 = vsel %vm661_vm1, %v2084_v44, %v2085_v18  ;;  %v448_v45 = vld [vmem:[%s5087_s29 + $0x38] sm:$0x1] }
  0xe1   : > { %v2247_v50 = vmul.f32 %v5543_v56, %v2224_v29  ;;  %v2367_v15 = vunpack.c.l.bf16 %v4079_v41  ;;  %v2389_v51 = vmul.f32 %v5472_v25, %v5479_v35  ;;  %v2131_v54 = vadd.f32 %v2086_v49, %v1988_v37 }
  0xe2   : > { %1506 = vst [vmem:[#allocation2 + $0x18] sm:$0xff] %v1498_v46  ;;  %4647 = vmatmul.mubr.bf16.gmra.mrb[4].mxu0 %v1498_v46  ;;  %v2204_v34 = vadd.f32 %v2188_v43, %v2132_v47  ;;  %v2299_v21 = vrot.slane %v2245_v16, 1  ;;  %v2300_v57 = vrot.slane %v2246_v48, 1  ;;  %v2390_v61 = vmul.f32 %v5472_v25, %v2224_v29  ;;  %v593_v16 = vld [vmem:[%s5087_s29 + $0x30] sm:$0xe] }
  0xe3   : > { %v2302_v20 = vrot.slane %v2247_v50, 1  ;;  %v2388_v59 = vmul.f32 %v5472_v25, %v2367_v15  ;;  %v2443_v62 = vrot.slane %v2389_v51, 2  ;;  %v2203_v63 = vadd.f32 %v2187_v28, %v2131_v54 }
  0xe4   : > { %v2301_v32 = vsel %vm516_vm0, %v2299_v21, %v2300_v57  ;;  %v2522_v36 = vunpack.c.l.bf16 %v4092_v53  ;;  %v2523_v0 = vunpack.c.h.bf16 %v4092_v53  ;;  %v2445_v3 = vrot.slane %v2390_v61, 2 }
  0xe5   : > { %v2303_v31 = vsel %vm516_vm0, %v2300_v57, %v2302_v20  ;;  %v2442_v2 = vrot.slane %v2388_v59, 2  ;;  %v2582_v4 = vunpack.c.l.bf16 %v4107_v58  ;;  %v2346_v40 = vadd.f32 %v2301_v32, %v2203_v63  ;;  %v3917_v59 = vld [vmem:[%s5087_s29 + $0x3c] sm:$0xff]  }
  0xe6   : > { %v2347_v7 = vadd.f32 %v2303_v31, %v2204_v34  ;;  %v2545_v8 = vmul.f32 %v5564_v23, %v2522_v36  ;;  %v2546_v9 = vmul.f32 %v5564_v23, %v2523_v0  ;;  %v2446_v13 = vsel %vm661_vm1, %v2443_v62, %v2445_v3 }
  0xe7   : > { %v2444_v10 = vsel %vm661_vm1, %v2442_v2, %v2443_v62  ;;  %v2603_v14 = vmul.f32 %v5571_v30, %v2522_v36  ;;  %v2604_v17 = vmul.f32 %v5571_v30, %v2523_v0  ;;  %v2605_v22 = vmul.f32 %v5571_v30, %v2582_v4 }
  0xe8   : > { %v2489_v18 = vadd.f32 %v2444_v10, %v2346_v40  ;;  %v2490_v19 = vadd.f32 %v2446_v13, %v2347_v7  ;;  %v2725_v26 = vunpack.c.l.bf16 %v4117_v5  ;;  %v2747_v33 = vmul.f32 %v5579_v42, %v2523_v0 }
  0xe9   : > { %v2657_v27 = vrot.slane %v2603_v14, 1  ;;  %v2658_v28 = vrot.slane %v2604_v17, 1  ;;  %v2748_v1 = vmul.f32 %v5579_v42, %v2582_v4  ;;  %v2660_v41 = vrot.slane %v2605_v22, 1 }
  0xea   : > { %v2561_v37 = vadd.f32 %v2545_v8, %v2489_v18  ;;  %v2562_v39 = vadd.f32 %v2546_v9, %v2490_v19  ;;  %v2746_v44 = vmul.f32 %v5579_v42, %v2725_v26  ;;  %v2801_v29 = vrot.slane %v2747_v33, 2  ;;  %v3931_v9 = vld [vmem:[%s5087_s29 + $0x44] sm:$0x1]  ;;  %v3941_v18 = vld [vmem:[%s5087_s29 + $0x3c] sm:$0xe] }
  0xeb   : > { %v2659_v43 = vsel %vm516_vm0, %v2657_v27, %v2658_v28  ;;  %v2803_v46 = vrot.slane %v2748_v1, 2  ;;  %v420_v47 = vmul.f32 %v5505_v6, %v5406_v52  ;;  %v2661_v48 = vsel %vm516_vm0, %v2658_v28, %v2660_v41 }
  0xec   : > { %v2704_v49 = vadd.f32 %v2659_v43, %v2561_v37  ;;  %v2800_v50 = vrot.slane %v2746_v44, 2  ;;  %v421_v15 = vmul.f32 %v5505_v6, %v5409_v55  ;;  %v2705_v51 = vadd.f32 %v2661_v48, %v2562_v39  ;;  %v4526_v43 = vld [vmem:[%s5087_s29 + $0x48] sm:$0xff]   ;;  %v3969_v48 = vld [vmem:[%s5087_s29 + $0x50] sm:$0x1] }
  0xed   : > { %v2804_v53 = vsel %vm661_vm1, %v2801_v29, %v2803_v46  ;;  %v456_v54 = vunpack.c.l.bf16 %v448_v45  ;;  %v480_v34 = vmul.f32 %v5514_v11, %v5406_v52  ;;  %v481_v57 = vmul.f32 %v5514_v11, %v5409_v55 }
  0xee   : > { %v2802_v21 = vsel %vm661_vm1, %v2800_v50, %v2801_v29  ;;  %v601_v58 = vunpack.c.l.bf16 %v593_v16  ;;  %v626_v20 = vmul.f32 %v5523_v24, %v5409_v55  ;;  %v2848_v62 = vadd.f32 %v2804_v53, %v2705_v51 }
  0xef   : > { %v2847_v61 = vadd.f32 %v2802_v21, %v2704_v49  ;;  %v482_v63 = vmul.f32 %v5514_v11, %v456_v54  ;;  %v537_v32 = vrot.slane %v480_v34, 1  ;;  %v538_v36 = vrot.slane %v481_v57, 1 }
  0xf0   : > { %v625_v0 = vmul.f32 %v5523_v24, %v601_v58  ;;  %v627_v52 = vmul.f32 %v5523_v24, %v456_v54  ;;  %v683_v31 = vrot.slane %v626_v20, 2  ;;  %v2871_v3 = vadd.f32 %v5601_v12, %v2848_v62 }
  0xf1   : > { %v2870_v2 = vadd.f32 %v5601_v12, %v2847_v61  ;;  %v540_v4 = vrot.slane %v482_v63, 1  ;;  %v759_v55 = vunpack.c.l.bf16 %v3917_v59  ;;  %v539_v5 = vsel %vm516_vm0, %v537_v32, %v538_v36  ;;  %v3979_v61 = vld [vmem:[%s5087_s29 + $0x48] sm:$0xe] }
  0xf2   : > { %v682_v40 = vrot.slane %v625_v0, 2  ;;  %v685_v7 = vrot.slane %v627_v52, 2  ;;  %v760_v8 = vunpack.c.h.bf16 %v3917_v59  ;;  %v2887_v13 = vmax.f32 %v2871_v3, 0.0 }
  0xf3   : > { %v2886_v10 = vmax.f32 %v2870_v2, 0.0  ;;  %v541_v14 = vsel %vm516_vm0, %v538_v36, %v540_v4  ;;  %v581_v17 = vadd.f32 %v539_v5, %v420_v47  ;;  %v783_v27 = vmul.f32 %v5459_v38, %v759_v55 }
  0xf4   : > { %v582_v19 = vadd.f32 %v541_v14, %v421_v15  ;;  %v684_v22 = vsel %vm661_vm1, %v682_v40, %v683_v31  ;;  %v686_v26 = vsel %vm661_vm1, %v683_v31, %v685_v7  ;;  %v784_v1 = vmul.f32 %v5459_v38, %v760_v8 }
  0xf5   : > { %v2899_v28 = vpack.c.bf16 %v2887_v13, %v2886_v10  ;;  %v726_v33 = vadd.f32 %v684_v22, %v581_v17  ;;  %v819_v37 = vunpack.c.l.bf16 %v3931_v9  ;;  %v843_v41 = vmul.f32 %v5543_v56, %v759_v55 }
  0xf6   : > { %v727_v39 = vadd.f32 %v686_v26, %v582_v19  ;;  %v844_v44 = vmul.f32 %v5543_v56, %v760_v8  ;;  %v963_v45 = vunpack.c.l.bf16 %v3941_v18  ;;  %v988_v47 = vmul.f32 %v5472_v25, %v760_v8  ;;  %v4032_v18 = vld [vmem:[%s5087_s29 + $0x98] sm:$0x1] }
  0xf7   : > { %2907 = vst [vmem:[#allocation2 + $0x58] sm:$0xff] %v2899_v28  ;;  %4679 = vmatmul.mubr.bf16.gmra.mrb[4].mxu1 %v2899_v28  ;;  %v799_v29 = vadd.f32 %v783_v27, %v726_v33  ;;  %v845_v46 = vmul.f32 %v5543_v56, %v819_v37  ;;  %v989_v16 = vmul.f32 %v5472_v25, %v819_v37  ;;  %v899_v50 = vrot.slane %v843_v41, 1  ;;  %v4042_v28 = vld [vmem:[%s5087_s29 + $0x90] sm:$0xe] }
  0xf8   : > { %v800_v49 = vadd.f32 %v784_v1, %v727_v39  ;;  %v900_v15 = vrot.slane %v844_v44, 1  ;;  %v987_v51 = vmul.f32 %v5472_v25, %v963_v45  ;;  %v1044_v54 = vrot.slane %v988_v47, 2 }
  0xf9   : > { %v902_v53 = vrot.slane %v845_v46, 1  ;;  %v1046_v34 = vrot.slane %v989_v16, 2  ;;  %v5678_v21 = vunpack.c.l.bf16 %v4526_v43  ;;  %v5681_v20 = vunpack.c.h.bf16 %v4526_v43 }
  0xfa   : > { %v901_v57 = vsel %vm516_vm0, %v899_v50, %v900_v15  ;;  %v1043_v58 = vrot.slane %v987_v51, 2  ;;  %v1180_v59 = vunpack.c.l.bf16 %v3969_v48  ;;  %v1324_v5 = vunpack.c.l.bf16 %v3979_v61  ;;  %v4056_v51 = vld [vmem:[%s5087_s29 + $0x9c] sm:$0xff]  }
  0xfb   : > { %v903_v62 = vsel %vm516_vm0, %v900_v15, %v902_v53  ;;  %v943_v63 = vadd.f32 %v901_v57, %v799_v29  ;;  %v1047_v32 = vsel %vm661_vm1, %v1044_v54, %v1046_v34  ;;  %v1144_v36 = vmul.f32 %v5564_v23, %v5678_v21 }
  0xfc   : > { %v944_v0 = vadd.f32 %v903_v62, %v800_v49  ;;  %v1045_v52 = vsel %vm661_vm1, %v1043_v58, %v1044_v54  ;;  %v1145_v31 = vmul.f32 %v5564_v23, %v5681_v20  ;;  %v1204_v2 = vmul.f32 %v5571_v30, %v5678_v21 }
  0xfd   : > { %v1087_v3 = vadd.f32 %v1045_v52, %v943_v63  ;;  %v1205_v4 = vmul.f32 %v5571_v30, %v5681_v20  ;;  %v1206_v55 = vmul.f32 %v5571_v30, %v1180_v59  ;;  %v1349_v8 = vmul.f32 %v5579_v42, %v5681_v20 }
  0xfe   : > { %v1088_v40 = vadd.f32 %v1047_v32, %v944_v0  ;;  %v1260_v7 = vrot.slane %v1204_v2, 1  ;;  %v1350_v9 = vmul.f32 %v5579_v42, %v1180_v59  ;;  %v1348_v17 = vmul.f32 %v5579_v42, %v1324_v5 }
  0xff   : > { %v1160_v10 = vadd.f32 %v1144_v36, %v1087_v3  ;;  %v1261_v13 = vrot.slane %v1205_v4, 1  ;;  %v1263_v14 = vrot.slane %v1206_v55, 1  ;;  %v1405_v22 = vrot.slane %v1349_v8, 2 }
 0x100   : > { %v1161_v19 = vadd.f32 %v1145_v31, %v1088_v40  ;;  %v1407_v26 = vrot.slane %v1350_v9, 2  ;;  %v1831_v27 = vmul.f32 %v5505_v6, %v5476_v60  ;;  %v1404_v37 = vrot.slane %v1348_v17, 2  ;;  %v4080_v40 = vld [vmem:[%s5087_s29 + $0x9c] sm:$0xe] }
 0x101   : > { %v1262_v33 = vsel %vm516_vm0, %v1260_v7, %v1261_v13  ;;  %v1264_v1 = vsel %vm516_vm0, %v1261_v13, %v1263_v14  ;;  %v1832_v39 = vmul.f32 %v5505_v6, %v5479_v35  ;;  %v1867_v43 = vunpack.c.l.bf16 %v4032_v18 }
 0x102   : > { %v1304_v41 = vadd.f32 %v1262_v33, %v1160_v10  ;;  %v1305_v44 = vadd.f32 %v1264_v1, %v1161_v19  ;;  %v1408_v45 = vsel %vm661_vm1, %v1405_v22, %v1407_v26  ;;  %v1406_v29 = vsel %vm661_vm1, %v1404_v37, %v1405_v22  ;;  %v4545_v19 = vld [vmem:[%s5087_s29 + $0xa8] sm:$0xff]   ;;  %v4108_v33 = vld [vmem:[%s5087_s29 + $0xb0] sm:$0x1] }
 0x103   : > { %v1890_v46 = vmul.f32 %v5514_v11, %v5476_v60  ;;  %v1891_v47 = vmul.f32 %v5514_v11, %v5479_v35  ;;  %v2010_v16 = vunpack.c.l.bf16 %v4042_v28  ;;  %v1892_v50 = vmul.f32 %v5514_v11, %v1867_v43 }
 0x104   : > { %v1448_v48 = vadd.f32 %v1406_v29, %v1304_v41  ;;  %v1449_v49 = vadd.f32 %v1408_v45, %v1305_v44  ;;  %v2034_v15 = vmul.f32 %v5523_v24, %v5479_v35  ;;  %v2035_v57 = vmul.f32 %v5523_v24, %v1867_v43  ;;  %v4070_v35 = vld [vmem:[%s5087_s29 + $0xa4] sm:$0x1] }
 0x105   : > { %v1946_v53 = vrot.slane %v1890_v46, 1  ;;  %v1947_v54 = vrot.slane %v1891_v47, 1  ;;  %v2033_v34 = vmul.f32 %v5523_v24, %v2010_v16  ;;  %v1949_v59 = vrot.slane %v1892_v50, 1 }
 0x106   : > { %v1471_v60 = vadd.f32 %v5601_v12, %v1448_v48  ;;  %v1472_v58 = vadd.f32 %v5601_v12, %v1449_v49  ;;  %v2090_v61 = vrot.slane %v2034_v15, 2  ;;  %v2092_v32 = vrot.slane %v2035_v57, 2  ;;  %v4118_v49 = vld [vmem:[%s5087_s29 + $0xa8] sm:$0xe] }
 0x107   : > { %v1948_v62 = vsel %vm516_vm0, %v1946_v53, %v1947_v54  ;;  %v2089_v63 = vrot.slane %v2033_v34, 2  ;;  %v2166_v36 = vunpack.c.l.bf16 %v4056_v51  ;;  %v1950_v31 = vsel %vm516_vm0, %v1947_v54, %v1949_v59 }
 0x108   : > { %v1487_v0 = vmax.f32 %v1471_v60, 0.0  ;;  %v1488_v52 = vmax.f32 %v1472_v58, 0.0  ;;  %v1990_v2 = vadd.f32 %v1948_v62, %v1831_v27  ;;  %v1991_v3 = vadd.f32 %v1950_v31, %v1832_v39 }
 0x109   : > { %v2091_v4 = vsel %vm661_vm1, %v2089_v63, %v2090_v61  ;;  %v2093_v55 = vsel %vm661_vm1, %v2090_v61, %v2092_v32  ;;  %v2167_v5 = vunpack.c.h.bf16 %v4056_v51  ;;  %v2189_v9 = vmul.f32 %v5459_v38, %v2166_v36  ;;  %v383_v63 = vld [vmem:[%s5087_s29 + $0x3c] sm:$0xff]  }
 0x10a   : > { %v1499_v7 = vpack.c.bf16 %v1488_v52, %v1487_v0  ;;  %v2133_v8 = vadd.f32 %v2091_v4, %v1990_v2  ;;  %v2225_v10 = vunpack.c.l.bf16 %v4070_v35  ;;  %v2134_v13 = vadd.f32 %v2093_v55, %v1991_v3 }
 0x10b   : > { %v2190_v14 = vmul.f32 %v5459_v38, %v2167_v5  ;;  %v2248_v17 = vmul.f32 %v5543_v56, %v2166_v36  ;;  %v2249_v18 = vmul.f32 %v5543_v56, %v2167_v5  ;;  %v2368_v27 = vunpack.c.l.bf16 %v4080_v40 }
 0x10c   : > { %1507 = vst [vmem:[#allocation2 + $0x20] sm:$0xff] %v1499_v7  ;;  %4650 = vmatprep.mubr.bf16.mxu0 %v1499_v7  ;;  %v2205_v22 = vadd.f32 %v2189_v9, %v2133_v8  ;;  %v2250_v26 = vmul.f32 %v5543_v56, %v2225_v10  ;;  %v2392_v28 = vmul.f32 %v5472_v25, %v2167_v5  ;;  %v5738_v29 = vunpack.c.l.bf16 %v4545_v19  ;;  %v449_v7 = vld [vmem:[%s5087_s29 + $0x44] sm:$0x1] }
 0x10d   : > { %v2206_v1 = vadd.f32 %v2190_v14, %v2134_v13  ;;  %v2304_v37 = vrot.slane %v2248_v17, 1  ;;  %v2305_v39 = vrot.slane %v2249_v18, 1  ;;  %v2393_v41 = vmul.f32 %v5472_v25, %v2225_v10 }
 0x10e   : > { %v2307_v44 = vrot.slane %v2250_v26, 1  ;;  %v2391_v45 = vmul.f32 %v5472_v25, %v2368_v27  ;;  %v2448_v43 = vrot.slane %v2392_v28, 2  ;;  %v5741_v16 = vunpack.c.h.bf16 %v4545_v19 }
 0x10f   : > { %v2306_v46 = vsel %vm516_vm0, %v2304_v37, %v2305_v39  ;;  %v2450_v47 = vrot.slane %v2393_v41, 2  ;;  %v2583_v48 = vunpack.c.l.bf16 %v4108_v33  ;;  %v2547_v53 = vmul.f32 %v5564_v23, %v5738_v29 }
 0x110   : > { %v2308_v50 = vsel %vm516_vm0, %v2305_v39, %v2307_v44  ;;  %v2348_v15 = vadd.f32 %v2306_v46, %v2205_v22  ;;  %v2447_v51 = vrot.slane %v2391_v45, 2  ;;  %v2548_v57 = vmul.f32 %v5564_v23, %v5741_v16  ;;  %v594_v22 = vld [vmem:[%s5087_s29 + $0x3c] sm:$0xe] }
 0x111   : > { %v2349_v54 = vadd.f32 %v2308_v50, %v2206_v1  ;;  %v2451_v34 = vsel %vm661_vm1, %v2448_v43, %v2450_v47  ;;  %v2606_v60 = vmul.f32 %v5571_v30, %v5738_v29  ;;  %v2607_v59 = vmul.f32 %v5571_v30, %v5741_v16 }
 0x112   : > { %v2449_v58 = vsel %vm661_vm1, %v2447_v51, %v2448_v43  ;;  %v2608_v61 = vmul.f32 %v5571_v30, %v2583_v48  ;;  %v2726_v62 = vunpack.c.l.bf16 %v4118_v49  ;;  %v2750_v0 = vmul.f32 %v5579_v42, %v5741_v16 }
 0x113   : > { %v2491_v32 = vadd.f32 %v2449_v58, %v2348_v15  ;;  %v2492_v36 = vadd.f32 %v2451_v34, %v2349_v54  ;;  %v2662_v35 = vrot.slane %v2606_v60, 1  ;;  %v2663_v52 = vrot.slane %v2607_v59, 1  ;;  %v3932_v34 = vld [vmem:[%s5087_s29 + $0x50] sm:$0x1] }
 0x114   : > { %v2665_v31 = vrot.slane %v2608_v61, 1  ;;  %v2749_v2 = vmul.f32 %v5579_v42, %v2726_v62  ;;  %v2751_v3 = vmul.f32 %v5579_v42, %v2583_v48  ;;  %v2806_v5 = vrot.slane %v2750_v0, 2  ;;  %v3942_v61 = vld [vmem:[%s5087_s29 + $0x48] sm:$0xe] }
 0x115   : > { %v2563_v4 = vadd.f32 %v2547_v53, %v2491_v32  ;;  %v2564_v55 = vadd.f32 %v2548_v57, %v2492_v36  ;;  %v399_v40 = vunpack.c.l.bf16 %v383_v63  ;;  %v2664_v8 = vsel %vm516_vm0, %v2662_v35, %v2663_v52 }
 0x116   : > { %v2666_v9 = vsel %vm516_vm0, %v2663_v52, %v2665_v31  ;;  %v2805_v10 = vrot.slane %v2749_v2, 2  ;;  %v2808_v13 = vrot.slane %v2751_v3, 2  ;;  %v400_v18 = vunpack.c.h.bf16 %v383_v63 }
 0x117   : > { %v2706_v14 = vadd.f32 %v2664_v8, %v2563_v4  ;;  %v2707_v17 = vadd.f32 %v2666_v9, %v2564_v55  ;;  %v422_v19 = vmul.f32 %v5505_v6, %v399_v40  ;;  %v457_v28 = vunpack.c.l.bf16 %v449_v7  ;;  %v3957_v8 = vld [vmem:[%s5087_s29 + $0x54] sm:$0xff]  }
 0x118   : > { %v2807_v26 = vsel %vm661_vm1, %v2805_v10, %v2806_v5  ;;  %v2809_v27 = vsel %vm661_vm1, %v2806_v5, %v2808_v13  ;;  %v483_v33 = vmul.f32 %v5514_v11, %v399_v40  ;;  %v423_v39 = vmul.f32 %v5505_v6, %v400_v18 }
 0x119   : > { %v2849_v1 = vadd.f32 %v2807_v26, %v2706_v14  ;;  %v2850_v37 = vadd.f32 %v2809_v27, %v2707_v17  ;;  %v484_v41 = vmul.f32 %v5514_v11, %v400_v18  ;;  %v485_v44 = vmul.f32 %v5514_v11, %v457_v28  ;;  %v3970_v17 = vld [vmem:[%s5087_s29 + $0x5c] sm:$0x1] }
 0x11a   : > { %v542_v45 = vrot.slane %v483_v33, 1  ;;  %v602_v43 = vunpack.c.l.bf16 %v594_v22  ;;  %v629_v46 = vmul.f32 %v5523_v24, %v400_v18  ;;  %v630_v50 = vmul.f32 %v5523_v24, %v457_v28 }
 0x11b   : > { %v2872_v47 = vadd.f32 %v5601_v12, %v2849_v1  ;;  %v2873_v48 = vadd.f32 %v5601_v12, %v2850_v37  ;;  %v543_v49 = vrot.slane %v484_v41, 1  ;;  %v545_v15 = vrot.slane %v485_v44, 1 }
 0x11c   : > { %v628_v51 = vmul.f32 %v5523_v24, %v602_v43  ;;  %v688_v53 = vrot.slane %v629_v46, 2  ;;  %v785_v54 = vmul.f32 %v5459_v38, %v5678_v21  ;;  %v690_v59 = vrot.slane %v630_v50, 2 }
 0x11d   : > { %v2888_v57 = vmax.f32 %v2872_v47, 0.0  ;;  %v2889_v60 = vmax.f32 %v2873_v48, 0.0  ;;  %v544_v58 = vsel %vm516_vm0, %v542_v45, %v543_v49  ;;  %v546_v62 = vsel %vm516_vm0, %v543_v49, %v545_v15  ;;  %v3980_v45 = vld [vmem:[%s5087_s29 + $0x54] sm:$0xe] }
 0x11e   : > { %v583_v63 = vadd.f32 %v544_v58, %v422_v19  ;;  %v687_v32 = vrot.slane %v628_v51, 2  ;;  %v786_v36 = vmul.f32 %v5459_v38, %v5681_v20  ;;  %v584_v0 = vadd.f32 %v546_v62, %v423_v39  ;;  %v4033_v62 = vld [vmem:[%s5087_s29 + $0xa4] sm:$0x1] }
 0x11f   : > { %v2900_v35 = vpack.c.bf16 %v2889_v60, %v2888_v57  ;;  %v691_v52 = vsel %vm661_vm1, %v688_v53, %v690_v59  ;;  %v820_v31 = vunpack.c.l.bf16 %v3932_v34  ;;  %v846_v3 = vmul.f32 %v5543_v56, %v5678_v21  ;;  %v4021_v57 = vld [vmem:[%s5087_s29 + $0x9c] sm:$0xff]  }
 0x120   : > { %v689_v2 = vsel %vm661_vm1, %v687_v32, %v688_v53  ;;  %v847_v4 = vmul.f32 %v5543_v56, %v5681_v20  ;;  %v964_v55 = vunpack.c.l.bf16 %v3942_v61  ;;  %v729_v40 = vadd.f32 %v691_v52, %v584_v0 }
 0x121   : > { %2908 = vst [vmem:[#allocation2 + $0x60] sm:$0xff] %v2900_v35  ;;  %4682 = vmatprep.mubr.bf16.mxu1 %v2900_v35  ;;  %v728_v5 = vadd.f32 %v689_v2, %v583_v63  ;;  %v848_v38 = vmul.f32 %v5543_v56, %v820_v31  ;;  %v991_v7 = vmul.f32 %v5472_v25, %v5681_v20  ;;  %v904_v9 = vrot.slane %v846_v3, 1 }
 0x122   : > { %v905_v10 = vrot.slane %v847_v4, 1  ;;  %v990_v13 = vmul.f32 %v5472_v25, %v964_v55  ;;  %v992_v14 = vmul.f32 %v5472_v25, %v820_v31  ;;  %v802_v19 = vadd.f32 %v786_v36, %v729_v40  ;;  %v4043_v40 = vld [vmem:[%s5087_s29 + $0x9c] sm:$0xe] }
 0x123   : > { %v801_v18 = vadd.f32 %v785_v54, %v728_v5  ;;  %v907_v22 = vrot.slane %v848_v38, 1  ;;  %v1049_v26 = vrot.slane %v991_v7, 2  ;;  %v1122_v1 = vunpack.c.l.bf16 %v3957_v8 }
 0x124   : > { %v906_v27 = vsel %vm516_vm0, %v904_v9, %v905_v10  ;;  %v1048_v28 = vrot.slane %v990_v13, 2  ;;  %v1051_v33 = vrot.slane %v992_v14, 2  ;;  %v1123_v41 = vunpack.c.h.bf16 %v3957_v8 }
 0x125   : > { %v908_v37 = vsel %vm516_vm0, %v905_v10, %v907_v22  ;;  %v945_v39 = vadd.f32 %v906_v27, %v801_v18  ;;  %v1181_v44 = vunpack.c.l.bf16 %v3970_v17  ;;  %v1146_v47 = vmul.f32 %v5564_v23, %v1122_v1 }
 0x126   : > { %v946_v43 = vadd.f32 %v908_v37, %v802_v19  ;;  %v1050_v25 = vsel %vm661_vm1, %v1048_v28, %v1049_v26  ;;  %v1052_v46 = vsel %vm661_vm1, %v1049_v26, %v1051_v33  ;;  %v1147_v49 = vmul.f32 %v5564_v23, %v1123_v41 }
 0x127   : > { %v1089_v48 = vadd.f32 %v1050_v25, %v945_v39  ;;  %v1207_v50 = vmul.f32 %v5571_v30, %v1122_v1  ;;  %v1208_v15 = vmul.f32 %v5571_v30, %v1123_v41  ;;  %v1209_v53 = vmul.f32 %v5571_v30, %v1181_v44  ;;  %v5834_v25 = vld [vmem:[%s6376_s1 + $0x3] ss:$0 sm:$0xff] }
 0x128   : > { %v1090_v51 = vadd.f32 %v1052_v46, %v946_v43  ;;  %v1325_v54 = vunpack.c.l.bf16 %v3980_v45  ;;  %v1352_v34 = vmul.f32 %v5579_v42, %v1123_v41  ;;  %v1353_v61 = vmul.f32 %v5579_v42, %v1181_v44  ;;  %v4071_v44 = vld [vmem:[%s5087_s29 + $0xb0] sm:$0x1] }
 0x129   : > { %v1162_v60 = vadd.f32 %v1146_v47, %v1089_v48  ;;  %v1265_v58 = vrot.slane %v1207_v50, 1  ;;  %v1266_v59 = vrot.slane %v1208_v15, 1  ;;  %v1268_v32 = vrot.slane %v1209_v53, 1  ;;  %v4081_v50 = vld [vmem:[%s5087_s29 + $0xa8] sm:$0xe] }
 0x12a   : > { %v1163_v63 = vadd.f32 %v1147_v49, %v1090_v51  ;;  %v1351_v36 = vmul.f32 %v5579_v42, %v1325_v54  ;;  %v1410_v35 = vrot.slane %v1352_v34, 2  ;;  %v1412_v52 = vrot.slane %v1353_v61, 2 }
 0x12b   : > { %v1267_v0 = vsel %vm516_vm0, %v1265_v58, %v1266_v59  ;;  %v1810_v31 = vunpack.c.l.bf16 %v4021_v57  ;;  %v1811_v2 = vunpack.c.h.bf16 %v4021_v57  ;;  %v1269_v3 = vsel %vm516_vm0, %v1266_v59, %v1268_v32 }
 0x12c   : > { %v1306_v4 = vadd.f32 %v1267_v0, %v1162_v60  ;;  %v1409_v55 = vrot.slane %v1351_v36, 2  ;;  %v1868_v5 = vunpack.c.l.bf16 %v4033_v62  ;;  %v1307_v38 = vadd.f32 %v1269_v3, %v1163_v63  ;;  %v5851_v63 = vld [vmem:[%s6376_s1 + $0x5] ss:$0 sm:$0xff]  ;;  %v4096_v36 = vld [vmem:[%s5087_s29 + $0xb4] sm:$0xff]  }
 0x12d   : > { %v1413_v7 = vsel %vm661_vm1, %v1410_v35, %v1412_v52  ;;  %v1833_v8 = vmul.f32 %v5505_v6, %v1810_v31  ;;  %v1834_v9 = vmul.f32 %v5505_v6, %v1811_v2  ;;  %v1893_v13 = vmul.f32 %v5514_v11, %v1810_v31 }
 0x12e   : > { %v1411_v10 = vsel %vm661_vm1, %v1409_v55, %v1410_v35  ;;  %v1894_v14 = vmul.f32 %v5514_v11, %v1811_v2  ;;  %v1895_v17 = vmul.f32 %v5514_v11, %v1868_v5  ;;  %v1451_v19 = vadd.f32 %v1413_v7, %v1307_v38 }
 0x12f   : > { %v1450_v18 = vadd.f32 %v1411_v10, %v1306_v4  ;;  %v2011_v22 = vunpack.c.l.bf16 %v4043_v40  ;;  %v2037_v26 = vmul.f32 %v5523_v24, %v1811_v2  ;;  %v1951_v27 = vrot.slane %v1893_v13, 1  ;;  %v4109_v2 = vld [vmem:[%s5087_s29 + $0xbc] sm:$0x1] }
 0x130   : > { %v1952_v28 = vrot.slane %v1894_v14, 1  ;;  %v1954_v33 = vrot.slane %v1895_v17, 1  ;;  %v2038_v6 = vmul.f32 %v5523_v24, %v1868_v5  ;;  %v1474_v37 = vadd.f32 %v5601_v12, %v1451_v19  ;;  %v4119_v14 = vld [vmem:[%s5087_s29 + $0xb4] sm:$0xe] }
 0x131   : > { %v1473_v1 = vadd.f32 %v5601_v12, %v1450_v18  ;;  %v2036_v39 = vmul.f32 %v5523_v24, %v2011_v22  ;;  %v2095_v41 = vrot.slane %v2037_v26, 2  ;;  %v2191_v46 = vmul.f32 %v5834_v25, %v5738_v29 }
 0x132   : > { %v1953_v11 = vsel %vm516_vm0, %v1951_v27, %v1952_v28  ;;  %v1955_v45 = vsel %vm516_vm0, %v1952_v28, %v1954_v33  ;;  %v2097_v43 = vrot.slane %v2038_v6, 2  ;;  %v1490_v48 = vmax.f32 %v1474_v37, 0.0 }
 0x133   : > { %v1489_v47 = vmax.f32 %v1473_v1, 0.0  ;;  %v1992_v49 = vadd.f32 %v1953_v11, %v1833_v8  ;;  %v1993_v24 = vadd.f32 %v1955_v45, %v1834_v9  ;;  %v2094_v15 = vrot.slane %v2036_v39, 2 }
 0x134   : > { %v2098_v51 = vsel %vm661_vm1, %v2095_v41, %v2097_v43  ;;  %v2192_v53 = vmul.f32 %v5834_v25, %v5741_v16  ;;  %v2226_v54 = vunpack.c.l.bf16 %v4071_v44  ;;  %v2251_v60 = vmul.f32 %v5543_v56, %v5738_v29 }
 0x135   : > { %v1500_v34 = vpack.c.bf16 %v1490_v48, %v1489_v47  ;;  %v2136_v57 = vadd.f32 %v2098_v51, %v1993_v24  ;;  %v2252_v58 = vmul.f32 %v5543_v56, %v5741_v16  ;;  %v2096_v59 = vsel %vm661_vm1, %v2094_v15, %v2095_v41  ;;  %v450_v48 = vld [vmem:[%s5087_s29 + $0x50] sm:$0x1]  ;;  %v595_v51 = vld [vmem:[%s5087_s29 + $0x48] sm:$0xe] }
 0x136   : > { %v2253_v61 = vmul.f32 %v5543_v56, %v2226_v54  ;;  %v2369_v62 = vunpack.c.l.bf16 %v4081_v50  ;;  %v2395_v32 = vmul.f32 %v5851_v63, %v5741_v16  ;;  %v2135_v35 = vadd.f32 %v2096_v59, %v1992_v49  ;;  %v5889_v59 = vld [vmem:[%s6376_s1 + $0x1] ss:$0 sm:$0xff] }
 0x137   : > { %1508 = vst [vmem:[#allocation2 + $0x28] sm:$0xff] %v1500_v34  ;;  %4651 = vmatmul.mubr.bf16.gmra.mrb[8].mxu0 %v1500_v34  ;;  %v2208_v0 = vadd.f32 %v2192_v53, %v2136_v57  ;;  %v2309_v52 = vrot.slane %v2251_v60, 1  ;;  %v2310_v31 = vrot.slane %v2252_v58, 1  ;;  %v2396_v4 = vmul.f32 %v5851_v63, %v2226_v54 }
 0x138   : > { %v2312_v3 = vrot.slane %v2253_v61, 1  ;;  %v2394_v56 = vmul.f32 %v5851_v63, %v2369_v62  ;;  %v2453_v55 = vrot.slane %v2395_v32, 2  ;;  %v2207_v5 = vadd.f32 %v2191_v46, %v2135_v35  ;;  %v5899_v35 = vld [vmem:[%s6376_s1 + $0x2] ss:$0 sm:$0xff] }
 0x139   : > { %v2311_v40 = vsel %vm516_vm0, %v2309_v52, %v2310_v31  ;;  %v2526_v38 = vunpack.c.l.bf16 %v4096_v36  ;;  %v2527_v7 = vunpack.c.h.bf16 %v4096_v36  ;;  %v2455_v10 = vrot.slane %v2396_v4, 2  ;;  %v3921_v52 = vld [vmem:[%s5087_s29 + $0x54] sm:$0xff]  }
 0x13a   : > { %v2313_v8 = vsel %vm516_vm0, %v2310_v31, %v2312_v3  ;;  %v2452_v9 = vrot.slane %v2394_v56, 2  ;;  %v2584_v13 = vunpack.c.l.bf16 %v4109_v2  ;;  %v2350_v17 = vadd.f32 %v2311_v40, %v2207_v5 }
 0x13b   : > { %v2351_v18 = vadd.f32 %v2313_v8, %v2208_v0  ;;  %v2549_v19 = vmul.f32 %v5564_v23, %v2526_v38  ;;  %v2550_v22 = vmul.f32 %v5564_v23, %v2527_v7  ;;  %v2456_v27 = vsel %vm661_vm1, %v2453_v55, %v2455_v10 }
 0x13c   : > { %v2454_v26 = vsel %vm661_vm1, %v2452_v9, %v2453_v55  ;;  %v2609_v28 = vmul.f32 %v5571_v30, %v2526_v38  ;;  %v2610_v33 = vmul.f32 %v5571_v30, %v2527_v7  ;;  %v2611_v37 = vmul.f32 %v5571_v30, %v2584_v13  ;;  %v5877_v30 = vld [vmem:[%s6376_s1] ss:$0 sm:$0xff] }
 0x13d   : > { %v2493_v6 = vadd.f32 %v2454_v26, %v2350_v17  ;;  %v2494_v1 = vadd.f32 %v2456_v27, %v2351_v18  ;;  %v2727_v39 = vunpack.c.l.bf16 %v4119_v14  ;;  %v2753_v11 = vmul.f32 %v5579_v42, %v2527_v7  ;;  %v3933_v14 = vld [vmem:[%s5087_s29 + $0x5c] sm:$0x1]  ;;  %v3943_v26 = vld [vmem:[%s5087_s29 + $0x54] sm:$0xe] }
 0x13e   : > { %v2667_v41 = vrot.slane %v2609_v28, 1  ;;  %v2668_v44 = vrot.slane %v2610_v33, 1  ;;  %v2754_v23 = vmul.f32 %v5579_v42, %v2584_v13  ;;  %v2670_v46 = vrot.slane %v2611_v37, 1 }
 0x13f   : > { %v2565_v45 = vadd.f32 %v2549_v19, %v2493_v6  ;;  %v2566_v43 = vadd.f32 %v2550_v22, %v2494_v1  ;;  %v2752_v47 = vmul.f32 %v5579_v42, %v2727_v39  ;;  %v2811_v24 = vrot.slane %v2753_v11, 2 }
 0x140   : > { %v2669_v49 = vsel %vm516_vm0, %v2667_v41, %v2668_v44  ;;  %v2813_v50 = vrot.slane %v2754_v23, 2  ;;  %v424_v15 = vmul.f32 %v5877_v30, %v5678_v21  ;;  %v2671_v53 = vsel %vm516_vm0, %v2668_v44, %v2670_v46  ;;  %v5920_v44 = vld [vmem:[%s6376_s1 + $0x4] ss:$0 sm:$0xff] }
 0x141   : > { %v2708_v54 = vadd.f32 %v2669_v49, %v2565_v45  ;;  %v2810_v34 = vrot.slane %v2752_v47, 2  ;;  %v425_v42 = vmul.f32 %v5877_v30, %v5681_v20  ;;  %v2709_v57 = vadd.f32 %v2671_v53, %v2566_v43  ;;  %v4527_v43 = vld [vmem:[%s5087_s29 + $0x60] sm:$0xff]  }
 0x142   : > { %v2814_v60 = vsel %vm661_vm1, %v2811_v24, %v2813_v50  ;;  %v458_v58 = vunpack.c.l.bf16 %v450_v48  ;;  %v486_v61 = vmul.f32 %v5889_v59, %v5678_v21  ;;  %v487_v32 = vmul.f32 %v5889_v59, %v5681_v20 }
 0x143   : > { %v2812_v62 = vsel %vm661_vm1, %v2810_v34, %v2811_v24  ;;  %v603_v36 = vunpack.c.l.bf16 %v595_v51  ;;  %v632_v0 = vmul.f32 %v5899_v35, %v5681_v20  ;;  %v2852_v2 = vadd.f32 %v2814_v60, %v2709_v57  ;;  %v3971_v24 = vld [vmem:[%s5087_s29 + $0x68] sm:$0x1] }
 0x144   : > { %v2851_v31 = vadd.f32 %v2812_v62, %v2708_v54  ;;  %v488_v21 = vmul.f32 %v5889_v59, %v458_v58  ;;  %v547_v3 = vrot.slane %v486_v61, 1  ;;  %v548_v56 = vrot.slane %v487_v32, 1  ;;  %v3981_v32 = vld [vmem:[%s5087_s29 + $0x60] sm:$0xe] }
 0x145   : > { %v631_v4 = vmul.f32 %v5899_v35, %v603_v36  ;;  %v633_v55 = vmul.f32 %v5899_v35, %v458_v58  ;;  %v693_v5 = vrot.slane %v632_v0, 2  ;;  %v2875_v38 = vadd.f32 %v5601_v12, %v2852_v2 }
 0x146   : > { %v2874_v40 = vadd.f32 %v5601_v12, %v2851_v31  ;;  %v550_v7 = vrot.slane %v488_v21, 1  ;;  %v763_v20 = vunpack.c.l.bf16 %v3921_v52  ;;  %v549_v8 = vsel %vm516_vm0, %v547_v3, %v548_v56  ;;  %v5941_v31 = vld [vmem:[%s6376_s1 + $0x6] ss:$0 sm:$0xff] }
 0x147   : > { %v692_v9 = vrot.slane %v631_v4, 2  ;;  %v695_v10 = vrot.slane %v633_v55, 2  ;;  %v764_v13 = vunpack.c.h.bf16 %v3921_v52  ;;  %v2891_v18 = vmax.f32 %v2875_v38, 0.0  ;;  %v5951_v4 = vld [vmem:[%s6376_s1 + $0x7] ss:$0 sm:$0xff] }
 0x148   : > { %v2890_v17 = vmax.f32 %v2874_v40, 0.0  ;;  %v551_v19 = vsel %vm516_vm0, %v548_v56, %v550_v7  ;;  %v585_v22 = vadd.f32 %v549_v8, %v424_v15  ;;  %v787_v33 = vmul.f32 %v5834_v25, %v763_v20 }
 0x149   : > { %v586_v27 = vadd.f32 %v551_v19, %v425_v42  ;;  %v694_v28 = vsel %vm661_vm1, %v692_v9, %v693_v5  ;;  %v696_v12 = vsel %vm661_vm1, %v693_v5, %v695_v10  ;;  %v788_v37 = vmul.f32 %v5834_v25, %v764_v13  ;;  %v5961_v9 = vld [vmem:[%s6376_s1 + $0x8] ss:$0 sm:$0xff] }
 0x14a   : > { %v2901_v6 = vpack.c.bf16 %v2891_v18, %v2890_v17  ;;  %v730_v1 = vadd.f32 %v694_v28, %v585_v22  ;;  %v821_v39 = vunpack.c.l.bf16 %v3933_v14  ;;  %v849_v11 = vmul.f32 %v5920_v44, %v763_v20  ;;  %v4034_v22 = vld [vmem:[%s5087_s29 + $0xb0] sm:$0x1] }
 0x14b   : > { %v731_v41 = vadd.f32 %v696_v12, %v586_v27  ;;  %v850_v23 = vmul.f32 %v5920_v44, %v764_v13  ;;  %v965_v45 = vunpack.c.l.bf16 %v3943_v26  ;;  %v994_v48 = vmul.f32 %v5851_v63, %v764_v13 }
 0x14c   : > { %2909 = vst [vmem:[#allocation2 + $0x68] sm:$0xff] %v2901_v6  ;;  %4683 = vmatmul.mubr.bf16.gmra.mrb[8].mxu1 %v2901_v6  ;;  %v803_v46 = vadd.f32 %v787_v33, %v730_v1  ;;  %v851_v47 = vmul.f32 %v5920_v44, %v821_v39  ;;  %v995_v49 = vmul.f32 %v5851_v63, %v821_v39  ;;  %v909_v15 = vrot.slane %v849_v11, 1  ;;  %v4044_v33 = vld [vmem:[%s5087_s29 + $0xa8] sm:$0xe] }
 0x14d   : > { %v804_v50 = vadd.f32 %v788_v37, %v731_v41  ;;  %v910_v51 = vrot.slane %v850_v23, 1  ;;  %v993_v53 = vmul.f32 %v5851_v63, %v965_v45  ;;  %v1054_v34 = vrot.slane %v994_v48, 2 }
 0x14e   : > { %v912_v54 = vrot.slane %v851_v47, 1  ;;  %v1056_v42 = vrot.slane %v995_v49, 2  ;;  %v5930_v57 = vunpack.c.l.bf16 %v4527_v43  ;;  %v5933_v61 = vunpack.c.h.bf16 %v4527_v43 }
 0x14f   : > { %v911_v60 = vsel %vm516_vm0, %v909_v15, %v910_v51  ;;  %v1053_v58 = vrot.slane %v993_v53, 2  ;;  %v1182_v62 = vunpack.c.l.bf16 %v3971_v24  ;;  %v1326_v7 = vunpack.c.l.bf16 %v3981_v32 }
 0x150   : > { %v913_v36 = vsel %vm516_vm0, %v910_v51, %v912_v54  ;;  %v947_v0 = vadd.f32 %v911_v60, %v803_v46  ;;  %v1057_v52 = vsel %vm661_vm1, %v1054_v34, %v1056_v42  ;;  %v1148_v2 = vmul.f32 %v5941_v31, %v5930_v57  ;;  %v4060_v51 = vld [vmem:[%s5087_s29 + $0xb4] sm:$0xff]  }
 0x151   : > { %v948_v21 = vadd.f32 %v913_v36, %v804_v50  ;;  %v1055_v3 = vsel %vm661_vm1, %v1053_v58, %v1054_v34  ;;  %v1149_v56 = vmul.f32 %v5941_v31, %v5933_v61  ;;  %v1210_v55 = vmul.f32 %v5951_v4, %v5930_v57 }
 0x152   : > { %v1091_v5 = vadd.f32 %v1055_v3, %v947_v0  ;;  %v1211_v40 = vmul.f32 %v5951_v4, %v5933_v61  ;;  %v1212_v38 = vmul.f32 %v5951_v4, %v1182_v62  ;;  %v1355_v10 = vmul.f32 %v5961_v9, %v5933_v61 }
 0x153   : > { %v1092_v20 = vadd.f32 %v1057_v52, %v948_v21  ;;  %v1270_v8 = vrot.slane %v1210_v55, 1  ;;  %v1356_v13 = vmul.f32 %v5961_v9, %v1182_v62  ;;  %v1354_v19 = vmul.f32 %v5961_v9, %v1326_v7 }
 0x154   : > { %v1164_v14 = vadd.f32 %v1148_v2, %v1091_v5  ;;  %v1271_v17 = vrot.slane %v1211_v40, 1  ;;  %v1273_v18 = vrot.slane %v1212_v38, 1  ;;  %v1415_v27 = vrot.slane %v1355_v10, 2  ;;  %v4072_v2 = vld [vmem:[%s5087_s29 + $0xbc] sm:$0x1] }
 0x155   : > { %v1165_v26 = vadd.f32 %v1149_v56, %v1092_v20  ;;  %v1417_v28 = vrot.slane %v1356_v13, 2  ;;  %v1835_v12 = vmul.f32 %v5877_v30, %v5738_v29  ;;  %v1414_v37 = vrot.slane %v1354_v19, 2  ;;  %v4082_v20 = vld [vmem:[%s5087_s29 + $0xb4] sm:$0xe] }
 0x156   : > { %v1272_v6 = vsel %vm516_vm0, %v1270_v8, %v1271_v17  ;;  %v1274_v1 = vsel %vm516_vm0, %v1271_v17, %v1273_v18  ;;  %v1836_v39 = vmul.f32 %v5877_v30, %v5741_v16  ;;  %v1869_v45 = vunpack.c.l.bf16 %v4034_v22 }
 0x157   : > { %v1308_v41 = vadd.f32 %v1272_v6, %v1164_v14  ;;  %v1309_v11 = vadd.f32 %v1274_v1, %v1165_v26  ;;  %v1418_v23 = vsel %vm661_vm1, %v1415_v27, %v1417_v28  ;;  %v1416_v43 = vsel %vm661_vm1, %v1414_v37, %v1415_v27  ;;  %v4546_v26 = vld [vmem:[%s5087_s29 + $0xc0] sm:$0xff]   ;;  %v4110_v1 = vld [vmem:[%s5087_s29 + $0xc8] sm:$0x1] }
 0x158   : > { %v1896_v46 = vmul.f32 %v5889_v59, %v5738_v29  ;;  %v1897_v47 = vmul.f32 %v5889_v59, %v5741_v16  ;;  %v2012_v48 = vunpack.c.l.bf16 %v4044_v33  ;;  %v1898_v50 = vmul.f32 %v5889_v59, %v1869_v45  ;;  %v5990_v29 = vld [vmem:[%s6377_s2] ss:$0 sm:$0xff] }
 0x159   : > { %v1452_v49 = vadd.f32 %v1416_v43, %v1308_v41  ;;  %v1453_v24 = vadd.f32 %v1418_v23, %v1309_v11  ;;  %v2040_v15 = vmul.f32 %v5899_v35, %v5741_v16  ;;  %v2041_v42 = vmul.f32 %v5899_v35, %v1869_v45 }
 0x15a   : > { %v1956_v53 = vrot.slane %v1896_v46, 1  ;;  %v1957_v54 = vrot.slane %v1897_v47, 1  ;;  %v2039_v34 = vmul.f32 %v5899_v35, %v2012_v48  ;;  %v1959_v62 = vrot.slane %v1898_v50, 1 }
 0x15b   : > { %v1475_v60 = vadd.f32 %v5990_v29, %v1452_v49  ;;  %v1476_v58 = vadd.f32 %v5990_v29, %v1453_v24  ;;  %v2100_v32 = vrot.slane %v2040_v15, 2  ;;  %v2102_v0 = vrot.slane %v2041_v42, 2 }
 0x15c   : > { %v1958_v16 = vsel %vm516_vm0, %v1956_v53, %v1957_v54  ;;  %v2099_v36 = vrot.slane %v2039_v34, 2  ;;  %v2170_v52 = vunpack.c.l.bf16 %v4060_v51  ;;  %v1960_v56 = vsel %vm516_vm0, %v1957_v54, %v1959_v62  ;;  %v4120_v53 = vld [vmem:[%s5087_s29 + $0xc0] sm:$0xe] }
 0x15d   : > { %v1491_v21 = vmax.f32 %v1475_v60, 0.0  ;;  %v1492_v3 = vmax.f32 %v1476_v58, 0.0  ;;  %v1994_v55 = vadd.f32 %v1958_v16, %v1835_v12  ;;  %v1995_v5 = vadd.f32 %v1960_v56, %v1836_v39 }
 0x15e   : > { %v2101_v40 = vsel %vm661_vm1, %v2099_v36, %v2100_v32  ;;  %v2103_v38 = vsel %vm661_vm1, %v2100_v32, %v2102_v0  ;;  %v2171_v7 = vunpack.c.h.bf16 %v4060_v51  ;;  %v2193_v13 = vmul.f32 %v5834_v25, %v2170_v52 }
 0x15f   : > { %v1501_v8 = vpack.c.bf16 %v1492_v3, %v1491_v21  ;;  %v2137_v10 = vadd.f32 %v2101_v40, %v1994_v55  ;;  %v2227_v14 = vunpack.c.l.bf16 %v4072_v2  ;;  %v2138_v17 = vadd.f32 %v2103_v38, %v1995_v5  ;;  %v6005_v27 = vpop.f32.mrb[0].mxu0  ;;  %v387_v21 = vld [vmem:[%s5087_s29 + $0x54] sm:$0xff]  }
 0x160   : > { %v2194_v18 = vmul.f32 %v5834_v25, %v2171_v7  ;;  %v2254_v19 = vmul.f32 %v5920_v44, %v2170_v52  ;;  %v2255_v22 = vmul.f32 %v5920_v44, %v2171_v7  ;;  %v2370_v33 = vunpack.c.l.bf16 %v4082_v20  ;;  %v6010_v37 = vpop.f32.mrb[1].mxu0 }
 0x161   : > { %1509 = vst [vmem:[#allocation2 + $0x30] sm:$0xff] %v1501_v8  ;;  %4654 = vmatprep.mubr.bf16.mxu0 %v1501_v8  ;;  %v2209_v28 = vadd.f32 %v2193_v13, %v2137_v10  ;;  %v2256_v12 = vmul.f32 %v5920_v44, %v2227_v14  ;;  %v2398_v6 = vmul.f32 %v5851_v63, %v2171_v7  ;;  %v6013_v45 = vpop.f32.mrb[2].mxu0  ;;  %v6016_v48 = vunpack.c.l.bf16 %v4546_v26 }
 0x162   : > { %v2210_v39 = vadd.f32 %v2194_v18, %v2138_v17  ;;  %v2314_v41 = vrot.slane %v2254_v19, 1  ;;  %v2315_v11 = vrot.slane %v2255_v22, 1  ;;  %v2399_v23 = vmul.f32 %v5851_v63, %v2227_v14  ;;  %v6018_v49 = vpop.f32.mrb[3].mxu0  ;;  %v451_v17 = vld [vmem:[%s5087_s29 + $0x5c] sm:$0x1] }
 0x163   : > { %v2317_v43 = vrot.slane %v2256_v12, 1  ;;  %v2397_v46 = vmul.f32 %v5851_v63, %v2370_v33  ;;  %v2458_v47 = vrot.slane %v2398_v6, 2  ;;  %v6021_v15 = vunpack.c.h.bf16 %v4546_v26 }
 0x164   : > { %v2316_v24 = vsel %vm516_vm0, %v2314_v41, %v2315_v11  ;;  %v2460_v50 = vrot.slane %v2399_v23, 2  ;;  %v2585_v51 = vunpack.c.l.bf16 %v4110_v1  ;;  %v2551_v60 = vmul.f32 %v5941_v31, %v6016_v48  ;;  %v596_v1 = vld [vmem:[%s5087_s29 + $0x54] sm:$0xe] }
 0x165   : > { %v2318_v54 = vsel %vm516_vm0, %v2315_v11, %v2317_v43  ;;  %v2352_v34 = vadd.f32 %v2316_v24, %v2209_v28  ;;  %v2457_v42 = vrot.slane %v2397_v46, 2  ;;  %v2552_v32 = vmul.f32 %v5941_v31, %v6021_v15 }
 0x166   : > { %v2353_v58 = vadd.f32 %v2318_v54, %v2210_v39  ;;  %v2461_v62 = vsel %vm661_vm1, %v2458_v47, %v2460_v50  ;;  %v2612_v16 = vmul.f32 %v5951_v4, %v6016_v48  ;;  %v2613_v0 = vmul.f32 %v5951_v4, %v6021_v15 }
 0x167   : > { %v2459_v36 = vsel %vm661_vm1, %v2457_v42, %v2458_v47  ;;  %v2614_v52 = vmul.f32 %v5951_v4, %v2585_v51  ;;  %v2728_v2 = vunpack.c.l.bf16 %v4120_v53  ;;  %v2756_v5 = vmul.f32 %v5961_v9, %v6021_v15 }
 0x168   : > { %v2495_v3 = vadd.f32 %v2459_v36, %v2352_v34  ;;  %v2496_v56 = vadd.f32 %v2461_v62, %v2353_v58  ;;  %v2672_v55 = vrot.slane %v2612_v16, 1  ;;  %v2673_v40 = vrot.slane %v2613_v0, 1  ;;  %v3934_v0 = vld [vmem:[%s5087_s29 + $0x68] sm:$0x1] }
 0x169   : > { %v2675_v38 = vrot.slane %v2614_v52, 1  ;;  %v2755_v7 = vmul.f32 %v5961_v9, %v2728_v2  ;;  %v2757_v20 = vmul.f32 %v5961_v9, %v2585_v51  ;;  %v2816_v13 = vrot.slane %v2756_v5, 2 }
 0x16a   : > { %v2567_v8 = vadd.f32 %v2551_v60, %v2495_v3  ;;  %v2568_v10 = vadd.f32 %v2552_v32, %v2496_v56  ;;  %v403_v14 = vunpack.c.l.bf16 %v387_v21  ;;  %v2674_v18 = vsel %vm516_vm0, %v2672_v55, %v2673_v40  ;;  %v3944_v56 = vld [vmem:[%s5087_s29 + $0x60] sm:$0xe] }
 0x16b   : > { %v2676_v19 = vsel %vm516_vm0, %v2673_v40, %v2675_v38  ;;  %v2815_v22 = vrot.slane %v2755_v7, 2  ;;  %v2818_v26 = vrot.slane %v2757_v20, 2  ;;  %v404_v33 = vunpack.c.h.bf16 %v387_v21 }
 0x16c   : > { %v2710_v28 = vadd.f32 %v2674_v18, %v2567_v8  ;;  %v2711_v12 = vadd.f32 %v2676_v19, %v2568_v10  ;;  %v426_v6 = vmul.f32 %v5877_v30, %v403_v14  ;;  %v459_v11 = vunpack.c.l.bf16 %v451_v17 }
 0x16d   : > { %v2817_v39 = vsel %vm661_vm1, %v2815_v22, %v2816_v13  ;;  %v2819_v41 = vsel %vm661_vm1, %v2816_v13, %v2818_v26  ;;  %v489_v23 = vmul.f32 %v5889_v59, %v403_v14  ;;  %v427_v47 = vmul.f32 %v5877_v30, %v404_v33 }
 0x16e   : > { %v2853_v43 = vadd.f32 %v2817_v39, %v2710_v28  ;;  %v2854_v46 = vadd.f32 %v2819_v41, %v2711_v12  ;;  %v490_v24 = vmul.f32 %v5889_v59, %v404_v33  ;;  %v491_v50 = vmul.f32 %v5889_v59, %v459_v11 }
 0x16f   : > { %v552_v51 = vrot.slane %v489_v23, 1  ;;  %v604_v53 = vunpack.c.l.bf16 %v596_v1  ;;  %v635_v54 = vmul.f32 %v5899_v35, %v404_v33  ;;  %v636_v58 = vmul.f32 %v5899_v35, %v459_v11  ;;  %v3961_v33 = vld [vmem:[%s5087_s29 + $0x6c] sm:$0xff]   ;;  %v3972_v11 = vld [vmem:[%s5087_s29 + $0x74] sm:$0x1] }
 0x170   : > { %v2876_v34 = vadd.f32 %v5990_v29, %v2853_v43  ;;  %v2877_v42 = vadd.f32 %v5990_v29, %v2854_v46  ;;  %v553_v60 = vrot.slane %v490_v24, 1  ;;  %v555_v62 = vrot.slane %v491_v50, 1 }
 0x171   : > { %v634_v32 = vmul.f32 %v5899_v35, %v604_v53  ;;  %v698_v16 = vrot.slane %v635_v54, 2  ;;  %v789_v36 = vmul.f32 %v5834_v25, %v5930_v57  ;;  %v700_v3 = vrot.slane %v636_v58, 2 }
 0x172   : > { %v2892_v52 = vmax.f32 %v2876_v34, 0.0  ;;  %v2893_v2 = vmax.f32 %v2877_v42, 0.0  ;;  %v554_v21 = vsel %vm516_vm0, %v552_v51, %v553_v60  ;;  %v556_v55 = vsel %vm516_vm0, %v553_v60, %v555_v62  ;;  %v3982_v62 = vld [vmem:[%s5087_s29 + $0x6c] sm:$0xe] }
 0x173   : > { %v587_v5 = vadd.f32 %v554_v21, %v426_v6  ;;  %v697_v40 = vrot.slane %v634_v32, 2  ;;  %v790_v38 = vmul.f32 %v5834_v25, %v5933_v61  ;;  %v588_v20 = vadd.f32 %v556_v55, %v427_v47 }
 0x174   : > { %v2902_v7 = vpack.c.bf16 %v2893_v2, %v2892_v52  ;;  %v701_v8 = vsel %vm661_vm1, %v698_v16, %v700_v3  ;;  %v822_v10 = vunpack.c.l.bf16 %v3934_v0  ;;  %v852_v14 = vmul.f32 %v5920_v44, %v5930_v57 }
 0x175   : > { %v699_v13 = vsel %vm661_vm1, %v697_v40, %v698_v16  ;;  %v853_v17 = vmul.f32 %v5920_v44, %v5933_v61  ;;  %v966_v18 = vunpack.c.l.bf16 %v3944_v56  ;;  %v6071_v19 = vpop.f32.mrb[0].mxu1  ;;  %v733_v26 = vadd.f32 %v701_v8, %v588_v20 }
 0x176   : > { %2910 = vst [vmem:[#allocation2 + $0x70] sm:$0xff] %v2902_v7  ;;  %4686 = vmatprep.mubr.bf16.mxu1 %v2902_v7  ;;  %v732_v22 = vadd.f32 %v699_v13, %v587_v5  ;;  %v854_v28 = vmul.f32 %v5920_v44, %v822_v10  ;;  %v997_v12 = vmul.f32 %v5851_v63, %v5933_v61  ;;  %v6077_v6 = vpop.f32.mrb[1].mxu1  ;;  %v914_v57 = vrot.slane %v852_v14, 1  ;;  %v4035_v13 = vld [vmem:[%s5087_s29 + $0xbc] sm:$0x1] }
 0x177   : > { %v915_v1 = vrot.slane %v853_v17, 1  ;;  %v996_v39 = vmul.f32 %v5851_v63, %v966_v18  ;;  %v998_v41 = vmul.f32 %v5851_v63, %v822_v10  ;;  %v6082_v23 = vpop.f32.mrb[2].mxu1  ;;  %v806_v46 = vadd.f32 %v790_v38, %v733_v26  ;;  %v4025_v38 = vld [vmem:[%s5087_s29 + $0xb4] sm:$0xff]  }
 0x178   : > { %v805_v43 = vadd.f32 %v789_v36, %v732_v22  ;;  %v917_v47 = vrot.slane %v854_v28, 1  ;;  %v1059_v24 = vrot.slane %v997_v12, 2  ;;  %v6084_v50 = vpop.f32.mrb[3].mxu1  ;;  %v1126_v54 = vunpack.c.l.bf16 %v3961_v33 }
 0x179   : > { %v916_v61 = vsel %vm516_vm0, %v914_v57, %v915_v1  ;;  %v1058_v51 = vrot.slane %v996_v39, 2  ;;  %v1061_v53 = vrot.slane %v998_v41, 2  ;;  %v1127_v60 = vunpack.c.h.bf16 %v3961_v33 }
 0x17a   : > { %v918_v34 = vsel %vm516_vm0, %v915_v1, %v917_v47  ;;  %v949_v42 = vadd.f32 %v916_v61, %v805_v43  ;;  %v1183_v58 = vunpack.c.l.bf16 %v3972_v11  ;;  %v1150_v0 = vmul.f32 %v5941_v31, %v1126_v54  ;;  %v4045_v11 = vld [vmem:[%s5087_s29 + $0xb4] sm:$0xe] }
 0x17b   : > { %v950_v32 = vadd.f32 %v918_v34, %v806_v46  ;;  %v1060_v16 = vsel %vm661_vm1, %v1058_v51, %v1059_v24  ;;  %v1062_v36 = vsel %vm661_vm1, %v1059_v24, %v1061_v53  ;;  %v1151_v2 = vmul.f32 %v5941_v31, %v1127_v60 }
 0x17c   : > { %v1093_v52 = vadd.f32 %v1060_v16, %v949_v42  ;;  %v1213_v21 = vmul.f32 %v5951_v4, %v1126_v54  ;;  %v1214_v3 = vmul.f32 %v5951_v4, %v1127_v60  ;;  %v1215_v55 = vmul.f32 %v5951_v4, %v1183_v58 }
 0x17d   : > { %v1094_v56 = vadd.f32 %v1062_v36, %v950_v32  ;;  %v1327_v5 = vunpack.c.l.bf16 %v3982_v62  ;;  %v1358_v40 = vmul.f32 %v5961_v9, %v1127_v60  ;;  %v1359_v10 = vmul.f32 %v5961_v9, %v1183_v58 }
 0x17e   : > { %v1166_v7 = vadd.f32 %v1150_v0, %v1093_v52  ;;  %v1275_v20 = vrot.slane %v1213_v21, 1  ;;  %v1276_v8 = vrot.slane %v1214_v3, 1  ;;  %v1278_v17 = vrot.slane %v1215_v55, 1  ;;  %v4073_v21 = vld [vmem:[%s5087_s29 + $0xc8] sm:$0x1] }
 0x17f   : > { %v1167_v14 = vadd.f32 %v1151_v2, %v1094_v56  ;;  %v1357_v18 = vmul.f32 %v5961_v9, %v1327_v5  ;;  %v1420_v22 = vrot.slane %v1358_v40, 2  ;;  %v1422_v28 = vrot.slane %v1359_v10, 2 }
 0x180   : > { %v1277_v26 = vsel %vm516_vm0, %v1275_v20, %v1276_v8  ;;  %v1814_v12 = vunpack.c.l.bf16 %v4025_v38  ;;  %v1815_v33 = vunpack.c.h.bf16 %v4025_v38  ;;  %v1279_v57 = vsel %vm516_vm0, %v1276_v8, %v1278_v17  ;;  %v4083_v20 = vld [vmem:[%s5087_s29 + $0xc0] sm:$0xe] }
 0x181   : > { %v1310_v1 = vadd.f32 %v1277_v26, %v1166_v7  ;;  %v1419_v39 = vrot.slane %v1357_v18, 2  ;;  %v1870_v41 = vunpack.c.l.bf16 %v4035_v13  ;;  %v1311_v43 = vadd.f32 %v1279_v57, %v1167_v14  ;;  %v4100_v57 = vld [vmem:[%s5087_s29 + $0xcc] sm:$0xff]  }
 0x182   : > { %v1423_v46 = vsel %vm661_vm1, %v1420_v22, %v1422_v28  ;;  %v1837_v47 = vmul.f32 %v5877_v30, %v1814_v12  ;;  %v1838_v24 = vmul.f32 %v5877_v30, %v1815_v33  ;;  %v1899_v51 = vmul.f32 %v5889_v59, %v1814_v12 }
 0x183   : > { %v1421_v61 = vsel %vm661_vm1, %v1419_v39, %v1420_v22  ;;  %v1900_v53 = vmul.f32 %v5889_v59, %v1815_v33  ;;  %v1901_v54 = vmul.f32 %v5889_v59, %v1870_v41  ;;  %v1455_v42 = vadd.f32 %v1423_v46, %v1311_v43 }
 0x184   : > { %v1454_v34 = vadd.f32 %v1421_v61, %v1310_v1  ;;  %v2013_v60 = vunpack.c.l.bf16 %v4045_v11  ;;  %v2043_v58 = vmul.f32 %v5899_v35, %v1815_v33  ;;  %v1961_v62 = vrot.slane %v1899_v51, 1 }
 0x185   : > { %v1962_v32 = vrot.slane %v1900_v53, 1  ;;  %v1964_v16 = vrot.slane %v1901_v54, 1  ;;  %v2044_v30 = vmul.f32 %v5899_v35, %v1870_v41  ;;  %v1478_v0 = vadd.f32 %v5990_v29, %v1455_v42  ;;  %v4121_v42 = vld [vmem:[%s5087_s29 + $0xcc] sm:$0xe] }
 0x186   : > { %v1477_v36 = vadd.f32 %v5990_v29, %v1454_v34  ;;  %v2042_v52 = vmul.f32 %v5899_v35, %v2013_v60  ;;  %v2105_v2 = vrot.slane %v2043_v58, 2  ;;  %v2195_v55 = vmul.f32 %v5834_v25, %v6016_v48 }
 0x187   : > { %v1963_v59 = vsel %vm516_vm0, %v1961_v62, %v1962_v32  ;;  %v1965_v3 = vsel %vm516_vm0, %v1962_v32, %v1964_v16  ;;  %v2107_v56 = vrot.slane %v2044_v30, 2  ;;  %v1494_v40 = vmax.f32 %v1478_v0, 0.0 }
 0x188   : > { %v1493_v5 = vmax.f32 %v1477_v36, 0.0  ;;  %v1996_v38 = vadd.f32 %v1963_v59, %v1837_v47  ;;  %v1997_v7 = vadd.f32 %v1965_v3, %v1838_v24  ;;  %v2104_v8 = vrot.slane %v2042_v52, 2  ;;  %v6148_v59 = vld [vmem:[%s5082_s27] ss:$0 sm:$0xff] }
 0x189   : > { %v2108_v10 = vsel %vm661_vm1, %v2105_v2, %v2107_v56  ;;  %v2196_v35 = vmul.f32 %v5834_v25, %v6021_v15  ;;  %v2228_v13 = vunpack.c.l.bf16 %v4073_v21  ;;  %v2257_v18 = vmul.f32 %v5920_v44, %v6016_v48  ;;  %v4111_v48 = vld [vmem:[%s5087_s29 + $0xd4] sm:$0x1] }
 0x18a   : > { %v1502_v14 = vpack.c.bf16 %v1494_v40, %v1493_v5  ;;  %v2140_v17 = vadd.f32 %v2108_v10, %v1997_v7  ;;  %v2258_v22 = vmul.f32 %v5920_v44, %v6021_v15  ;;  %v2106_v26 = vsel %vm661_vm1, %v2104_v8, %v2105_v2 }
 0x18b   : > { %v2259_v28 = vmul.f32 %v5920_v44, %v2228_v13  ;;  %v2371_v12 = vunpack.c.l.bf16 %v4083_v20  ;;  %v2401_v33 = vmul.f32 %v5851_v63, %v6021_v15  ;;  %v2139_v25 = vadd.f32 %v2106_v26, %v1996_v38 }
 0x18c   : > { %1510 = vst [vmem:[#allocation2 + $0x38] sm:$0xff] %v1502_v14  ;;  %4655 = vmatmul.mubr.bf16.gmra.mrb[12].mxu0 %v1502_v14  ;;  %v2212_v1 = vadd.f32 %v2196_v35, %v2140_v17  ;;  %v2319_v39 = vrot.slane %v2257_v18, 1  ;;  %v2320_v41 = vrot.slane %v2258_v22, 1  ;;  %v2402_v46 = vmul.f32 %v5851_v63, %v2228_v13 }
 0x18d   : > { %v2322_v11 = vrot.slane %v2259_v28, 1  ;;  %v2400_v43 = vmul.f32 %v5851_v63, %v2371_v12  ;;  %v2463_v47 = vrot.slane %v2401_v33, 2  ;;  %v2211_v44 = vadd.f32 %v2195_v55, %v2139_v25 }
 0x18e   : > { %v2321_v24 = vsel %vm516_vm0, %v2319_v39, %v2320_v41  ;;  %v2530_v61 = vunpack.c.l.bf16 %v4100_v57  ;;  %v2531_v15 = vunpack.c.h.bf16 %v4100_v57  ;;  %v2465_v54 = vrot.slane %v2402_v46, 2 }
 0x18f   : > { %v2323_v51 = vsel %vm516_vm0, %v2320_v41, %v2322_v11  ;;  %v2462_v53 = vrot.slane %v2400_v43, 2  ;;  %v2586_v34 = vunpack.c.l.bf16 %v4111_v48  ;;  %v2354_v60 = vadd.f32 %v2321_v24, %v2211_v44 }
 0x190   : > { %v2355_v58 = vadd.f32 %v2323_v51, %v2212_v1  ;;  %v2553_v62 = vmul.f32 %v5941_v31, %v2530_v61  ;;  %v2554_v32 = vmul.f32 %v5941_v31, %v2531_v15  ;;  %v2466_v16 = vsel %vm661_vm1, %v2463_v47, %v2465_v54 }
 0x191   : > { %v2464_v63 = vsel %vm661_vm1, %v2462_v53, %v2463_v47  ;;  %v2615_v30 = vmul.f32 %v5951_v4, %v2530_v61  ;;  %v2616_v36 = vmul.f32 %v5951_v4, %v2531_v15  ;;  %v2617_v2 = vmul.f32 %v5951_v4, %v2586_v34 }
 0x192   : > { %v2497_v0 = vadd.f32 %v2464_v63, %v2354_v60  ;;  %v2498_v52 = vadd.f32 %v2466_v16, %v2355_v58  ;;  %v2729_v21 = vunpack.c.l.bf16 %v4121_v42  ;;  %v2759_v55 = vmul.f32 %v5961_v9, %v2531_v15 }
 0x193   : > { %v2677_v3 = vrot.slane %v2615_v30, 1  ;;  %v2678_v56 = vrot.slane %v2616_v36, 1  ;;  %v2760_v31 = vmul.f32 %v5961_v9, %v2586_v34  ;;  %v2680_v38 = vrot.slane %v2617_v2, 1 }
 0x194   : > { %v2569_v5 = vadd.f32 %v2553_v62, %v2497_v0  ;;  %v2570_v40 = vadd.f32 %v2554_v32, %v2498_v52  ;;  %v2758_v7 = vmul.f32 %v5961_v9, %v2729_v21  ;;  %v2821_v8 = vrot.slane %v2759_v55, 2 }
 0x195   : > { %v2679_v20 = vsel %vm516_vm0, %v2677_v3, %v2678_v56  ;;  %v2823_v10 = vrot.slane %v2760_v31, 2  ;;  %v1633_v4 = vadd.f32 %v6005_v27, %v6148_v59  ;;  %v2681_v35 = vsel %vm516_vm0, %v2678_v56, %v2680_v38 }
 0x196   : > { %v2712_v13 = vadd.f32 %v2679_v20, %v2569_v5  ;;  %v2820_v14 = vrot.slane %v2758_v7, 2  ;;  %v3034_v17 = vadd.f32 %v6071_v19, %v6148_v59  ;;  %v2713_v18 = vadd.f32 %v2681_v35, %v2570_v40 }
 0x197   : > { %v2824_v22 = vsel %vm661_vm1, %v2821_v8, %v2823_v10  ;;  %v1625_v9 = vadd.f32 %v6148_v59, %v6010_v37  ;;  %v3026_v28 = vadd.f32 %v6148_v59, %v6077_v6  ;;  %v1636_v27 = vadd.f32 %v6013_v45, %v6148_v59 }
 0x198   : > { %v2822_v26 = vsel %vm661_vm1, %v2820_v14, %v2821_v8  ;;  %v2856_v33 = vadd.f32 %v2824_v22, %v2713_v18  ;;  %v1689_v57 = vmax.f32 %v1633_v4, 0.0  ;;  %v3037_v19 = vadd.f32 %v6082_v23, %v6148_v59 }
 0x199   : > { %v2855_v12 = vadd.f32 %v2822_v26, %v2712_v13  ;;  %v3090_v25 = vmax.f32 %v3034_v17, 0.0  ;;  %v1690_v1 = vmax.f32 %v1636_v27, 0.0  ;;  %v1628_v37 = vadd.f32 %v6148_v59, %v6018_v49 }
 0x19a   : > { %v3029_v39 = vadd.f32 %v6148_v59, %v6084_v50  ;;  %v2879_v45 = vadd.f32 %v5990_v29, %v2856_v33  ;;  %v1687_v41 = vmax.f32 %v1625_v9, 0.0  ;;  %v3091_v48 = vmax.f32 %v3037_v19, 0.0 }
 0x19b   : > { %v2878_v6 = vadd.f32 %v5990_v29, %v2855_v12  ;;  %v3088_v11 = vmax.f32 %v3026_v28, 0.0  ;;  %v4317_v23 = vpack.c.bf16 %v1690_v1, %v1689_v57  ;;  %v1688_v43 = vmax.f32 %v1628_v37, 0.0 }
 0x19c   : > { %v3089_v46 = vmax.f32 %v3029_v39, 0.0  ;;  %v2895_v44 = vmax.f32 %v2879_v45, 0.0  ;;  %v4405_v24 = vpack.c.bf16 %v3091_v48, %v3090_v25 }
 0x19d   : > { %v2894_v47 = vmax.f32 %v2878_v6, 0.0  ;;  %4528 = vst [vmem:[%s5091_s18 + $0x8] sm:$0xff] %v4317_v23   ;;  %v4312_v49 = vpack.c.bf16 %v1688_v43, %v1687_v41 }
 0x19e   : > { %v4400_v61 = vpack.c.bf16 %v3089_v46, %v3088_v11  ;;  %4548 = vst [vmem:[%s5091_s18 + $0x48] sm:$0xff] %v4405_v24  }
 0x19f   : > { %v2903_v50 = vpack.c.bf16 %v2895_v44, %v2894_v47  ;;  %4313 = vst [vmem:[%s5091_s18] sm:$0xff] %v4312_v49  }
 0x1a0   : > { %4547 = vst [vmem:[%s5091_s18 + $0x40] sm:$0xff] %v4400_v61  }
 0x1a1   : > { %2911 = vst [vmem:[#allocation2 + $0x78] sm:$0xff] %v2903_v50  ;;  %4687 = vmatmul.mubr.bf16.gmra.mrb[12].mxu1 %v2903_v50 }
 0x1b5   : > { %v4648_v29 = vpop.f32.mrb[4].mxu0 }
 0x1b6   : > { %v1649_v15 = vadd.f32 %v4648_v29, %v6148_v59  ;;  %v1640_v51 = vpop.f32.mrb[5].mxu0 }
 0x1b7   : > { %v1641_v53 = vadd.f32 %v6148_v59, %v1640_v51  ;;  %v4649_v54 = vpop.f32.mrb[6].mxu0 }
 0x1b8   : > { %v1652_v34 = vadd.f32 %v4649_v54, %v6148_v59  ;;  %v1643_v42 = vpop.f32.mrb[7].mxu0  ;;  %v1693_v58 = vmax.f32 %v1649_v15, 0.0 }
 0x1b9   : > { %v1644_v60 = vadd.f32 %v6148_v59, %v1643_v42  ;;  %v1691_v32 = vmax.f32 %v1641_v53, 0.0 }
 0x1ba   : > { %v1694_v62 = vmax.f32 %v1652_v34, 0.0 }
 0x1bb   : > { %v1692_v63 = vmax.f32 %v1644_v60, 0.0 }
 0x1bc   : > { %v4327_v16 = vpack.c.bf16 %v1694_v62, %v1693_v58 }
 0x1bd   : > { %v4322_v30 = vpack.c.bf16 %v1692_v63, %v1691_v32 }
 0x1be   : > { %4530 = vst [vmem:[%s5091_s18 + $0x18] sm:$0xff] %v4327_v16  }
 0x1bf   : > { %4529 = vst [vmem:[%s5091_s18 + $0x10] sm:$0xff] %v4322_v30  }
 0x1ca   : > { %v4680_v36 = vpop.f32.mrb[4].mxu1 }
 0x1cb   : > { %v3050_v0 = vadd.f32 %v4680_v36, %v6148_v59  ;;  %v3041_v52 = vpop.f32.mrb[5].mxu1 }
 0x1cc   : > { %v3042_v2 = vadd.f32 %v6148_v59, %v3041_v52  ;;  %v4681_v21 = vpop.f32.mrb[6].mxu1 }
 0x1cd   : > { %v3053_v3 = vadd.f32 %v4681_v21, %v6148_v59  ;;  %v3044_v56 = vpop.f32.mrb[7].mxu1  ;;  %v3094_v31 = vmax.f32 %v3050_v0, 0.0 }
 0x1ce   : > { %v3045_v55 = vadd.f32 %v6148_v59, %v3044_v56  ;;  %v3092_v40 = vmax.f32 %v3042_v2, 0.0 }
 0x1cf   : > { %v3095_v5 = vmax.f32 %v3053_v3, 0.0 }
 0x1d0   : > { %v3093_v38 = vmax.f32 %v3045_v55, 0.0 }
 0x1d1   : > { %v4415_v7 = vpack.c.bf16 %v3095_v5, %v3094_v31 }
 0x1d2   : > { %v4410_v20 = vpack.c.bf16 %v3093_v38, %v3092_v40 }
 0x1d3   : > { %4550 = vst [vmem:[%s5091_s18 + $0x58] sm:$0xff] %v4415_v7  }
 0x1d4   : > { %4549 = vst [vmem:[%s5091_s18 + $0x50] sm:$0xff] %v4410_v20  }
 0x20a   : > { %v4652_v8 = vpop.f32.mrb[8].mxu0 }
 0x20b   : > { %v1665_v10 = vadd.f32 %v4652_v8, %v6148_v59  ;;  %v1656_v4 = vpop.f32.mrb[9].mxu0 }
 0x20c   : > { %v1657_v35 = vadd.f32 %v6148_v59, %v1656_v4  ;;  %v4653_v13 = vpop.f32.mrb[10].mxu0 }
 0x20d   : > { %v1668_v14 = vadd.f32 %v4653_v13, %v6148_v59  ;;  %v1659_v17 = vpop.f32.mrb[11].mxu0  ;;  %v1697_v22 = vmax.f32 %v1665_v10, 0.0 }
 0x20e   : > { %v1660_v18 = vadd.f32 %v6148_v59, %v1659_v17  ;;  %v1695_v26 = vmax.f32 %v1657_v35, 0.0 }
 0x20f   : > { %v1698_v9 = vmax.f32 %v1668_v14, 0.0 }
 0x210   : > { %v1696_v28 = vmax.f32 %v1660_v18, 0.0 }
 0x211   : > { %v4337_v27 = vpack.c.bf16 %v1698_v9, %v1697_v22 }
 0x212   : > { %v4332_v12 = vpack.c.bf16 %v1696_v28, %v1695_v26 }
 0x213   : > { %4532 = vst [vmem:[%s5091_s18 + $0x28] sm:$0xff] %v4337_v27  }
 0x214   : > { %4531 = vst [vmem:[%s5091_s18 + $0x20] sm:$0xff] %v4332_v12  }
 0x21f   : > { %v4684_v33 = vpop.f32.mrb[8].mxu1 }
 0x220   : > { %v3066_v57 = vadd.f32 %v4684_v33, %v6148_v59  ;;  %v3057_v19 = vpop.f32.mrb[9].mxu1 }
 0x221   : > { %v3058_v25 = vadd.f32 %v6148_v59, %v3057_v19  ;;  %v4685_v1 = vpop.f32.mrb[10].mxu1 }
 0x222   : > { %v3069_v37 = vadd.f32 %v4685_v1, %v6148_v59  ;;  %v3060_v39 = vpop.f32.mrb[11].mxu1  ;;  %v3098_v45 = vmax.f32 %v3066_v57, 0.0 }
 0x223   : > { %v3061_v6 = vadd.f32 %v6148_v59, %v3060_v39  ;;  %v3096_v48 = vmax.f32 %v3058_v25, 0.0 }
 0x224   : > { %v3099_v41 = vmax.f32 %v3069_v37, 0.0 }
 0x225   : > { %v3097_v11 = vmax.f32 %v3061_v6, 0.0 }
 0x226   : > { %v4425_v23 = vpack.c.bf16 %v3099_v41, %v3098_v45 }
 0x227   : > { %v4420_v43 = vpack.c.bf16 %v3097_v11, %v3096_v48 }
 0x228   : > { %4552 = vst [vmem:[%s5091_s18 + $0x68] sm:$0xff] %v4425_v23  }
 0x229   : > { %4551 = vst [vmem:[%s5091_s18 + $0x60] sm:$0xff] %v4420_v43  }
 0x25f   : > { %v4656_v46 = vpop.f32.mrb[12].mxu0 }
 0x260   : > { %v1681_v47 = vadd.f32 %v4656_v46, %v6148_v59  ;;  %v1672_v44 = vpop.f32.mrb[13].mxu0 }
 0x261   : > { %v1673_v24 = vadd.f32 %v6148_v59, %v1672_v44  ;;  %v4657_v49 = vpop.f32.mrb[14].mxu0 }
 0x262   : > { %v1684_v61 = vadd.f32 %v4657_v49, %v6148_v59  ;;  %v1675_v50 = vpop.f32.mrb[15].mxu0  ;;  %v1701_v15 = vmax.f32 %v1681_v47, 0.0 }
 0x263   : > { %v1676_v29 = vadd.f32 %v6148_v59, %v1675_v50  ;;  %v1699_v53 = vmax.f32 %v1673_v24, 0.0 }
 0x264   : > { %v1702_v51 = vmax.f32 %v1684_v61, 0.0 }
 0x265   : > { %v1700_v54 = vmax.f32 %v1676_v29, 0.0 }
 0x266   : > { %v4347_v34 = vpack.c.bf16 %v1702_v51, %v1701_v15 }
 0x267   : > { %v4342_v42 = vpack.c.bf16 %v1700_v54, %v1699_v53 }
 0x268   : > { %4534 = vst [vmem:[%s5091_s18 + $0x38] sm:$0xff] %v4347_v34  }
 0x269   : > { %4533 = vst [vmem:[%s5091_s18 + $0x30] sm:$0xff] %v4342_v42  }
 0x274   : > { %v4688_v60 = vpop.f32.mrb[12].mxu1 }
 0x275   : > { %v3082_v58 = vadd.f32 %v4688_v60, %v6148_v59  ;;  %v3073_v62 = vpop.f32.mrb[13].mxu1 }
 0x276   : > { %v3074_v32 = vadd.f32 %v6148_v59, %v3073_v62  ;;  %v4689_v63 = vpop.f32.mrb[14].mxu1 }
 0x277   : > { %v3085_v16 = vadd.f32 %v4689_v63, %v6148_v59  ;;  %v3076_v30 = vpop.f32.mrb[15].mxu1  ;;  %v3102_v0 = vmax.f32 %v3082_v58, 0.0 }
 0x278   : > { %v3077_v36 = vadd.f32 %v6148_v59, %v3076_v30  ;;  %v3100_v2 = vmax.f32 %v3074_v32, 0.0 }
 0x279   : > { %v3103_v52 = vmax.f32 %v3085_v16, 0.0 }
 0x27a   : > { %v3101_v21 = vmax.f32 %v3077_v36, 0.0 }
 0x27b   : > { %v4435_v3 = vpack.c.bf16 %v3103_v52, %v3102_v0 }
 0x27c   : > { %v4430_v56 = vpack.c.bf16 %v3101_v21, %v3100_v2 }
 0x27d   : > { %4554 = vst [vmem:[%s5091_s18 + $0x78] sm:$0xff] %v4435_v3  }
 0x27e   : > { %4553 = vst [vmem:[%s5091_s18 + $0x70] sm:$0xff] %v4430_v56  }
 0x27f PF: > { %p4150_p3 = scmp.le.s32.totalorder %s4925_s22, 0 }
 0x280   : > { %v4863_v55 = vld [vmem:[%s5089_s28] sm:$0xff] (!%p4150_p3)   ;;  %v4864_v31 = vld [vmem:[%s5089_s28 + $0x8] sm:$0xff] (!%p4150_p3)   ;;  %v4865_v59 = vld [vmem:[%s5089_s28 + $0x10] sm:$0xff] (!%p4150_p3)  }
 0x281   : > { %3187 = sbr.rel (%p4150_p3) target bundleno = 919 (0x397), region = 89  ;;  %4690 = vmatprep.subr.bf16.mxu0 (!%p4150_p3), %v4863_v55  ;;  %4738 = vmatprep.subr.bf16.mxu1 (!%p4150_p3), %v4863_v55  ;;  %v4866_v5 = vld [vmem:[%s5089_s28 + $0x18] sm:$0xff] (!%p4150_p3)   ;;  %v3188_v40 = vld [vmem:[#allocation2] sm:$0xff] (!%p4150_p3)  ;;  %v4868_v20 = vld [vmem:[%s5089_s28 + $0x28] sm:$0xff] (!%p4150_p3)  }
 0x282   : > { %4691 = vmatpush3.bf16.msra.mxu0 (!%p4150_p3), %v4863_v55  ;;  %4746 = vmatpush3.bf16.msra.mxu1 (!%p4150_p3), %v4863_v55  ;;  %v3196_v38 = vld [vmem:[#allocation2 + $0x40] sm:$0xff] (!%p4150_p3)  ;;  %v4869_v8 = vld [vmem:[%s5089_s28 + $0x30] sm:$0xff] (!%p4150_p3)   ;;  %v4870_v10 = vld [vmem:[%s5089_s28 + $0x38] sm:$0xff] (!%p4150_p3)  }
 0x283   : > { %4692 = vmatprep.subr.bf16.mxu0 (!%p4150_p3), %v4864_v31  ;;  %4739 = vmatprep.subr.bf16.mxu1 (!%p4150_p3), %v4864_v31  ;;  %v4867_v7 = vld [vmem:[%s5089_s28 + $0x20] sm:$0xff] (!%p4150_p3)   ;;  %v3189_v4 = vld [vmem:[#allocation2 + $0x8] sm:$0xff] (!%p4150_p3)  ;;  %v3190_v13 = vld [vmem:[#allocation2 + $0x10] sm:$0xff] (!%p4150_p3) }
 0x284   : > { %4706 = vmatprep.mubr.bf16.mxu0 (!%p4150_p3), %v3188_v40  ;;  %4722 = vmatprep.mubr.bf16.mxu1 (!%p4150_p3), %v3196_v38  ;;  %v3197_v35 = vld [vmem:[#allocation2 + $0x48] sm:$0xff] (!%p4150_p3)  ;;  %v3198_v14 = vld [vmem:[#allocation2 + $0x50] sm:$0xff] (!%p4150_p3)  ;;  %v3191_v17 = vld [vmem:[#allocation2 + $0x18] sm:$0xff] (!%p4150_p3) }
 0x285   : > { %v3199_v18 = vld [vmem:[#allocation2 + $0x58] sm:$0xff] (!%p4150_p3)  ;;  %v3192_v22 = vld [vmem:[#allocation2 + $0x20] sm:$0xff] (!%p4150_p3)  ;;  %v3193_v26 = vld [vmem:[#allocation2 + $0x28] sm:$0xff] (!%p4150_p3) }
 0x286   : > { %4693 = vmatpush3.bf16.msra.mxu0 (!%p4150_p3), %v4864_v31  ;;  %4747 = vmatpush3.bf16.msra.mxu1 (!%p4150_p3), %v4864_v31  ;;  %v3200_v9 = vld [vmem:[#allocation2 + $0x60] sm:$0xff] (!%p4150_p3)  ;;  %v3201_v28 = vld [vmem:[#allocation2 + $0x68] sm:$0xff] (!%p4150_p3)  ;;  %v3194_v27 = vld [vmem:[#allocation2 + $0x30] sm:$0xff] (!%p4150_p3) }
 0x287   : > { %4694 = vmatprep.subr.bf16.mxu0 (!%p4150_p3), %v4865_v59  ;;  %4740 = vmatprep.subr.bf16.mxu1 (!%p4150_p3), %v4865_v59  ;;  %v3202_v12 = vld [vmem:[#allocation2 + $0x70] sm:$0xff] (!%p4150_p3)  ;;  %v3195_v33 = vld [vmem:[#allocation2 + $0x38] sm:$0xff] (!%p4150_p3)  ;;  %v6225_v19 = vld [vmem:[%s5082_s27] ss:$0 sm:$0xff] (!%p4150_p3) }
 0x288   : > { %v3203_v57 = vld [vmem:[#allocation2 + $0x78] sm:$0xff] }
 0x28a   : > { %4695 = vmatpush3.bf16.msra.mxu0 %v4865_v59  ;;  %4748 = vmatpush3.bf16.msra.mxu1 %v4865_v59 }
 0x28b   : > { %4696 = vmatprep.subr.bf16.mxu0 %v4866_v5  ;;  %4741 = vmatprep.subr.bf16.mxu1 %v4866_v5 }
 0x28e   : > { %4697 = vmatpush3.bf16.msra.mxu0 %v4866_v5  ;;  %4749 = vmatpush3.bf16.msra.mxu1 %v4866_v5 }
 0x28f   : > { %4698 = vmatprep.subr.bf16.mxu0 %v4867_v7  ;;  %4742 = vmatprep.subr.bf16.mxu1 %v4867_v7 }
 0x292   : > { %4699 = vmatpush3.bf16.msra.mxu0 %v4867_v7  ;;  %4750 = vmatpush3.bf16.msra.mxu1 %v4867_v7 }
 0x293   : > { %4700 = vmatprep.subr.bf16.mxu0 %v4868_v20  ;;  %4743 = vmatprep.subr.bf16.mxu1 %v4868_v20 }
 0x296   : > { %4701 = vmatpush3.bf16.msra.mxu0 %v4868_v20  ;;  %4751 = vmatpush3.bf16.msra.mxu1 %v4868_v20 }
 0x297   : > { %4702 = vmatprep.subr.bf16.mxu0 %v4869_v8  ;;  %4744 = vmatprep.subr.bf16.mxu1 %v4869_v8 }
 0x29a   : > { %4703 = vmatpush3.bf16.msra.mxu0 %v4869_v8  ;;  %4752 = vmatpush3.bf16.msra.mxu1 %v4869_v8 }
 0x29b   : > { %4704 = vmatprep.subr.bf16.mxu0 %v4870_v10  ;;  %4745 = vmatprep.subr.bf16.mxu1 %v4870_v10 }
 0x29e   : > { %4705 = vmatpush3.bf16.msra.mxu0 %v4870_v10  ;;  %4753 = vmatpush3.bf16.msra.mxu1 %v4870_v10 }
 0x2a1   : > { %4707 = vmatmul.mubr.bf16.vlgmr.msra.gmra.mrb[0].mxu0 %v3189_v4  ;;  %4723 = vmatmul.mubr.bf16.vlgmr.msra.gmra.mrb[0].mxu1 %v3197_v35 }
 0x2a2   : > { %4710 = vmatprep.mubr.bf16.mxu0 %v3190_v13  ;;  %4726 = vmatprep.mubr.bf16.mxu1 %v3198_v14 }
 0x2a9   : > { %4711 = vmatmul.mubr.bf16.gmra.mrb[4].mxu0 %v3191_v17  ;;  %4727 = vmatmul.mubr.bf16.gmra.mrb[4].mxu1 %v3199_v18 }
 0x2aa   : > { %4714 = vmatprep.mubr.bf16.mxu0 %v3192_v22  ;;  %4730 = vmatprep.mubr.bf16.mxu1 %v3200_v9 }
 0x2b1   : > { %4715 = vmatmul.mubr.bf16.gmra.mrb[8].mxu0 %v3193_v26  ;;  %4731 = vmatmul.mubr.bf16.gmra.mrb[8].mxu1 %v3201_v28 }
 0x2b2   : > { %4718 = vmatprep.mubr.bf16.mxu0 %v3194_v27  ;;  %4734 = vmatprep.mubr.bf16.mxu1 %v3202_v12 }
 0x2b9   : > { %4719 = vmatmul.mubr.bf16.gmra.mrb[12].mxu0 %v3195_v33  ;;  %4735 = vmatmul.mubr.bf16.gmra.mrb[12].mxu1 %v3203_v57 }
 0x374   : > { %v4708_v25 = vpop.f32.mrb[0].mxu0  ;;  %v4724_v1 = vpop.f32.mrb[0].mxu1 }
 0x375   : > { %v3318_v37 = vadd.f32 %v4708_v25, %v6225_v19  ;;  %v3382_v39 = vadd.f32 %v4724_v1, %v6225_v19  ;;  %v3309_v6 = vpop.f32.mrb[1].mxu0  ;;  %v3373_v45 = vpop.f32.mrb[1].mxu1 }
 0x376   : > { %v3310_v41 = vadd.f32 %v6225_v19, %v3309_v6  ;;  %v3374_v48 = vadd.f32 %v6225_v19, %v3373_v45  ;;  %v4709_v11 = vpop.f32.mrb[2].mxu0  ;;  %v4725_v23 = vpop.f32.mrb[2].mxu1 }
 0x377   : > { %v3321_v43 = vadd.f32 %v4709_v11, %v6225_v19  ;;  %v3385_v46 = vadd.f32 %v4725_v23, %v6225_v19  ;;  %v3312_v47 = vpop.f32.mrb[3].mxu0  ;;  %v3376_v44 = vpop.f32.mrb[3].mxu1  ;;  %v3438_v61 = vmax.f32 %v3318_v37, 0.0  ;;  %v3454_v50 = vmax.f32 %v3382_v39, 0.0 }
 0x378   : > { %v3313_v24 = vadd.f32 %v6225_v19, %v3312_v47  ;;  %v3377_v49 = vadd.f32 %v6225_v19, %v3376_v44  ;;  %v3436_v51 = vmax.f32 %v3310_v41, 0.0  ;;  %v3452_v53 = vmax.f32 %v3374_v48, 0.0 }
 0x379   : > { %v3439_v29 = vmax.f32 %v3321_v43, 0.0  ;;  %v3455_v15 = vmax.f32 %v3385_v46, 0.0 }
 0x37a   : > { %v3437_v54 = vmax.f32 %v3313_v24, 0.0  ;;  %v3453_v34 = vmax.f32 %v3377_v49, 0.0 }
 0x37b   : > { %v4445_v42 = vpack.c.bf16 %v3439_v29, %v3438_v61  ;;  %v4485_v60 = vpack.c.bf16 %v3455_v15, %v3454_v50 }
 0x37c   : > { %v4440_v58 = vpack.c.bf16 %v3437_v54, %v3436_v51  ;;  %v4480_v62 = vpack.c.bf16 %v3453_v34, %v3452_v53  ;;  %v4712_v32 = vpop.f32.mrb[4].mxu0  ;;  %v4728_v63 = vpop.f32.mrb[4].mxu1 }
 0x37d   : > { %4555 = vst [vmem:[%s5091_s18 + $0x8] sm:$0xff] %v4445_v42   ;;  %4563 = vst [vmem:[%s5091_s18 + $0x48] sm:$0xff] %v4485_v60   ;;  %v3334_v16 = vadd.f32 %v4712_v32, %v6225_v19  ;;  %v3398_v30 = vadd.f32 %v4728_v63, %v6225_v19  ;;  %v3325_v36 = vpop.f32.mrb[5].mxu0  ;;  %v3389_v0 = vpop.f32.mrb[5].mxu1 }
 0x37e   : > { %4441 = vst [vmem:[%s5091_s18] sm:$0xff] %v4440_v58   ;;  %4562 = vst [vmem:[%s5091_s18 + $0x40] sm:$0xff] %v4480_v62   ;;  %v3326_v52 = vadd.f32 %v6225_v19, %v3325_v36  ;;  %v3390_v2 = vadd.f32 %v6225_v19, %v3389_v0  ;;  %v4713_v21 = vpop.f32.mrb[6].mxu0  ;;  %v4729_v3 = vpop.f32.mrb[6].mxu1 }
 0x37f   : > { %v3337_v56 = vadd.f32 %v4713_v21, %v6225_v19  ;;  %v3401_v55 = vadd.f32 %v4729_v3, %v6225_v19  ;;  %v3328_v31 = vpop.f32.mrb[7].mxu0  ;;  %v3392_v59 = vpop.f32.mrb[7].mxu1  ;;  %v3442_v38 = vmax.f32 %v3334_v16, 0.0  ;;  %v3458_v7 = vmax.f32 %v3398_v30, 0.0 }
 0x380   : > { %v3329_v5 = vadd.f32 %v6225_v19, %v3328_v31  ;;  %v3393_v40 = vadd.f32 %v6225_v19, %v3392_v59  ;;  %v3440_v10 = vmax.f32 %v3326_v52, 0.0  ;;  %v3456_v4 = vmax.f32 %v3390_v2, 0.0 }
 0x381   : > { %v3443_v20 = vmax.f32 %v3337_v56, 0.0  ;;  %v3459_v8 = vmax.f32 %v3401_v55, 0.0 }
 0x382   : > { %v3441_v35 = vmax.f32 %v3329_v5, 0.0  ;;  %v3457_v13 = vmax.f32 %v3393_v40, 0.0 }
 0x383   : > { %v4455_v14 = vpack.c.bf16 %v3443_v20, %v3442_v38  ;;  %v4495_v17 = vpack.c.bf16 %v3459_v8, %v3458_v7 }
 0x384   : > { %v4450_v18 = vpack.c.bf16 %v3441_v35, %v3440_v10  ;;  %v4490_v22 = vpack.c.bf16 %v3457_v13, %v3456_v4  ;;  %v4716_v9 = vpop.f32.mrb[8].mxu0  ;;  %v4732_v26 = vpop.f32.mrb[8].mxu1 }
 0x385   : > { %4557 = vst [vmem:[%s5091_s18 + $0x18] sm:$0xff] %v4455_v14   ;;  %4565 = vst [vmem:[%s5091_s18 + $0x58] sm:$0xff] %v4495_v17   ;;  %v3350_v28 = vadd.f32 %v4716_v9, %v6225_v19  ;;  %v3414_v27 = vadd.f32 %v4732_v26, %v6225_v19  ;;  %v3341_v12 = vpop.f32.mrb[9].mxu0  ;;  %v3405_v33 = vpop.f32.mrb[9].mxu1 }
 0x386   : > { %4556 = vst [vmem:[%s5091_s18 + $0x10] sm:$0xff] %v4450_v18   ;;  %4564 = vst [vmem:[%s5091_s18 + $0x50] sm:$0xff] %v4490_v22   ;;  %v3342_v57 = vadd.f32 %v6225_v19, %v3341_v12  ;;  %v3406_v25 = vadd.f32 %v6225_v19, %v3405_v33  ;;  %v4717_v1 = vpop.f32.mrb[10].mxu0  ;;  %v4733_v37 = vpop.f32.mrb[10].mxu1 }
 0x387   : > { %v3353_v39 = vadd.f32 %v4717_v1, %v6225_v19  ;;  %v3417_v6 = vadd.f32 %v4733_v37, %v6225_v19  ;;  %v3344_v45 = vpop.f32.mrb[11].mxu0  ;;  %v3408_v41 = vpop.f32.mrb[11].mxu1  ;;  %v3446_v23 = vmax.f32 %v3350_v28, 0.0  ;;  %v3462_v43 = vmax.f32 %v3414_v27, 0.0 }
 0x388   : > { %v3345_v48 = vadd.f32 %v6225_v19, %v3344_v45  ;;  %v3409_v11 = vadd.f32 %v6225_v19, %v3408_v41  ;;  %v3444_v44 = vmax.f32 %v3342_v57, 0.0  ;;  %v3460_v24 = vmax.f32 %v3406_v25, 0.0 }
 0x389   : > { %v3447_v46 = vmax.f32 %v3353_v39, 0.0  ;;  %v3463_v47 = vmax.f32 %v3417_v6, 0.0 }
 0x38a   : > { %v3445_v49 = vmax.f32 %v3345_v48, 0.0  ;;  %v3461_v61 = vmax.f32 %v3409_v11, 0.0 }
 0x38b   : > { %v4465_v50 = vpack.c.bf16 %v3447_v46, %v3446_v23  ;;  %v4505_v29 = vpack.c.bf16 %v3463_v47, %v3462_v43 }
 0x38c   : > { %v4460_v15 = vpack.c.bf16 %v3445_v49, %v3444_v44  ;;  %v4500_v51 = vpack.c.bf16 %v3461_v61, %v3460_v24  ;;  %v4720_v53 = vpop.f32.mrb[12].mxu0  ;;  %v4736_v54 = vpop.f32.mrb[12].mxu1 }
 0x38d   : > { %4559 = vst [vmem:[%s5091_s18 + $0x28] sm:$0xff] %v4465_v50   ;;  %4567 = vst [vmem:[%s5091_s18 + $0x68] sm:$0xff] %v4505_v29   ;;  %v3366_v34 = vadd.f32 %v4720_v53, %v6225_v19  ;;  %v3430_v42 = vadd.f32 %v4736_v54, %v6225_v19  ;;  %v3357_v60 = vpop.f32.mrb[13].mxu0  ;;  %v3421_v58 = vpop.f32.mrb[13].mxu1 }
 0x38e   : > { %4558 = vst [vmem:[%s5091_s18 + $0x20] sm:$0xff] %v4460_v15   ;;  %4566 = vst [vmem:[%s5091_s18 + $0x60] sm:$0xff] %v4500_v51   ;;  %v3358_v62 = vadd.f32 %v6225_v19, %v3357_v60  ;;  %v3422_v32 = vadd.f32 %v6225_v19, %v3421_v58  ;;  %v4721_v63 = vpop.f32.mrb[14].mxu0  ;;  %v4737_v16 = vpop.f32.mrb[14].mxu1 }
 0x38f   : > { %v3369_v30 = vadd.f32 %v4721_v63, %v6225_v19  ;;  %v3433_v36 = vadd.f32 %v4737_v16, %v6225_v19  ;;  %v3360_v0 = vpop.f32.mrb[15].mxu0  ;;  %v3424_v52 = vpop.f32.mrb[15].mxu1  ;;  %v3450_v3 = vmax.f32 %v3366_v34, 0.0  ;;  %v3466_v56 = vmax.f32 %v3430_v42, 0.0 }
 0x390   : > { %v3361_v2 = vadd.f32 %v6225_v19, %v3360_v0  ;;  %v3425_v21 = vadd.f32 %v6225_v19, %v3424_v52  ;;  %v3448_v59 = vmax.f32 %v3358_v62, 0.0  ;;  %v3464_v5 = vmax.f32 %v3422_v32, 0.0 }
 0x391   : > { %v3451_v55 = vmax.f32 %v3369_v30, 0.0  ;;  %v3467_v31 = vmax.f32 %v3433_v36, 0.0 }
 0x392   : > { %v3449_v40 = vmax.f32 %v3361_v2, 0.0  ;;  %v3465_v38 = vmax.f32 %v3425_v21, 0.0 }
 0x393   : > { %v4475_v7 = vpack.c.bf16 %v3451_v55, %v3450_v3  ;;  %v4515_v20 = vpack.c.bf16 %v3467_v31, %v3466_v56 }
 0x394   : > { %v4470_v8 = vpack.c.bf16 %v3449_v40, %v3448_v59  ;;  %v4510_v10 = vpack.c.bf16 %v3465_v38, %v3464_v5 }
 0x395   : > { %4561 = vst [vmem:[%s5091_s18 + $0x38] sm:$0xff] %v4475_v7   ;;  %4569 = vst [vmem:[%s5091_s18 + $0x78] sm:$0xff] %v4515_v20  }
 0x396   : > { %4560 = vst [vmem:[%s5091_s18 + $0x30] sm:$0xff] %v4470_v8   ;;  %4568 = vst [vmem:[%s5091_s18 + $0x70] sm:$0xff] %v4510_v10  }
 0x397 PF: > { %3634 = sbr.rel (!%p5040_p9) target bundleno = 942 (0x3ae), region = 93  ;;  %s4193_s28 = sshll.u32 (%p5040_p9), %s4929_s23, 6  ;;  %v3654_v19 = vld [vmem:[%s5091_s18] sm:$0xf] (%p5040_p9)  ;;  %v3656_v4 = vld [vmem:[%s5091_s18 + $0x4] sm:$0xf] (%p5040_p9) }
 0x398   : > { %s3636_s29 = sadd.s32 (%p5040_p9), %s4925_s22, %s4193_s28  ;;  %v3658_v35 = vld [vmem:[%s5091_s18 + $0x8] sm:$0xf] (%p5040_p9)  ;;  %v3660_v13 = vld [vmem:[%s5091_s18 + $0xc] sm:$0xf] (%p5040_p9)  ;;  %v3662_v14 = vld [vmem:[%s5091_s18 + $0x10] sm:$0xf] (%p5040_p9) }
 0x399   : > { %s4194_s11 = sshll.u32 (%p5040_p9), %s3636_s29, 2  ;;  %v3664_v17 = vld [vmem:[%s5091_s18 + $0x14] sm:$0xf] (%p5040_p9)  ;;  %v3666_v18 = vld [vmem:[%s5091_s18 + $0x18] sm:$0xf] (%p5040_p9) }
 0x39a   : > { %s6289_s20 = scalar_lea.vmem (%p5040_p9), %s6380_s5, %s4194_s11  ;;  %v3668_v22 = vld [vmem:[%s5091_s18 + $0x1c] sm:$0xf] (%p5040_p9)  ;;  %v3670_v9 = vld [vmem:[%s5091_s18 + $0x20] sm:$0xf] (%p5040_p9)  ;;  %v3672_v26 = vld [vmem:[%s5091_s18 + $0x24] sm:$0xf] (%p5040_p9) }
 0x39b   : > { %3655 = vst [vmem:[%s6289_s20] sm:$0xf] (%p5040_p9), %v3654_v19  ;;  %3657 = vst [vmem:[%s6289_s20 + $0x8] sm:$0xf] (%p5040_p9), %v3656_v4  ;;  %v3674_v28 = vld [vmem:[%s5091_s18 + $0x28] sm:$0xf] (%p5040_p9) }
 0x39c   : > { %3659 = vst [vmem:[%s6289_s20 + $0x10] sm:$0xf] (%p5040_p9), %v3658_v35  ;;  %3661 = vst [vmem:[%s6289_s20 + $0x18] sm:$0xf] (%p5040_p9), %v3660_v13  ;;  %v3676_v27 = vld [vmem:[%s5091_s18 + $0x2c] sm:$0xf] (%p5040_p9) }
 0x39d   : > { %3663 = vst [vmem:[%s6289_s20 + $0x20] sm:$0xf] (%p5040_p9), %v3662_v14  ;;  %3665 = vst [vmem:[%s6289_s20 + $0x28] sm:$0xf] (%p5040_p9), %v3664_v17  ;;  %v3678_v12 = vld [vmem:[%s5091_s18 + $0x30] sm:$0xf] (%p5040_p9) }
 0x39e   : > { %3667 = vst [vmem:[%s6289_s20 + $0x30] sm:$0xf] %v3666_v18  ;;  %3669 = vst [vmem:[%s6289_s20 + $0x38] sm:$0xf] %v3668_v22  ;;  %v3680_v33 = vld [vmem:[%s5091_s18 + $0x34] sm:$0xf] }
 0x39f   : > { %3671 = vst [vmem:[%s6289_s20 + $0x40] sm:$0xf] %v3670_v9  ;;  %3673 = vst [vmem:[%s6289_s20 + $0x48] sm:$0xf] %v3672_v26  ;;  %v3682_v57 = vld [vmem:[%s5091_s18 + $0x38] sm:$0xf] }
 0x3a0   : > { %3675 = vst [vmem:[%s6289_s20 + $0x50] sm:$0xf] %v3674_v28  ;;  %3677 = vst [vmem:[%s6289_s20 + $0x58] sm:$0xf] %v3676_v27  ;;  %v3684_v25 = vld [vmem:[%s5091_s18 + $0x3c] sm:$0xf] }
 0x3a1   : > { %3679 = vst [vmem:[%s6289_s20 + $0x60] sm:$0xf] %v3678_v12  ;;  %3681 = vst [vmem:[%s6289_s20 + $0x68] sm:$0xf] %v3680_v33  ;;  %v3686_v1 = vld [vmem:[%s5091_s18 + $0x40] sm:$0xf] }
 0x3a2   : > { %3683 = vst [vmem:[%s6289_s20 + $0x70] sm:$0xf] %v3682_v57  ;;  %3685 = vst [vmem:[%s6289_s20 + $0x78] sm:$0xf] %v3684_v25  ;;  %v3688_v37 = vld [vmem:[%s5091_s18 + $0x44] sm:$0xf] }
 0x3a3   : > { %v3690_v39 = vld [vmem:[%s5091_s18 + $0x48] sm:$0xf]  ;;  %3687 = vst [vmem:[%s6289_s20 + $0x80] sm:$0xf] %v3686_v1  ;;  %3689 = vst [vmem:[%s6289_s20 + $0x88] sm:$0xf] %v3688_v37 }
 0x3a4   : > { %3691 = vst [vmem:[%s6289_s20 + $0x90] sm:$0xf] %v3690_v39  ;;  %v3692_v6 = vld [vmem:[%s5091_s18 + $0x4c] sm:$0xf]  ;;  %v3694_v45 = vld [vmem:[%s5091_s18 + $0x50] sm:$0xf] }
 0x3a5   : > { %v3696_v41 = vld [vmem:[%s5091_s18 + $0x54] sm:$0xf]  ;;  %3693 = vst [vmem:[%s6289_s20 + $0x98] sm:$0xf] %v3692_v6  ;;  %3695 = vst [vmem:[%s6289_s20 + $0xa0] sm:$0xf] %v3694_v45 }
 0x3a6   : > { %3697 = vst [vmem:[%s6289_s20 + $0xa8] sm:$0xf] %v3696_v41  ;;  %v3698_v48 = vld [vmem:[%s5091_s18 + $0x58] sm:$0xf]  ;;  %v3700_v11 = vld [vmem:[%s5091_s18 + $0x5c] sm:$0xf] }
 0x3a7   : > { %v3702_v23 = vld [vmem:[%s5091_s18 + $0x60] sm:$0xf]  ;;  %3699 = vst [vmem:[%s6289_s20 + $0xb0] sm:$0xf] %v3698_v48  ;;  %3701 = vst [vmem:[%s6289_s20 + $0xb8] sm:$0xf] %v3700_v11 }
 0x3a8   : > { %3703 = vst [vmem:[%s6289_s20 + $0xc0] sm:$0xf] %v3702_v23  ;;  %v3704_v43 = vld [vmem:[%s5091_s18 + $0x64] sm:$0xf]  ;;  %v3706_v46 = vld [vmem:[%s5091_s18 + $0x68] sm:$0xf] }
 0x3a9   : > { %v3708_v47 = vld [vmem:[%s5091_s18 + $0x6c] sm:$0xf]  ;;  %3705 = vst [vmem:[%s6289_s20 + $0xc8] sm:$0xf] %v3704_v43  ;;  %3707 = vst [vmem:[%s6289_s20 + $0xd0] sm:$0xf] %v3706_v46 }
 0x3aa   : > { %3709 = vst [vmem:[%s6289_s20 + $0xd8] sm:$0xf] %v3708_v47  ;;  %v3710_v44 = vld [vmem:[%s5091_s18 + $0x70] sm:$0xf]  ;;  %v3712_v24 = vld [vmem:[%s5091_s18 + $0x74] sm:$0xf] }
 0x3ab   : > { %v3714_v49 = vld [vmem:[%s5091_s18 + $0x78] sm:$0xf]  ;;  %3711 = vst [vmem:[%s6289_s20 + $0xe0] sm:$0xf] %v3710_v44  ;;  %3713 = vst [vmem:[%s6289_s20 + $0xe8] sm:$0xf] %v3712_v24 }
 0x3ac   : > { %3715 = vst [vmem:[%s6289_s20 + $0xf0] sm:$0xf] %v3714_v49  ;;  %v3716_v61 = vld [vmem:[%s5091_s18 + $0x7c] sm:$0xf] }
 0x3ad   : > { %3717 = vst [vmem:[%s6289_s20 + $0xf8] sm:$0xf] %v3716_v61 }
 0x3ae PF: > { %s15_s26 = sadd.s32 1, %s4941_s26   ;;  %s6388_s6 = sld [smem:[#allocation5_spill]] }
 0x3af   : > { %p12_p4 = scmp.ge.s32.totalorder %s15_s26, 6   ;;  %s6389_s7 = sld [smem:[#allocation6_spill]] }
 0x3b0   : > { %s6390_s18 = smov %s4913_s19  ;;  %s6391_s19 = smov %s5045_s12 }
 0x3b1   : > { %s6392_s20 = smov %s4921_s21  ;;  %s6393_s21 = smov %s5034_s8 }
 0x3b2   : > { %s6394_s22 = smov %s4933_s24  ;;  %s6395_s23 = smov %s4937_s25 }
 0x3b3   :  { %14 = sbr.rel (!%p12_p4) target bundleno = 7 (0x7), region = 184 }
 0x3b4   : > { %s6396_s24 = smov %s6388_s6 }
 0x3b5   : > { %s6397_s25 = smov %s6389_s7 }

</bundles_post_ra>
